<compile_context>
chip_gen: v7x
topology: tpu7x:2x2x1
jax: 0.10.0
libtpu: 0.0.40
codegen_flags: <defaults>
</compile_context>

<pallas_src>
import functools
import math

import jax
import jax.numpy as jnp
from jax.experimental import pallas as pl
from jax.experimental.pallas import tpu as pltpu


def _round_up(v, m):
    return (v + m - 1) // m * m


# --------------------------------------------------------------------------- #
# Fused BasicBlockHeartNet kernel (one batch element per grid step).
# --------------------------------------------------------------------------- #
def _block_kernel(x_ref, w1_ref, s1_ref, b1_ref, w2_ref, s2_ref, b2_ref, *rest,
                  K, S, L, L1, Cin, Cmid, Cout, pad, has_ds, chunk):
    """Cin / Cmid below are the lane-padded (128-multiple) channel counts.

    x_ref  : (1, L, Cin)         f32   block input (zero-padded channels)
    w1_ref : (K*Cin, Cmid)       bf16  conv1 im2col weights (tap-major rows)
    s1/b1  : (1, Cin)            f32   folded bn1 scale / shift
    w2_ref : (K*Cmid, Cout)      bf16  conv2 im2col weights
    s2/b2  : (1, Cmid)           f32   folded bn2 scale / shift
    wd_ref : (Cin, Cout)         bf16  downsample 1x1 weight * bn scale (folded)
    bd_ref : (1, Cout)           f32   downsample bn shift
    o_ref  : (1, L1, Cout)       f32
    hp1    : (L  + 2*pad, Cin)   bf16  scratch: zero-padded relu(bn1(x))
    hp2    : (L1 + 2*pad, Cmid)  bf16  scratch: zero-padded relu(bn2(conv1))
    """
    if has_ds:
        wd_ref, bd_ref, o_ref, hp1, hp2 = rest
    else:
        o_ref, hp1, hp2 = rest

    # ---- bn1 + relu (f32 VPU math), one bf16 cast, one aligned full store ----
    h1 = jnp.maximum(x_ref[0] * s1_ref[...] + b1_ref[...], 0.0).astype(jnp.bfloat16)
    zc1 = jnp.zeros((pad, Cin), jnp.bfloat16)
    hp1[...] = jnp.concatenate([zc1, h1, zc1], axis=0)   # each row stored once

    # hp2: halo-only zeroing; the interior is written per conv1 output chunk.
    zc2 = jnp.zeros((pad, Cmid), jnp.bfloat16)
    hp2[pl.ds(0, pad), :] = zc2
    hp2[pl.ds(pad + L1, pad), :] = zc2

    def conv(hp_ref, w_ref, stride, C, Co, store_fn):
        """out[l, co] = sum_{k,c} hp[stride*l + k, c] * w[k*C + c, co].

        Taps are grouped so each MXU dot has contraction depth >= 512 (bf16
        activations straight from scratch, bf16 weights, f32 accumulation);
        the Lout-chunk loop bounds the live f32 accumulator.
        """
        G = max(1, min(K, 512 // C)) if C % 128 == 0 else 1
        for c0 in range(0, L1, chunk):                    # static -> unrolled
            ch = min(chunk, L1 - c0)
            acc = jnp.zeros((ch, Co), jnp.float32)
            for g0 in range(0, K, G):
                ng = min(G, K - g0)
                taps = []
                for k in range(g0, g0 + ng):
                    start = stride * c0 + k
                    if stride == 1:
                        taps.append(hp_ref[pl.ds(start, ch), :])
                    else:
                        taps.append(hp_ref[pl.ds(start, ch, stride=stride), :])
                a = taps[0] if ng == 1 else jnp.concatenate(taps, axis=-1)
                acc = acc + jnp.dot(a, w_ref[pl.ds(g0 * C, ng * C), :],
                                    preferred_element_type=jnp.float32)
            store_fn(c0, ch, acc)

    # ---- conv1 -> bn2 + relu -> hp2 interior (bf16, stays in VMEM) ----
    def store1(c0, ch, acc):
        h2 = jnp.maximum(acc * s2_ref[...] + b2_ref[...], 0.0)
        hp2[pl.ds(pad + c0, ch), :] = h2.astype(jnp.bfloat16)

    conv(hp1, w1_ref, S, Cin, Cmid, store1)

    # ---- conv2 + identity path, lane-dense output store ----
    def store2(c0, ch, acc):
        if has_ds:
            # downsample = bn(conv1x1(x)) then F.max_pool1d(., S):
            # one contiguous (S*ch, Cin) x (Cin, Cout) matmul (bn scale folded
            # into the weight), then a reshape + max over the S stride phases.
            xr = x_ref[0, pl.ds(S * c0, S * ch), :]
            y = jnp.dot(xr.astype(jnp.bfloat16), wd_ref[...],
                        preferred_element_type=jnp.float32) + bd_ref[...]
            ident = y if S == 1 else jnp.max(y.reshape(ch, S, Cout), axis=1)
        else:
            # no downsample => stride == 1; F.max_pool1d(x, 1) == x.
            xr = x_ref[0, pl.ds(c0, ch), :]
            ident = xr if Cin == Cout else xr[:, :Cout]
        o_ref[0, pl.ds(c0, ch), :] = (acc + ident).astype(o_ref.dtype)

    conv(hp2, w2_ref, 1, Cmid, Cout, store2)


# --------------------------------------------------------------------------- #
# Host-side wrapper (torch NCL layout in/out, folds BN, packs/pads weights).
# --------------------------------------------------------------------------- #
def _fold_bn(bn, eps=1e-5):
    sc = bn["gamma"] * jax.lax.rsqrt(bn["var"] + eps)
    sh = bn["beta"] - bn["mean"] * sc
    return sc.reshape(1, -1), sh.reshape(1, -1)


def _pad_last(a, target):
    extra = target - a.shape[-1]
    if extra == 0:
        return a
    return jnp.pad(a, [(0, 0)] * (a.ndim - 1) + [(0, extra)])


def _const_spec(shape):
    """Grid-invariant operand: single-buffered when the API supports it."""
    idx = lambda n: (0,) * len(shape)
    if hasattr(pl, "Buffered"):
        try:
            return pl.BlockSpec(shape, idx, pipeline_mode=pl.Buffered(1))
        except TypeError:
            pass
    return pl.BlockSpec(shape, idx)


def basic_block_forward(x_ncl, p, *, stride):
    N, Cin, L = x_ncl.shape
    w1, w2 = p["conv1_w"], p["conv2_w"]
    Cmid, K = w1.shape[0], w1.shape[2]
    Cout = w2.shape[0]
    pad = (K - 1) // 2
    has_ds = "ds_conv_w" in p
    L1 = (L + 2 * pad - K) // stride + 1

    assert L % 8 == 0, "length must be a multiple of 8 (sublane tiling)"
    if has_ds:
        assert L % stride == 0 and L // stride == L1
    else:
        assert stride == 1 and Cin == Cout

    # Lane-align channels: zero-pad Cin / Cmid to 128-multiples (zero channels
    # + zero weight rows/cols -> identical math, lane-dense vregs, 512-deep dots
    # even for the Cin=64 configuration).
    Cin_p = _round_up(Cin, 128)
    Cmid_p = _round_up(Cmid, 128)

    x = jnp.transpose(x_ncl, (0, 2, 1))                       # NCL -> NLC once
    x = _pad_last(x, Cin_p)

    s1, b1 = _fold_bn(p["bn1"])
    s2, b2 = _fold_bn(p["bn2"])
    s1, b1 = _pad_last(s1, Cin_p), _pad_last(b1, Cin_p)
    s2, b2 = _pad_last(s2, Cmid_p), _pad_last(b2, Cmid_p)

    # im2col weights: tap-major rows, channel-minor columns; bf16 for the MXU.
    w1_kio = jnp.pad(jnp.transpose(w1, (2, 1, 0)),            # (K, Cin, Cmid)
                     ((0, 0), (0, Cin_p - Cin), (0, Cmid_p - Cmid)))
    w1col = w1_kio.reshape(K * Cin_p, Cmid_p).astype(jnp.bfloat16)
    w2_kio = jnp.pad(jnp.transpose(w2, (2, 1, 0)),            # (K, Cmid, Cout)
                     ((0, 0), (0, Cmid_p - Cmid), (0, 0)))
    w2col = w2_kio.reshape(K * Cmid_p, Cout).astype(jnp.bfloat16)

    operands = [x, w1col, s1, b1, w2col, s2, b2]
    in_specs = [
        pl.BlockSpec((1, L, Cin_p), lambda n: (n, 0, 0)),
        _const_spec((K * Cin_p, Cmid_p)),
        _const_spec((1, Cin_p)),
        _const_spec((1, Cin_p)),
        _const_spec((K * Cmid_p, Cout)),
        _const_spec((1, Cmid_p)),
        _const_spec((1, Cmid_p)),
    ]
    if has_ds:
        sd, bd = _fold_bn(p["ds_bn"])
        wd = jnp.transpose(p["ds_conv_w"][:, :, 0], (1, 0)) * sd   # fold bn scale
        wd = jnp.pad(wd, ((0, Cin_p - Cin), (0, 0))).astype(jnp.bfloat16)
        operands += [wd, bd]
        in_specs += [_const_spec((Cin_p, Cout)), _const_spec((1, Cout))]

    # Bound the live f32 accumulator: chunk_rows * Cout * 4B <= ~128 KiB.
    chunk = min(L1, max(8, (32768 // max(Cmid_p, Cout)) // 8 * 8))

    # Explicit VMEM budget: bf16 scratches + single-buffered weights +
    # double-buffered x / out tiles, plus headroom.
    vmem_bytes = (
        2 * L * Cin_p * 4 + 2 * L1 * Cout * 4
        + K * Cin_p * Cmid_p * 2 + K * Cmid_p * Cout * 2
        + (Cin_p * Cout * 2 if has_ds else 0)
        + (L + 2 * pad) * Cin_p * 2 + (L1 + 2 * pad) * Cmid_p * 2)
    vmem_limit = int(min(max(2 * vmem_bytes + (4 << 20), 32 << 20), 120 << 20))

    out = pl.pallas_call(
        functools.partial(_block_kernel, K=K, S=stride, L=L, L1=L1,
                          Cin=Cin_p, Cmid=Cmid_p, Cout=Cout, pad=pad,
                          has_ds=has_ds, chunk=chunk),
        out_shape=jax.ShapeDtypeStruct((N, L1, Cout), jnp.float32),
        grid=(N,),
        in_specs=in_specs,
        out_specs=pl.BlockSpec((1, L1, Cout), lambda n: (n, 0, 0)),
        scratch_shapes=[
            pltpu.VMEM((L + 2 * pad, Cin_p), jnp.bfloat16),    # padded bn1+relu(x)
            pltpu.VMEM((L1 + 2 * pad, Cmid_p), jnp.bfloat16),  # padded bn2+relu(conv1)
        ],
        compiler_params=pltpu.CompilerParams(
            dimension_semantics=("parallel",),                 # batch across TCs
            vmem_limit_bytes=vmem_limit),
    )(*operands)
    # TODO(synk): for very long ECG records (L >> 4k) add an L-tile grid axis
    # with a (stride+1)*pad input halo so the scratches / x tile stop scaling
    # with L (v7x TensorCores only have 64 MiB VMEM); not needed at these shapes.
    return jnp.transpose(out, (0, 2, 1))                       # back to torch NCL


# --------------------------------------------------------------------------- #
# Deterministic parameters (mirrors the module's init; BN stats randomized so
# the correctness check exercises the scale/shift path).
# --------------------------------------------------------------------------- #
def _kaiming_conv(key, cout, cin, k):
    std = math.sqrt(2.0 / (cout * k))        # kaiming_normal_, fan_out, relu
    return std * jax.random.normal(key, (cout, cin, k), jnp.float32)


def _rand_bn(key, c):
    k1, k2, k3, k4 = jax.random.split(key, 4)
    return dict(gamma=jax.random.uniform(k1, (c,), jnp.float32, 0.5, 1.5),
                beta=0.1 * jax.random.normal(k2, (c,), jnp.float32),
                mean=0.1 * jax.random.normal(k3, (c,), jnp.float32),
                var=jax.random.uniform(k4, (c,), jnp.float32, 0.5, 1.5))


def init_block_params(key, inplanes, planes, downsample):
    ks = jax.random.split(key, 6)
    p = dict(bn1=_rand_bn(ks[0], inplanes),
             conv1_w=_kaiming_conv(ks[1], planes, inplanes, 17),
             bn2=_rand_bn(ks[2], planes),
             conv2_w=_kaiming_conv(ks[3], planes, planes, 17))
    if downsample:
        p["ds_conv_w"] = _kaiming_conv(ks[4], planes, inplanes, 1)
        p["ds_bn"] = _rand_bn(ks[5], planes)
    return p


# --------------------------------------------------------------------------- #
# Pure-JAX reference (mirrors the kernel's bf16 quantization of matmul inputs).
# --------------------------------------------------------------------------- #
def _q(t):
    return t.astype(jnp.bfloat16).astype(jnp.float32)


def _conv1d_ref(x_nlc, w_torch, stride, pad):
    w = jnp.transpose(w_torch, (2, 1, 0))                     # (K, Cin, Cout) WIO
    return jax.lax.conv_general_dilated(
        _q(x_nlc), _q(w), window_strides=(stride,), padding=[(pad, pad)],
        dimension_numbers=("NWC", "WIO", "NWC"),
        precision=jax.lax.Precision.HIGHEST)


def _bn_ref(t, bn, relu):
    sc, sh = _fold_bn(bn)
    y = t * sc + sh
    return jnp.maximum(y, 0.0) if relu else y


def basic_block_ref(x_ncl, p, *, stride):
    x = jnp.transpose(x_ncl, (0, 2, 1))
    out = _bn_ref(x, p["bn1"], True)
    out = _conv1d_ref(out, p["conv1_w"], stride, 8)
    out = _bn_ref(out, p["bn2"], True)
    out = _conv1d_ref(out, p["conv2_w"], 1, 8)
    if "ds_conv_w" in p:
        ident = _conv1d_ref(x, p["ds_conv_w"], 1, 0)
        ident = _bn_ref(ident, p["ds_bn"], False)
        if stride > 1:                                        # F.max_pool1d(., stride)
            N, L, C = ident.shape
            ident = ident[:, :(L // stride) * stride, :]
            ident = ident.reshape(N, L // stride, stride, C).max(axis=2)
    else:
        ident = x                                             # F.max_pool1d(x, 1) == x
    return jnp.transpose(out + ident, (0, 2, 1))


# --------------------------------------------------------------------------- #
if __name__ == "__main__":
    key = jax.random.PRNGKey(0)
    configs = [
        # (inplanes, planes, stride, downsample, L, N)
        dict(inplanes=128, planes=128, stride=1, downsample=False, L=64, N=2),
        dict(inplanes=64,  planes=128, stride=2, downsample=True,  L=64, N=2),
    ]
    for cfg in configs:
        key, pk, xk = jax.random.split(key, 3)
        params = init_block_params(pk, cfg["inplanes"], cfg["planes"],
                                   cfg["downsample"])
        x = jax.random.normal(xk, (cfg["N"], cfg["inplanes"], cfg["L"]),
                              jnp.float32)                    # torch NCL layout

        fwd = jax.jit(functools.partial(basic_block_forward, stride=cfg["stride"]))
        out = jax.block_until_ready(fwd(x, params))

        ref = basic_block_ref(x, params, stride=cfg["stride"])
        assert out.shape == ref.shape, (out.shape, ref.shape)
        # bf16 MXU inputs + f32 accumulation; the only mismatches vs. the
        # bf16-quantized reference are accumulation order and the bn-scale
        # fold into the bf16 downsample weight (both << tolerance).
        if not jnp.allclose(out, ref, atol=2e-2, rtol=2e-2):
            err = float(jnp.max(jnp.abs(out - ref)))
            raise AssertionError(f"Pallas mismatch (cfg={cfg}), max abs err {err}")
    print("KERNEL_OK")
</pallas_src>

<mosaic_0001>
module attributes {stable_mosaic.version = 11 : i64} {
  func.func @_block_kernel(%arg0: i32, %arg1: memref<1x64x128xf32, #tpu.memory_space<vmem>>, %arg2: memref<2176x128xbf16, #tpu.memory_space<vmem>>, %arg3: memref<1x128xf32, #tpu.memory_space<vmem>>, %arg4: memref<1x128xf32, #tpu.memory_space<vmem>>, %arg5: memref<2176x128xbf16, #tpu.memory_space<vmem>>, %arg6: memref<1x128xf32, #tpu.memory_space<vmem>>, %arg7: memref<1x128xf32, #tpu.memory_space<vmem>>, %arg8: memref<1x64x128xf32, #tpu.memory_space<vmem>>, %arg9: memref<80x128xbf16, #tpu.memory_space<vmem>>, %arg10: memref<80x128xbf16, #tpu.memory_space<vmem>>) attributes {dimension_semantics = [#tpu.dimension_semantics<parallel>], iteration_bounds = array<i64: 2>, scalar_prefetch = 0 : i64, scratch_operands = 2 : i64, tpu.core_type = #tpu.core_type<tc>, window_params = [{transform_indices = @transform_0, window_bounds = array<i64: 1, 64, 128>}, {pipeline_mode = #tpu.pipeline_mode<synchronous>, transform_indices = @transform_1, window_bounds = array<i64: 2176, 128>}, {pipeline_mode = #tpu.pipeline_mode<synchronous>, transform_indices = @transform_2, window_bounds = array<i64: 1, 128>}, {pipeline_mode = #tpu.pipeline_mode<synchronous>, transform_indices = @transform_3, window_bounds = array<i64: 1, 128>}, {pipeline_mode = #tpu.pipeline_mode<synchronous>, transform_indices = @transform_4, window_bounds = array<i64: 2176, 128>}, {pipeline_mode = #tpu.pipeline_mode<synchronous>, transform_indices = @transform_5, window_bounds = array<i64: 1, 128>}, {pipeline_mode = #tpu.pipeline_mode<synchronous>, transform_indices = @transform_6, window_bounds = array<i64: 1, 128>}, {transform_indices = @transform_7, window_bounds = array<i64: 1, 64, 128>}]} {
    %c0 = arith.constant 0 : index
    %c0_0 = arith.constant 0 : index
    %c0_1 = arith.constant 0 : index
    %0 = vector.load %arg1[%c0, %c0_0, %c0_1] : memref<1x64x128xf32, #tpu.memory_space<vmem>>, vector<1x64x128xf32>
    %1 = vector.shape_cast %0 : vector<1x64x128xf32> to vector<64x128xf32>
    %c0_2 = arith.constant 0 : index
    %c0_3 = arith.constant 0 : index
    %2 = vector.load %arg3[%c0_2, %c0_3] : memref<1x128xf32, #tpu.memory_space<vmem>>, vector<1x128xf32>
    %3 = vector.broadcast %2 : vector<1x128xf32> to vector<64x128xf32>
    %4 = arith.mulf %1, %3 : vector<64x128xf32>
    %c0_4 = arith.constant 0 : index
    %c0_5 = arith.constant 0 : index
    %5 = vector.load %arg4[%c0_4, %c0_5] : memref<1x128xf32, #tpu.memory_space<vmem>>, vector<1x128xf32>
    %6 = vector.broadcast %5 : vector<1x128xf32> to vector<64x128xf32>
    %7 = arith.addf %4, %6 : vector<64x128xf32>
    %cst = arith.constant 0.000000e+00 : f32
    %8 = vector.broadcast %cst : f32 to vector<64x128xf32>
    %9 = arith.maximumf %7, %8 : vector<64x128xf32>
    %10 = arith.truncf %9 : vector<64x128xf32> to vector<64x128xbf16>
    %cst_6 = arith.constant 0.000000e+00 : bf16
    %11 = vector.broadcast %cst_6 : bf16 to vector<8x128xbf16>
    %12 = tpu.concatenate %11, %10, %11 in 0 : vector<8x128xbf16>, vector<64x128xbf16>, vector<8x128xbf16> -> vector<80x128xbf16>
    %c0_7 = arith.constant 0 : index
    %c0_8 = arith.constant 0 : index
    %13 = vector.load %arg9[%c0_7, %c0_8] : memref<80x128xbf16, #tpu.memory_space<vmem>>, vector<80x128xbf16>
    tpu.vector_store %arg9[%c0_7, %c0_8], %12 {strides = array<i32>} : memref<80x128xbf16, #tpu.memory_space<vmem>>, vector<80x128xbf16>,
    %cst_9 = arith.constant 0.000000e+00 : bf16
    %14 = vector.broadcast %cst_9 : bf16 to vector<8x128xbf16>
    %c0_10 = arith.constant 0 : index
    %c0_11 = arith.constant 0 : index
    %15 = vector.load %arg10[%c0_10, %c0_11] : memref<80x128xbf16, #tpu.memory_space<vmem>>, vector<8x128xbf16>
    tpu.vector_store %arg10[%c0_10, %c0_11], %14 {strides = array<i32>} : memref<80x128xbf16, #tpu.memory_space<vmem>>, vector<8x128xbf16>,
    %c72 = arith.constant 72 : index
    %c0_12 = arith.constant 0 : index
    %16 = vector.load %arg10[%c72, %c0_12] : memref<80x128xbf16, #tpu.memory_space<vmem>>, vector<8x128xbf16>
    tpu.vector_store %arg10[%c72, %c0_12], %14 {strides = array<i32>} : memref<80x128xbf16, #tpu.memory_space<vmem>>, vector<8x128xbf16>,
    %cst_13 = arith.constant 0.000000e+00 : f32
    %17 = vector.broadcast %cst_13 : f32 to vector<64x128xf32>
    %c0_14 = arith.constant 0 : index
    %c0_15 = arith.constant 0 : index
    %18 = vector.load %arg9[%c0_14, %c0_15] : memref<80x128xbf16, #tpu.memory_space<vmem>>, vector<64x128xbf16>
    %c1 = arith.constant 1 : index
    %c0_16 = arith.constant 0 : index
    %19 = vector.load %arg9[%c1, %c0_16] : memref<80x128xbf16, #tpu.memory_space<vmem>>, vector<64x128xbf16>
    %c2 = arith.constant 2 : index
    %c0_17 = arith.constant 0 : index
    %20 = vector.load %arg9[%c2, %c0_17] : memref<80x128xbf16, #tpu.memory_space<vmem>>, vector<64x128xbf16>
    %c3 = arith.constant 3 : index
    %c0_18 = arith.constant 0 : index
    %21 = vector.load %arg9[%c3, %c0_18] : memref<80x128xbf16, #tpu.memory_space<vmem>>, vector<64x128xbf16>
    %22 = tpu.concatenate %18, %19, %20, %21 in 1 : vector<64x128xbf16>, vector<64x128xbf16>, vector<64x128xbf16>, vector<64x128xbf16> -> vector<64x512xbf16>
    %c0_19 = arith.constant 0 : index
    %c0_20 = arith.constant 0 : index
    %23 = vector.load %arg2[%c0_19, %c0_20] : memref<2176x128xbf16, #tpu.memory_space<vmem>>, vector<512x128xbf16>
    %cst_21 = arith.constant dense<0.000000e+00> : vector<64x128xf32>
    %24 = tpu.matmul %22, %23, %cst_21 {dimension_numbers = #tpu.dot_dimension_numbers<[1], [0], [0], [1], [0, 0, 1, 1], [], []>} : vector<64x512xbf16>, vector<512x128xbf16>, vector<64x128xf32> -> vector<64x128xf32>
    %25 = arith.addf %17, %24 : vector<64x128xf32>
    %c4 = arith.constant 4 : index
    %c0_22 = arith.constant 0 : index
    %26 = vector.load %arg9[%c4, %c0_22] : memref<80x128xbf16, #tpu.memory_space<vmem>>, vector<64x128xbf16>
    %c5 = arith.constant 5 : index
    %c0_23 = arith.constant 0 : index
    %27 = vector.load %arg9[%c5, %c0_23] : memref<80x128xbf16, #tpu.memory_space<vmem>>, vector<64x128xbf16>
    %c6 = arith.constant 6 : index
    %c0_24 = arith.constant 0 : index
    %28 = vector.load %arg9[%c6, %c0_24] : memref<80x128xbf16, #tpu.memory_space<vmem>>, vector<64x128xbf16>
    %c7 = arith.constant 7 : index
    %c0_25 = arith.constant 0 : index
    %29 = vector.load %arg9[%c7, %c0_25] : memref<80x128xbf16, #tpu.memory_space<vmem>>, vector<64x128xbf16>
    %30 = tpu.concatenate %26, %27, %28, %29 in 1 : vector<64x128xbf16>, vector<64x128xbf16>, vector<64x128xbf16>, vector<64x128xbf16> -> vector<64x512xbf16>
    %c512 = arith.constant 512 : index
    %c0_26 = arith.constant 0 : index
    %31 = vector.load %arg2[%c512, %c0_26] : memref<2176x128xbf16, #tpu.memory_space<vmem>>, vector<512x128xbf16>
    %cst_27 = arith.constant dense<0.000000e+00> : vector<64x128xf32>
    %32 = tpu.matmul %30, %31, %cst_27 {dimension_numbers = #tpu.dot_dimension_numbers<[1], [0], [0], [1], [0, 0, 1, 1], [], []>} : vector<64x512xbf16>, vector<512x128xbf16>, vector<64x128xf32> -> vector<64x128xf32>
    %33 = arith.addf %25, %32 : vector<64x128xf32>
    %c8 = arith.constant 8 : index
    %c0_28 = arith.constant 0 : index
    %34 = vector.load %arg9[%c8, %c0_28] : memref<80x128xbf16, #tpu.memory_space<vmem>>, vector<64x128xbf16>
    %c9 = arith.constant 9 : index
    %c0_29 = arith.constant 0 : index
    %35 = vector.load %arg9[%c9, %c0_29] : memref<80x128xbf16, #tpu.memory_space<vmem>>, vector<64x128xbf16>
    %c10 = arith.constant 10 : index
    %c0_30 = arith.constant 0 : index
    %36 = vector.load %arg9[%c10, %c0_30] : memref<80x128xbf16, #tpu.memory_space<vmem>>, vector<64x128xbf16>
    %c11 = arith.constant 11 : index
    %c0_31 = arith.constant 0 : index
    %37 = vector.load %arg9[%c11, %c0_31] : memref<80x128xbf16, #tpu.memory_space<vmem>>, vector<64x128xbf16>
    %38 = tpu.concatenate %34, %35, %36, %37 in 1 : vector<64x128xbf16>, vector<64x128xbf16>, vector<64x128xbf16>, vector<64x128xbf16> -> vector<64x512xbf16>
    %c1024 = arith.constant 1024 : index
    %c0_32 = arith.constant 0 : index
    %39 = vector.load %arg2[%c1024, %c0_32] : memref<2176x128xbf16, #tpu.memory_space<vmem>>, vector<512x128xbf16>
    %cst_33 = arith.constant dense<0.000000e+00> : vector<64x128xf32>
    %40 = tpu.matmul %38, %39, %cst_33 {dimension_numbers = #tpu.dot_dimension_numbers<[1], [0], [0], [1], [0, 0, 1, 1], [], []>} : vector<64x512xbf16>, vector<512x128xbf16>, vector<64x128xf32> -> vector<64x128xf32>
    %41 = arith.addf %33, %40 : vector<64x128xf32>
    %c12 = arith.constant 12 : index
    %c0_34 = arith.constant 0 : index
    %42 = vector.load %arg9[%c12, %c0_34] : memref<80x128xbf16, #tpu.memory_space<vmem>>, vector<64x128xbf16>
    %c13 = arith.constant 13 : index
    %c0_35 = arith.constant 0 : index
    %43 = vector.load %arg9[%c13, %c0_35] : memref<80x128xbf16, #tpu.memory_space<vmem>>, vector<64x128xbf16>
    %c14 = arith.constant 14 : index
    %c0_36 = arith.constant 0 : index
    %44 = vector.load %arg9[%c14, %c0_36] : memref<80x128xbf16, #tpu.memory_space<vmem>>, vector<64x128xbf16>
    %c15 = arith.constant 15 : index
    %c0_37 = arith.constant 0 : index
    %45 = vector.load %arg9[%c15, %c0_37] : memref<80x128xbf16, #tpu.memory_space<vmem>>, vector<64x128xbf16>
    %46 = tpu.concatenate %42, %43, %44, %45 in 1 : vector<64x128xbf16>, vector<64x128xbf16>, vector<64x128xbf16>, vector<64x128xbf16> -> vector<64x512xbf16>
    %c1536 = arith.constant 1536 : index
    %c0_38 = arith.constant 0 : index
    %47 = vector.load %arg2[%c1536, %c0_38] : memref<2176x128xbf16, #tpu.memory_space<vmem>>, vector<512x128xbf16>
    %cst_39 = arith.constant dense<0.000000e+00> : vector<64x128xf32>
    %48 = tpu.matmul %46, %47, %cst_39 {dimension_numbers = #tpu.dot_dimension_numbers<[1], [0], [0], [1], [0, 0, 1, 1], [], []>} : vector<64x512xbf16>, vector<512x128xbf16>, vector<64x128xf32> -> vector<64x128xf32>
    %49 = arith.addf %41, %48 : vector<64x128xf32>
    %c16 = arith.constant 16 : index
    %c0_40 = arith.constant 0 : index
    %50 = vector.load %arg9[%c16, %c0_40] : memref<80x128xbf16, #tpu.memory_space<vmem>>, vector<64x128xbf16>
    %c2048 = arith.constant 2048 : index
    %c0_41 = arith.constant 0 : index
    %51 = vector.load %arg2[%c2048, %c0_41] : memref<2176x128xbf16, #tpu.memory_space<vmem>>, vector<128x128xbf16>
    %cst_42 = arith.constant dense<0.000000e+00> : vector<64x128xf32>
    %52 = tpu.matmul %50, %51, %cst_42 {dimension_numbers = #tpu.dot_dimension_numbers<[1], [0], [0], [1], [0, 0, 1, 1], [], []>} : vector<64x128xbf16>, vector<128x128xbf16>, vector<64x128xf32> -> vector<64x128xf32>
    %53 = arith.addf %49, %52 : vector<64x128xf32>
    %c0_43 = arith.constant 0 : index
    %c0_44 = arith.constant 0 : index
    %54 = vector.load %arg6[%c0_43, %c0_44] : memref<1x128xf32, #tpu.memory_space<vmem>>, vector<1x128xf32>
    %55 = vector.broadcast %54 : vector<1x128xf32> to vector<64x128xf32>
    %56 = arith.mulf %53, %55 : vector<64x128xf32>
    %c0_45 = arith.constant 0 : index
    %c0_46 = arith.constant 0 : index
    %57 = vector.load %arg7[%c0_45, %c0_46] : memref<1x128xf32, #tpu.memory_space<vmem>>, vector<1x128xf32>
    %58 = vector.broadcast %57 : vector<1x128xf32> to vector<64x128xf32>
    %59 = arith.addf %56, %58 : vector<64x128xf32>
    %cst_47 = arith.constant 0.000000e+00 : f32
    %60 = vector.broadcast %cst_47 : f32 to vector<64x128xf32>
    %61 = arith.maximumf %59, %60 : vector<64x128xf32>
    %62 = arith.truncf %61 : vector<64x128xf32> to vector<64x128xbf16>
    %c8_48 = arith.constant 8 : index
    %c0_49 = arith.constant 0 : index
    %63 = vector.load %arg10[%c8_48, %c0_49] : memref<80x128xbf16, #tpu.memory_space<vmem>>, vector<64x128xbf16>
    tpu.vector_store %arg10[%c8_48, %c0_49], %62 {strides = array<i32>} : memref<80x128xbf16, #tpu.memory_space<vmem>>, vector<64x128xbf16>,
    %cst_50 = arith.constant 0.000000e+00 : f32
    %64 = vector.broadcast %cst_50 : f32 to vector<64x128xf32>
    %c0_51 = arith.constant 0 : index
    %c0_52 = arith.constant 0 : index
    %65 = vector.load %arg10[%c0_51, %c0_52] : memref<80x128xbf16, #tpu.memory_space<vmem>>, vector<64x128xbf16>
    %c1_53 = arith.constant 1 : index
    %c0_54 = arith.constant 0 : index
    %66 = vector.load %arg10[%c1_53, %c0_54] : memref<80x128xbf16, #tpu.memory_space<vmem>>, vector<64x128xbf16>
    %c2_55 = arith.constant 2 : index
    %c0_56 = arith.constant 0 : index
    %67 = vector.load %arg10[%c2_55, %c0_56] : memref<80x128xbf16, #tpu.memory_space<vmem>>, vector<64x128xbf16>
    %c3_57 = arith.constant 3 : index
    %c0_58 = arith.constant 0 : index
    %68 = vector.load %arg10[%c3_57, %c0_58] : memref<80x128xbf16, #tpu.memory_space<vmem>>, vector<64x128xbf16>
    %69 = tpu.concatenate %65, %66, %67, %68 in 1 : vector<64x128xbf16>, vector<64x128xbf16>, vector<64x128xbf16>, vector<64x128xbf16> -> vector<64x512xbf16>
    %c0_59 = arith.constant 0 : index
    %c0_60 = arith.constant 0 : index
    %70 = vector.load %arg5[%c0_59, %c0_60] : memref<2176x128xbf16, #tpu.memory_space<vmem>>, vector<512x128xbf16>
    %cst_61 = arith.constant dense<0.000000e+00> : vector<64x128xf32>
    %71 = tpu.matmul %69, %70, %cst_61 {dimension_numbers = #tpu.dot_dimension_numbers<[1], [0], [0], [1], [0, 0, 1, 1], [], []>} : vector<64x512xbf16>, vector<512x128xbf16>, vector<64x128xf32> -> vector<64x128xf32>
    %72 = arith.addf %64, %71 : vector<64x128xf32>
    %c4_62 = arith.constant 4 : index
    %c0_63 = arith.constant 0 : index
    %73 = vector.load %arg10[%c4_62, %c0_63] : memref<80x128xbf16, #tpu.memory_space<vmem>>, vector<64x128xbf16>
    %c5_64 = arith.constant 5 : index
    %c0_65 = arith.constant 0 : index
    %74 = vector.load %arg10[%c5_64, %c0_65] : memref<80x128xbf16, #tpu.memory_space<vmem>>, vector<64x128xbf16>
    %c6_66 = arith.constant 6 : index
    %c0_67 = arith.constant 0 : index
    %75 = vector.load %arg10[%c6_66, %c0_67] : memref<80x128xbf16, #tpu.memory_space<vmem>>, vector<64x128xbf16>
    %c7_68 = arith.constant 7 : index
    %c0_69 = arith.constant 0 : index
    %76 = vector.load %arg10[%c7_68, %c0_69] : memref<80x128xbf16, #tpu.memory_space<vmem>>, vector<64x128xbf16>
    %77 = tpu.concatenate %73, %74, %75, %76 in 1 : vector<64x128xbf16>, vector<64x128xbf16>, vector<64x128xbf16>, vector<64x128xbf16> -> vector<64x512xbf16>
    %c512_70 = arith.constant 512 : index
    %c0_71 = arith.constant 0 : index
    %78 = vector.load %arg5[%c512_70, %c0_71] : memref<2176x128xbf16, #tpu.memory_space<vmem>>, vector<512x128xbf16>
    %cst_72 = arith.constant dense<0.000000e+00> : vector<64x128xf32>
    %79 = tpu.matmul %77, %78, %cst_72 {dimension_numbers = #tpu.dot_dimension_numbers<[1], [0], [0], [1], [0, 0, 1, 1], [], []>} : vector<64x512xbf16>, vector<512x128xbf16>, vector<64x128xf32> -> vector<64x128xf32>
    %80 = arith.addf %72, %79 : vector<64x128xf32>
    %c8_73 = arith.constant 8 : index
    %c0_74 = arith.constant 0 : index
    %81 = vector.load %arg10[%c8_73, %c0_74] : memref<80x128xbf16, #tpu.memory_space<vmem>>, vector<64x128xbf16>
    %c9_75 = arith.constant 9 : index
    %c0_76 = arith.constant 0 : index
    %82 = vector.load %arg10[%c9_75, %c0_76] : memref<80x128xbf16, #tpu.memory_space<vmem>>, vector<64x128xbf16>
    %c10_77 = arith.constant 10 : index
    %c0_78 = arith.constant 0 : index
    %83 = vector.load %arg10[%c10_77, %c0_78] : memref<80x128xbf16, #tpu.memory_space<vmem>>, vector<64x128xbf16>
    %c11_79 = arith.constant 11 : index
    %c0_80 = arith.constant 0 : index
    %84 = vector.load %arg10[%c11_79, %c0_80] : memref<80x128xbf16, #tpu.memory_space<vmem>>, vector<64x128xbf16>
    %85 = tpu.concatenate %81, %82, %83, %84 in 1 : vector<64x128xbf16>, vector<64x128xbf16>, vector<64x128xbf16>, vector<64x128xbf16> -> vector<64x512xbf16>
    %c1024_81 = arith.constant 1024 : index
    %c0_82 = arith.constant 0 : index
    %86 = vector.load %arg5[%c1024_81, %c0_82] : memref<2176x128xbf16, #tpu.memory_space<vmem>>, vector<512x128xbf16>
    %cst_83 = arith.constant dense<0.000000e+00> : vector<64x128xf32>
    %87 = tpu.matmul %85, %86, %cst_83 {dimension_numbers = #tpu.dot_dimension_numbers<[1], [0], [0], [1], [0, 0, 1, 1], [], []>} : vector<64x512xbf16>, vector<512x128xbf16>, vector<64x128xf32> -> vector<64x128xf32>
    %88 = arith.addf %80, %87 : vector<64x128xf32>
    %c12_84 = arith.constant 12 : index
    %c0_85 = arith.constant 0 : index
    %89 = vector.load %arg10[%c12_84, %c0_85] : memref<80x128xbf16, #tpu.memory_space<vmem>>, vector<64x128xbf16>
    %c13_86 = arith.constant 13 : index
    %c0_87 = arith.constant 0 : index
    %90 = vector.load %arg10[%c13_86, %c0_87] : memref<80x128xbf16, #tpu.memory_space<vmem>>, vector<64x128xbf16>
    %c14_88 = arith.constant 14 : index
    %c0_89 = arith.constant 0 : index
    %91 = vector.load %arg10[%c14_88, %c0_89] : memref<80x128xbf16, #tpu.memory_space<vmem>>, vector<64x128xbf16>
    %c15_90 = arith.constant 15 : index
    %c0_91 = arith.constant 0 : index
    %92 = vector.load %arg10[%c15_90, %c0_91] : memref<80x128xbf16, #tpu.memory_space<vmem>>, vector<64x128xbf16>
    %93 = tpu.concatenate %89, %90, %91, %92 in 1 : vector<64x128xbf16>, vector<64x128xbf16>, vector<64x128xbf16>, vector<64x128xbf16> -> vector<64x512xbf16>
    %c1536_92 = arith.constant 1536 : index
    %c0_93 = arith.constant 0 : index
    %94 = vector.load %arg5[%c1536_92, %c0_93] : memref<2176x128xbf16, #tpu.memory_space<vmem>>, vector<512x128xbf16>
    %cst_94 = arith.constant dense<0.000000e+00> : vector<64x128xf32>
    %95 = tpu.matmul %93, %94, %cst_94 {dimension_numbers = #tpu.dot_dimension_numbers<[1], [0], [0], [1], [0, 0, 1, 1], [], []>} : vector<64x512xbf16>, vector<512x128xbf16>, vector<64x128xf32> -> vector<64x128xf32>
    %96 = arith.addf %88, %95 : vector<64x128xf32>
    %c16_95 = arith.constant 16 : index
    %c0_96 = arith.constant 0 : index
    %97 = vector.load %arg10[%c16_95, %c0_96] : memref<80x128xbf16, #tpu.memory_space<vmem>>, vector<64x128xbf16>
    %c2048_97 = arith.constant 2048 : index
    %c0_98 = arith.constant 0 : index
    %98 = vector.load %arg5[%c2048_97, %c0_98] : memref<2176x128xbf16, #tpu.memory_space<vmem>>, vector<128x128xbf16>
    %cst_99 = arith.constant dense<0.000000e+00> : vector<64x128xf32>
    %99 = tpu.matmul %97, %98, %cst_99 {dimension_numbers = #tpu.dot_dimension_numbers<[1], [0], [0], [1], [0, 0, 1, 1], [], []>} : vector<64x128xbf16>, vector<128x128xbf16>, vector<64x128xf32> -> vector<64x128xf32>
    %100 = arith.addf %96, %99 : vector<64x128xf32>
    %c0_100 = arith.constant 0 : index
    %c0_101 = arith.constant 0 : index
    %c0_102 = arith.constant 0 : index
    %101 = vector.load %arg1[%c0_100, %c0_101, %c0_102] : memref<1x64x128xf32, #tpu.memory_space<vmem>>, vector<1x64x128xf32>
    %102 = vector.shape_cast %101 : vector<1x64x128xf32> to vector<64x128xf32>
    %103 = arith.addf %100, %102 : vector<64x128xf32>
    %c0_103 = arith.constant 0 : index
    %c0_104 = arith.constant 0 : index
    %c0_105 = arith.constant 0 : index
    %104 = vector.load %arg8[%c0_103, %c0_104, %c0_105] : memref<1x64x128xf32, #tpu.memory_space<vmem>>, vector<1x64x128xf32>
    %105 = vector.shape_cast %104 : vector<1x64x128xf32> to vector<64x128xf32>
    %106 = vector.shape_cast %103 : vector<64x128xf32> to vector<1x64x128xf32>
    tpu.vector_store %arg8[%c0_103, %c0_104, %c0_105], %106 {strides = array<i32>} : memref<1x64x128xf32, #tpu.memory_space<vmem>>, vector<1x64x128xf32>,
    return
  }
  func.func @transform_0(%arg0: i32) -> (i32, i32, i32) {
    %c0_i32 = arith.constant 0 : i32
    %c0_i32_0 = arith.constant 0 : i32
    %c0_i32_1 = arith.constant 0 : i32
    return %arg0, %c0_i32, %c0_i32_0 : i32, i32, i32
  }
  func.func @transform_1(%arg0: i32) -> (i32, i32) {
    %c0_i32 = arith.constant 0 : i32
    %c0_i32_0 = arith.constant 0 : i32
    %c0_i32_1 = arith.constant 0 : i32
    return %c0_i32, %c0_i32_0 : i32, i32
  }
  func.func @transform_2(%arg0: i32) -> (i32, i32) {
    %c0_i32 = arith.constant 0 : i32
    %c0_i32_0 = arith.constant 0 : i32
    %c0_i32_1 = arith.constant 0 : i32
    return %c0_i32, %c0_i32_0 : i32, i32
  }
  func.func @transform_3(%arg0: i32) -> (i32, i32) {
    %c0_i32 = arith.constant 0 : i32
    %c0_i32_0 = arith.constant 0 : i32
    %c0_i32_1 = arith.constant 0 : i32
    return %c0_i32, %c0_i32_0 : i32, i32
  }
  func.func @transform_4(%arg0: i32) -> (i32, i32) {
    %c0_i32 = arith.constant 0 : i32
    %c0_i32_0 = arith.constant 0 : i32
    %c0_i32_1 = arith.constant 0 : i32
    return %c0_i32, %c0_i32_0 : i32, i32
  }
  func.func @transform_5(%arg0: i32) -> (i32, i32) {
    %c0_i32 = arith.constant 0 : i32
    %c0_i32_0 = arith.constant 0 : i32
    %c0_i32_1 = arith.constant 0 : i32
    return %c0_i32, %c0_i32_0 : i32, i32
  }
  func.func @transform_6(%arg0: i32) -> (i32, i32) {
    %c0_i32 = arith.constant 0 : i32
    %c0_i32_0 = arith.constant 0 : i32
    %c0_i32_1 = arith.constant 0 : i32
    return %c0_i32, %c0_i32_0 : i32, i32
  }
  func.func @transform_7(%arg0: i32) -> (i32, i32, i32) {
    %c0_i32 = arith.constant 0 : i32
    %c0_i32_0 = arith.constant 0 : i32
    %c0_i32_1 = arith.constant 0 : i32
    return %arg0, %c0_i32, %c0_i32_0 : i32, i32, i32
  }
}

</mosaic_0001>

<bundles_post_ra>
// kernel: basic_block_forward.1
= control target key start
LH: loop header
LB: loop body
LE: loop exit
PB: predicated region body
PF: predicated region fallthrough
CT: control target
= control target key end

     0   :  { %12 = vsyncpa [#allocation5], 0  ;;  %s7967_s0 = inlined_call_operand.vmem [shape: f32[2,64,128], index: 0, kind: input, shape index: {}]   ;;  %s7968_s1 = inlined_call_operand.vmem [shape: bf16[2176,128], index: 1, kind: input, shape index: {}]   ;;  %s7969_s2 = inlined_call_operand.vmem [shape: f32[1,128], index: 2, kind: input, shape index: {}]   ;;  %s7970_s3 = inlined_call_operand.vmem [shape: f32[1,128], index: 3, kind: input, shape index: {}]   ;;  %s7971_s4 = inlined_call_operand.vmem [shape: bf16[2176,128], index: 4, kind: input, shape index: {}]   ;;  %s7972_s5 = inlined_call_operand.vmem [shape: f32[1,128], index: 5, kind: input, shape index: {}]   ;;  %s7973_s6 = inlined_call_operand.vmem [shape: f32[1,128], index: 6, kind: input, shape index: {}]   ;;  %s7974_s7 = inlined_call_operand.hbm [shape: f32[2,64,128], index: 7, kind: output, shape index: {}]  }
   0x1   :  { %14 = vsyncpa [#allocation5 + $0x1], 0  ;;  %s6136_s24 = smov 0   ;;  %s6138_s25 = smov 0  }
   0x2   :  { %s6140_s26 = smov 0   ;;  %s6142_s27 = smov 0  }
   0x3 LB: > { %s6157_s28 = sadd.s32 4294967295, %s6090_s27   ;;  %s4704_s29 = sadd.s32 4294967294, %s6090_s27   ;;  %s6090_s27 = sphi %s6142_s27, %s7994_s27   ;;  %s6086_s26 = sphi %s6140_s26, %s7993_s26   ;;  %s6082_s25 = sphi %s6138_s25, %s7992_s25   ;;  %s6078_s24 = sphi %s6136_s24, %s7991_s24  }
   0x4   : > { %s6161_s30 = sadd.s32 1, %s6090_s27   ;;  %s179_s8 = sadd.s32 1, %s6086_s26 }
   0x5   : > { %s176_s9 = ssub.s32 %s6090_s27, %s6161_s30  ;;  %p189_p0 = scmp.ne.s32.totalorder %s6086_s26, %s6082_s25 }
   0x6   : > { %p177_p1 = scmp.eq.s32.totalorder %s176_s9, 0  ;;  %p190_p2 = scmp.eq.s32.totalorder %s6157_s28, 1 }
   0x7   : > { %p195_p3 = scmp.ne.s32.totalorder %s6082_s25, %s6078_s24  ;;  %p196_p4 = scmp.eq.s32.totalorder %s4704_s29, 1 }
   0x8   : > { %s6172_s10 = scalar_select %p177_p1, %s6086_s26, %s179_s8  }
   0x9   : > { %p6174_p5 = por %p190_p2, %p189_p0  ;;  %p6178_p6 = por %p196_p4, %p195_p3 }
   0xa   : > { %p4707_p7 = scmp.ge.s32.totalorder %s6090_s27, 1  ;;  %p240_p8 = scmp.lt.s32.totalorder %s6090_s27, 3 }
   0xc   : > { %p241_p9 = pnand %p4707_p7, %p240_p8 }
   0xd   : > { %v5748_v0 = vld [vmem:[%s7968_s1 + $0x140] sm:$0xff] (!%p241_p9)   ;;  %v5752_v4 = vld [vmem:[%s7968_s1 + $0x148] sm:$0xff] (!%p241_p9)   ;;  %v5756_v8 = vld [vmem:[%s7968_s1 + $0x150] sm:$0xff] (!%p241_p9)   ;;  %p272_p10 = scmp.lt.s32.totalorder (!%p241_p9), %s6157_s28, 1  ;;  %vm332_vm0 = vcmask (!%p241_p9), 1043456   ;;  %vm415_vm1 = vcmask (!%p241_p9), 1046528  }
   0xe   : > { %244 = sbr.rel (%p241_p9) target bundleno = 800 (0x320), region = 48  ;;  %v5749_v1 = vld [vmem:[%s7968_s1 + $0x100] sm:$0xff] (!%p241_p9)   ;;  %4994 = vmatprep.subr.bf16.mxu0 (!%p241_p9), %v5748_v0  ;;  %v5753_v5 = vld [vmem:[%s7968_s1 + $0x108] sm:$0xff] (!%p241_p9)   ;;  %v5757_v9 = vld [vmem:[%s7968_s1 + $0x110] sm:$0xff] (!%p241_p9)   ;;  %vm369_vm2 = vsmask.f32 (!%p241_p9), 7424 }
   0xf   : > { %v5750_v2 = vld [vmem:[%s7968_s1 + $0x1c0] sm:$0xff] (!%p241_p9)   ;;  %4995 = vmatpush3.bf16.msra.mxu0 (!%p241_p9), %v5749_v1  ;;  %v5754_v6 = vld [vmem:[%s7968_s1 + $0x1c8] sm:$0xff] (!%p241_p9)   ;;  %v5758_v10 = vld [vmem:[%s7968_s1 + $0x1d0] sm:$0xff] (!%p241_p9)   ;;  %vm637_vm3 = vcmask (!%p241_p9), 1045504   ;;  %vm429_vm4 = vsmask.f32 (!%p241_p9), 6400 }
  0x10   : > { %v5751_v3 = vld [vmem:[%s7968_s1 + $0x180] sm:$0xff] (!%p241_p9)   ;;  %5034 = vmatprep.subr.bf16.mxu1 (!%p241_p9), %v5750_v2  ;;  %4996 = vmatprep.subr.bf16.mxu0 (!%p241_p9), %v5752_v4  ;;  %v5755_v7 = vld [vmem:[%s7968_s1 + $0x188] sm:$0xff] (!%p241_p9)   ;;  %v5759_v11 = vld [vmem:[%s7968_s1 + $0x190] sm:$0xff] (!%p241_p9)   ;;  %vm1932_vm5 = vcmask (!%p241_p9), 1041408   ;;  %s269_s20 = sand.u32 (!%p241_p9), 1, %s6082_s25   ;;  %s4993_s23 = sshll.u32 (!%p241_p9), %s6157_s28, 10 }
  0x11   : > { %5035 = vmatpush3.bf16.msra.mxu1 (!%p241_p9), %v5751_v3  ;;  %v5760_v12 = vld [vmem:[%s7968_s1 + $0x158] sm:$0xff] (!%p241_p9)   ;;  %v5764_v16 = vld [vmem:[%s7968_s1 + $0x160] sm:$0xff] (!%p241_p9)   ;;  %v5768_v20 = vld [vmem:[%s7968_s1 + $0x168] sm:$0xff] (!%p241_p9)   ;;  %s4708_s21 = sshll.u32 (!%p241_p9), %s269_s20, 6  ;;  %s7920_s13 = scalar_lea.hbm (!%p241_p9), %s7974_s7, %s4993_s23 }
  0x12   : > { %5036 = vmatprep.subr.bf16.mxu1 (!%p241_p9), %v5754_v6  ;;  %v5761_v13 = vld [vmem:[%s7968_s1 + $0x118] sm:$0xff] (!%p241_p9)   ;;  %v5765_v17 = vld [vmem:[%s7968_s1 + $0x120] sm:$0xff] (!%p241_p9)   ;;  %v5769_v21 = vld [vmem:[%s7968_s1 + $0x128] sm:$0xff] (!%p241_p9)   ;;  %s6093_s14 = smov (!%p241_p9), [#allocation4]  }
  0x13   : > { %4997 = vmatpush3.bf16.msra.mxu0 (!%p241_p9), %v5753_v5  ;;  %v5762_v14 = vld [vmem:[%s7968_s1 + $0x1d8] sm:$0xff] (!%p241_p9)   ;;  %v5766_v18 = vld [vmem:[%s7968_s1 + $0x1e0] sm:$0xff] (!%p241_p9)   ;;  %v5770_v22 = vld [vmem:[%s7968_s1 + $0x1e8] sm:$0xff] (!%p241_p9)   ;;  %s6032_s15 = sshll.u32 (!%p241_p9), %s6093_s14, 4  ;;  %s6033_s15 = int_to_ptr.vmem [resolvable:$false] %s6032_s15 }
  0x14   : > { %4998 = vmatprep.subr.bf16.mxu0 (!%p241_p9), %v5756_v8  ;;  %v5763_v15 = vld [vmem:[%s7968_s1 + $0x198] sm:$0xff] (!%p241_p9)   ;;  %v5767_v19 = vld [vmem:[%s7968_s1 + $0x1a0] sm:$0xff] (!%p241_p9)   ;;  %v5771_v23 = vld [vmem:[%s7968_s1 + $0x1a8] sm:$0xff] (!%p241_p9)   ;;  %s6034_s16 = scalar_lea.vmem (!%p241_p9), %s6033_s15, 2048 }
  0x15   : > { %5037 = vmatpush3.bf16.msra.mxu1 %v5755_v7  ;;  %s273_s17 = scalar_select %p272_p10, %s6157_s28, 1  ;;  %v5772_v24 = vld [vmem:[%s7968_s1 + $0x170] sm:$0xff]   ;;  %v5776_v28 = vld [vmem:[%s7968_s1 + $0x178] sm:$0xff]   ;;  %v4711_v38 = vld [vmem:[%s7969_s2] ss:$0 sm:$0xff] }
  0x16   : > { %5038 = vmatprep.subr.bf16.mxu1 %v5758_v10  ;;  %v5773_v25 = vld [vmem:[%s7968_s1 + $0x130] sm:$0xff]   ;;  %v5777_v29 = vld [vmem:[%s7968_s1 + $0x138] sm:$0xff]   ;;  %v4712_v39 = vld [vmem:[%s7970_s3] ss:$0 sm:$0xff]  ;;  %s7926_s28 = scalar_lea.sflag [#allocation5], %s269_s20 }
  0x17   : > { %4999 = vmatpush3.bf16.msra.mxu0 %v5757_v9  ;;  %v5774_v26 = vld [vmem:[%s7968_s1 + $0x1f0] sm:$0xff]   ;;  %s4992_s9 = sshll.u32 %s273_s17, 6  ;;  %v5778_v30 = vld [vmem:[%s7968_s1 + $0x1f8] sm:$0xff]   ;;  %v5780_v44 = vld [vmem:[%s7968_s1 + $0x40] sm:$0xff]   ;;  %s271_s17 = scalar_lea.vmem [#allocation4], %s4708_s21 }
  0x18   : > { %5000 = vmatprep.subr.bf16.mxu0 %v5760_v12  ;;  %v5775_v27 = vld [vmem:[%s7968_s1 + $0x1b0] sm:$0xff]   ;;  %s6279_s22 = scalar_lea.vmem %s7967_s0, %s4992_s9  ;;  %v5779_v31 = vld [vmem:[%s7968_s1 + $0x1b8] sm:$0xff]   ;;  %v5782_v51 = vld [vmem:[%s7968_s1 + $0xc0] sm:$0xff]   ;;  %s4642_s29 = sshll.u32 %s271_s17, 4  ;;  %s7922_s29 = int_to_ptr.vmem [resolvable:$true] %s4642_s29 }
  0x19   : > { %5039 = vmatpush3.bf16.msra.mxu1 %v5759_v11  ;;  %v278_v32 = vld [vmem:[%s6279_s22] sm:$0xff]  ;;  %v279_v33 = vld [vmem:[%s6279_s22 + $0x8] sm:$0xff]  ;;  %v280_v34 = vld [vmem:[%s6279_s22 + $0x10] sm:$0xff]  ;;  %p6035_p0 = scmp.lt.s32.totalorder %s7922_s29, %s6033_s15 }
  0x1a   : > { %5040 = vmatprep.subr.bf16.mxu1 %v5762_v14  ;;  %v281_v35 = vld [vmem:[%s6279_s22 + $0x18] sm:$0xff]  ;;  %v282_v36 = vld [vmem:[%s6279_s22 + $0x20] sm:$0xff]  ;;  %v283_v37 = vld [vmem:[%s6279_s22 + $0x28] sm:$0xff]  ;;  %v293_v40 = vmul.f32 %v4711_v38, %v278_v32  ;;  %v294_v41 = vmul.f32 %v4711_v38, %v279_v33  ;;  %v295_v42 = vmul.f32 %v4711_v38, %v280_v34 }
  0x1b   : > { %5001 = vmatpush3.bf16.msra.mxu0 %v5761_v13  ;;  %v296_v43 = vmul.f32 %v4711_v38, %v281_v35  ;;  %v297_v45 = vmul.f32 %v4711_v38, %v282_v36  ;;  %v298_v46 = vmul.f32 %v4711_v38, %v283_v37  ;;  %v284_v1 = vld [vmem:[%s6279_s22 + $0x30] sm:$0xff]  ;;  %v285_v2 = vld [vmem:[%s6279_s22 + $0x38] sm:$0xff]  ;;  %vm6026_vm6 = vmneg %vm332_vm0 }
  0x1c   : > { %5002 = vmatprep.subr.bf16.mxu0 %v5764_v16  ;;  %v308_v47 = vadd.f32 %v4712_v39, %v293_v40  ;;  %v309_v48 = vadd.f32 %v4712_v39, %v294_v41  ;;  %v310_v49 = vadd.f32 %v4712_v39, %v295_v42  ;;  %v299_v4 = vmul.f32 %v4711_v38, %v284_v1 }
  0x1d   : > { %5041 = vmatpush3.bf16.msra.mxu1 %v5763_v15  ;;  %v311_v50 = vadd.f32 %v4712_v39, %v296_v43  ;;  %v312_v52 = vadd.f32 %v4712_v39, %v297_v45  ;;  %v313_v53 = vadd.f32 %v4712_v39, %v298_v46  ;;  %v300_v10 = vmul.f32 %v4711_v38, %v285_v2  ;;  %v5783_v2 = vld [vmem:[%s7968_s1 + $0x80] sm:$0xff]  }
  0x1e   : > { %5042 = vmatprep.subr.bf16.mxu1 %v5766_v18  ;;  %v316_v54 = vmax.f32 %v308_v47, 0.0  ;;  %v317_v55 = vmax.f32 %v309_v48, 0.0  ;;  %v318_v56 = vmax.f32 %v310_v49, 0.0  ;;  %v314_v18 = vadd.f32 %v4712_v39, %v299_v4 }
  0x1f   : > { %5003 = vmatpush3.bf16.msra.mxu0 %v5765_v17  ;;  %v319_v57 = vmax.f32 %v311_v50, 0.0  ;;  %v320_v58 = vmax.f32 %v312_v52, 0.0  ;;  %v321_v59 = vmax.f32 %v313_v53, 0.0 }
  0x20   : > { %5004 = vmatprep.subr.bf16.mxu0 %v5768_v20  ;;  %v324_v60 = vpack.c.bf16 %v317_v55, %v316_v54 }
  0x21   : > { %5043 = vmatpush3.bf16.msra.mxu1 %v5767_v19  ;;  %v325_v61 = vpack.c.bf16 %v319_v57, %v318_v56  ;;  %v6305_v62 = vpack.c.bf16 %v321_v59, %v320_v58  ;;  %v5781_v56 = vld [vmem:[%s7968_s1] sm:$0xff]  }
  0x22   : > { %5044 = vmatprep.subr.bf16.mxu1 %v5770_v22  ;;  %v6307_v63 = vrot.slane %v324_v60, 4 }
  0x23   : > { %5005 = vmatpush3.bf16.msra.mxu0 %v5769_v21  ;;  %v334_v0 = vrot.slane %v325_v61, 4  ;;  %v336_v3 = vrot.slane %v6305_v62, 4 }
  0x24   : > { %5006 = vmatprep.subr.bf16.mxu0 %v5772_v24  ;;  %v6318_v6 = vsel %vm332_vm0, 0, %v6307_v63  ;;  %v322_v24 = vmax.f32 %v314_v18, 0.0  ;;  %v5787_v18 = vld [vmem:[%s7968_s1 + $0x88] sm:$0xff]  }
  0x25   : > { %5045 = vmatpush3.bf16.msra.mxu1 %v5771_v23  ;;  %v6314_v5 = vsel %vm332_vm0, %v6307_v63, %v334_v0  ;;  %v6321_v7 = vsel %vm332_vm0, %v334_v0, %v336_v3  ;;  %351 = vst [vmem:[#allocation2] sm:$0xff] %v6318_v6  ;;  %v315_v23 = vadd.f32 %v4712_v39, %v300_v10 }
  0x26   : > { %5046 = vmatprep.subr.bf16.mxu1 %v5774_v26  ;;  %352 = vst [vmem:[#allocation2 + $0x8] sm:$0xff] %v6314_v5  ;;  %v378_v8 = vshll.u32 %v6314_v5, 16  ;;  %v382_v9 = vshrl.u32 %v6314_v5, 16  ;;  %353 = vst [vmem:[#allocation2 + $0x10] sm:$0xff] %v6321_v7  ;;  %v386_v11 = vshll.u32 %v6321_v7, 16  ;;  %v390_v12 = vshrl.u32 %v6321_v7, 16 }
  0x27   : > { %5007 = vmatpush3.bf16.msra.mxu0 %v5773_v25  ;;  %v6331_v13 = vrot.slane %v6314_v5, 1  ;;  %v419_v14 = vrot.slane %v6321_v7, 1  ;;  %v639_v36 = vrot.slane %v6314_v5, 2 }
  0x28   : > { %5008 = vmatprep.subr.bf16.mxu0 %v5776_v28  ;;  %v6334_v15 = vrot.slane %v378_v8, 1  ;;  %v438_v16 = vrot.slane %v382_v9, 1  ;;  %v439_v17 = vrot.slane %v378_v8, 2  ;;  %v388_v19 = vrot.slane %v386_v11, 1 }
  0x29   : > { %5047 = vmatpush3.bf16.msra.mxu1 %v5775_v27  ;;  %v442_v20 = vrot.slane %v390_v12, 1  ;;  %v443_v21 = vrot.slane %v386_v11, 2  ;;  %v6345_v27 = vsel %vm415_vm1, %v6331_v13, %v419_v14  ;;  %v323_v28 = vmax.f32 %v315_v23, 0.0  ;;  %v5786_v11 = vld [vmem:[%s7968_s1 + $0xc8] sm:$0xff]  }
  0x2a   : > { %5048 = vmatprep.subr.bf16.mxu1 %v5778_v30  ;;  %v384_v22 = vor.u32 %v382_v9, %v6334_v15  ;;  %v6337_v25 = vor.u32 %v439_v17, %v438_v16  ;;  %v645_v38 = vrot.slane %v6345_v27, 2  ;;  %v392_v57 = vor.u32 %v390_v12, %v388_v19  ;;  %v5785_v17 = vld [vmem:[%s7968_s1 + $0x8] sm:$0xff]  }
  0x2b   : > { %5009 = vmatpush3.bf16.msra.mxu0 %v5777_v29  ;;  %v6339_v26 = vor.u32 %v443_v21, %v442_v20  ;;  %v327_v39 = vpack.c.bf16 %v323_v28, %v322_v24  ;;  %v650_v20 = vrot.slane %v6321_v7, 2 }
  0x2c   : > { %5074 = vmatprep.subr.bf16.mxu0 %v5780_v44  ;;  %v6348_v29 = vsel %vm369_vm2, %v384_v22, %v388_v19  ;;  %v527_v30 = vld [vmem:[#allocation2] sm:$0xfc]  ;;  %v5788_v22 = vld [vmem:[%s7968_s1 + $0x50] sm:$0xff]  }
  0x2d   : > { %5049 = vmatpush3.bf16.msra.mxu1 %v5779_v31  ;;  %v529_v31 = vld [vmem:[#allocation2] sm:$0xf8]  ;;  %v532_v32 = vshrl.u32 %v527_v30, 16  ;;  %v534_v33 = vshll.u32 %v527_v30, 16  ;;  %v6355_v41 = vsel %vm429_vm4, %v6337_v25, %v6339_v26  ;;  %v642_v44 = vrot.slane %v6348_v29, 2 }
  0x2e   : > { %5114 = vmatprep.subr.bf16.mxu1 %v5782_v51  ;;  %v554_v34 = vshrl.u32 %v529_v31, 16  ;;  %v557_v35 = vshll.u32 %v529_v31, 16  ;;  %v549_v37 = vrot.slane %v529_v31, 1  ;;  %v338_v46 = vrot.slane %v327_v39, 4 }
  0x2f   : > { %v536_v40 = vrot.slane %v534_v33, 1  ;;  %v638_v49 = vrot.slane %v527_v30, 2  ;;  %v648_v51 = vrot.slane %v6355_v41, 2  ;;  %v5790_v30 = vld [vmem:[%s7968_s1 + $0xd0] sm:$0xff]   ;;  %v651_v39 = vsel %vm637_vm3, %v639_v36, %v650_v20 }
  0x30   : > { %v556_v42 = vrot.slane %v554_v34, 1  ;;  %v559_v43 = vrot.slane %v557_v35, 2  ;;  %v550_v45 = vsel %vm415_vm1, %v549_v37, %v6331_v13  ;;  %v6362_v52 = vsel %vm332_vm0, %v336_v3, %v338_v46  ;;  %v5784_v3 = vld [vmem:[%s7968_s1 + $0x48] sm:$0xff]  }
  0x31   : > { %v537_v47 = vor.u32 %v536_v40, %v532_v32  ;;  %v644_v50 = vrot.slane %v550_v45, 2  ;;  %v349_v53 = vsel %vm332_vm0, %v338_v46, 0  ;;  %354 = vst [vmem:[#allocation2 + $0x18] sm:$0xff] %v6362_v52  ;;  %v394_v58 = vshll.u32 %v6362_v52, 16 }
  0x32   : > { %v560_v48 = vor.u32 %v559_v43, %v556_v42  ;;  %355 = vst [vmem:[#allocation2 + $0x20] sm:$0xff] %v349_v53  ;;  %v398_v61 = vshrl.u32 %v6362_v52, 16  ;;  %v6376_v62 = vrot.slane %v6362_v52, 1  ;;  %v640_v0 = vsel %vm637_vm3, %v638_v49, %v639_v36  ;;  %v5789_v42 = vld [vmem:[%s7968_s1 + $0x10] sm:$0xff]   ;;  %v5794_v49 = vld [vmem:[%s7968_s1 + $0xd8] sm:$0xff]  }
  0x33   : > { %v538_v54 = vsel %vm369_vm2, %v537_v47, %v6334_v15  ;;  %v646_v1 = vsel %vm637_vm3, %v644_v50, %v645_v38  ;;  %v396_v4 = vrot.slane %v394_v58, 1  ;;  %v447_v8 = vrot.slane %v394_v58, 2  ;;  %v5791_v43 = vld [vmem:[%s7968_s1 + $0x90] sm:$0xff]  }
  0x34   : > { %v561_v55 = vsel %vm429_vm4, %v560_v48, %v6337_v25  ;;  %v641_v59 = vrot.slane %v538_v54, 2  ;;  %v446_v12 = vrot.slane %v398_v61, 1  ;;  %v6399_v16 = vsel %vm415_vm1, %v419_v14, %v6376_v62 }
  0x35   : > { %v647_v60 = vrot.slane %v561_v55, 2  ;;  %v6408_v19 = vsel %vm369_vm2, %v392_v57, %v396_v4  ;;  %v654_v23 = vrot.slane %v6399_v16, 2  ;;  %v6427_v31 = vor.u32 %v398_v61, %v396_v4  ;;  %v5797_v4 = vld [vmem:[%s7968_s1 + $0x20] sm:$0xff]  }
  0x36   : > { %v643_v9 = vsel %vm637_vm3, %v641_v59, %v642_v44  ;;  %v6411_v21 = vor.u32 %v447_v8, %v446_v12  ;;  %v652_v14 = vrot.slane %v6408_v19, 2  ;;  %v658_v59 = vrot.slane %v6362_v52, 2  ;;  %v5799_v8 = vld [vmem:[%s7968_s1 + $0xa0] sm:$0xff]  }
  0x37   : > { %v649_v10 = vsel %vm637_vm3, %v647_v60, %v648_v51  ;;  %914 = vmatprep.mubr.bf16.mxu0 %v643_v9  ;;  %v655_v40 = vsel %vm637_vm3, %v645_v38, %v654_v23  ;;  %v5792_v38 = vld [vmem:[%s7968_s1 + $0x58] sm:$0xff]  }
  0x38   : > { %979 = vmatprep.mubr.bf16.mxu1 %v649_v10  ;;  %915 = vmatmul.mubr.bf16.vlgmr.msra.gmra.mrb[0].mxu0 %v640_v0  ;;  %v653_v24 = vsel %vm637_vm3, %v642_v44, %v652_v14  ;;  %v6422_v28 = vsel %vm429_vm4, %v6339_v26, %v6411_v21  ;;  %v373_v10 = vshll.u32 %v6318_v6, 16 }
  0x39   : > { %980 = vmatmul.mubr.bf16.vlgmr.msra.gmra.mrb[0].mxu1 %v646_v1  ;;  %5075 = vmatpush3.bf16.msra.mxu0 %v5781_v56  ;;  %v6429_v32 = vld [vmem:[#allocation2 + $0x20] sm:$0x7]  ;;  %v656_v34 = vrot.slane %v6422_v28, 2  ;;  %v5795_v56 = vld [vmem:[%s7968_s1 + $0x98] sm:$0xff]  }
  0x3a   : > { %5115 = vmatpush3.bf16.msra.mxu1 %v5783_v2  ;;  %5076 = vmatprep.subr.bf16.mxu0 %v5784_v3  ;;  %v6431_v33 = vld [vmem:[#allocation2 + $0x20] sm:$0xf]  ;;  %v540_v35 = vshll.u32 %v6429_v32, 16  ;;  %v551_v44 = vrot.slane %v6429_v32, 1  ;;  %v544_v45 = vshrl.u32 %v6429_v32, 16 }
  0x3b   : > { %5116 = vmatprep.subr.bf16.mxu1 %v5786_v11  ;;  %922 = vmatprep.mubr.bf16.mxu0 %v653_v24  ;;  %v563_v37 = vshrl.u32 %v6431_v33, 16  ;;  %v566_v26 = vshll.u32 %v6431_v33, 16  ;;  %v657_v36 = vsel %vm637_vm3, %v648_v51, %v656_v34  ;;  %v5793_v51 = vld [vmem:[%s7968_s1 + $0x18] sm:$0xff]   ;;  %v5796_v1 = vld [vmem:[%s7968_s1 + $0x60] sm:$0xff]  }
  0x3c   : > { %v542_v46 = vrot.slane %v540_v35, 1  ;;  %987 = vmatprep.mubr.bf16.mxu1 %v657_v36  ;;  %v6466_v50 = vsel %vm415_vm1, %v6376_v62, %v551_v44  ;;  %v5798_v2 = vld [vmem:[%s7968_s1 + $0xe0] sm:$0xff]   ;;  %v371_v35 = vshrl.u32 %v6318_v6, 16  ;;  %v5804_v6 = vld [vmem:[%s7968_s1 + $0x70] sm:$0xff]  }
  0x3d   : > { %5077 = vmatpush3.bf16.msra.mxu0 %v5785_v17  ;;  %v565_v47 = vrot.slane %v563_v37, 1  ;;  %v568_v48 = vrot.slane %v566_v26, 2  ;;  %v662_v60 = vrot.slane %v6466_v50, 2  ;;  %v6494_v11 = vld [vmem:[#allocation2] sm:$0xfe]  ;;  %v5800_v17 = vld [vmem:[%s7968_s1 + $0x68] sm:$0xff]  }
  0x3e   : > { %5117 = vmatpush3.bf16.msra.mxu1 %v5787_v18  ;;  %5078 = vmatprep.subr.bf16.mxu0 %v5788_v22  ;;  %v543_v53 = vsel %vm369_vm2, %v6427_v31, %v542_v46  ;;  %v546_v55 = vor.u32 %v544_v45, %v542_v46  ;;  %v431_v18 = vshrl.u32 %v6494_v11, 16  ;;  %v659_v22 = vsel %vm637_vm3, %v650_v20, %v658_v59  ;;  %v5801_v20 = vld [vmem:[%s7968_s1 + $0x28] sm:$0xff]   ;;  %v5806_v36 = vld [vmem:[%s7968_s1 + $0xf0] sm:$0xff]   ;;  %v5810_v50 = vld [vmem:[%s7968_s1 + $0xf8] sm:$0xff]  }
  0x3f   : > { %5118 = vmatprep.subr.bf16.mxu1 %v5790_v30  ;;  %v569_v54 = vor.u32 %v568_v48, %v565_v47  ;;  %v660_v57 = vrot.slane %v543_v53, 2  ;;  %v663_v24 = vsel %vm637_vm3, %v654_v23, %v662_v60  ;;  %v5802_v30 = vld [vmem:[%s7968_s1 + $0xe8] sm:$0xff]   ;;  %v375_v37 = vrot.slane %v373_v10, 1  ;;  %v5807_v46 = vld [vmem:[%s7968_s1 + $0xb0] sm:$0xff]   ;;  %v5811_v53 = vld [vmem:[%s7968_s1 + $0xb8] sm:$0xff]  }
  0x40   : > { %923 = vmatmul.mubr.bf16.gmra.mrb[4].mxu0 %v651_v39  ;;  %v668_v3 = vrot.slane %v546_v55, 2  ;;  %v5803_v23 = vld [vmem:[%s7968_s1 + $0xa8] sm:$0xff]   ;;  %v670_v45 = vrot.slane %v551_v44, 2  ;;  %v5820_v10 = vld [vmem:[%s7968_s1 + $0x250] sm:$0xff]  }
  0x41   : > { %988 = vmatmul.mubr.bf16.gmra.mrb[4].mxu1 %v655_v40  ;;  %5079 = vmatpush3.bf16.msra.mxu0 %v5789_v42  ;;  %v570_v58 = vsel %vm429_vm4, %v6411_v21, %v569_v54  ;;  %v661_v61 = vsel %vm637_vm3, %v652_v14, %v660_v57  ;;  %v672_v9 = vrot.slane %v569_v54, 2  ;;  %v434_v14 = vshll.u32 %v6494_v11, 16 }
  0x42   : > { %5119 = vmatpush3.bf16.msra.mxu1 %v5791_v43  ;;  %5080 = vmatprep.subr.bf16.mxu0 %v5792_v38  ;;  %v664_v0 = vrot.slane %v570_v58, 2  ;;  %v669_v26 = vsel %vm637_vm3, %v660_v57, %v668_v3  ;;  %v433_v40 = vrot.slane %v431_v18, 1  ;;  %v5805_v38 = vld [vmem:[%s7968_s1 + $0x30] sm:$0xff]   ;;  %v376_v47 = vor.u32 %v375_v37, %v371_v35  ;;  %v5814_v58 = vld [vmem:[%s7968_s1 + $0x2c0] sm:$0xff]   ;;  %v5824_v37 = vld [vmem:[%s7968_s1 + $0x258] sm:$0xff]  }
  0x43   : > { %5120 = vmatprep.subr.bf16.mxu1 %v5794_v49  ;;  %930 = vmatprep.mubr.bf16.mxu0 %v661_v61  ;;  %v436_v42 = vrot.slane %v434_v14, 2  ;;  %v671_v44 = vsel %vm637_vm3, %v662_v60, %v670_v45  ;;  %v5808_v49 = vld [vmem:[%s7968_s1 + $0x78] sm:$0xff]   ;;  %v416_v57 = vrot.slane %v6494_v11, 1  ;;  %v1451_v60 = vrot.slane %v6345_v27, 4  ;;  %v5821_v14 = vld [vmem:[%s7968_s1 + $0x210] sm:$0xff]  }
  0x44   : > { %v665_v12 = vsel %vm637_vm3, %v656_v34, %v664_v0  ;;  %v6511_v34 = vld [vmem:[#allocation2 + $0x20] sm:$0x3]  ;;  %v673_v39 = vsel %vm637_vm3, %v664_v0, %v672_v9  ;;  %v381_v54 = vsel %vm369_vm2, %v376_v47, %v6334_v15  ;;  %v1460_v61 = vrot.slane %v6399_v16, 4  ;;  %v5819_v9 = vld [vmem:[%s7968_s1 + $0x288] sm:$0xff]  }
  0x45   : > { %5081 = vmatpush3.bf16.msra.mxu0 %v5793_v51  ;;  %995 = vmatprep.mubr.bf16.mxu1 %v665_v12  ;;  %v666_v43 = vrot.slane %v6511_v34, 2  ;;  %v437_v48 = vor.u32 %v436_v42, %v433_v40  ;;  %v5809_v51 = vld [vmem:[%s7968_s1 + $0x38] sm:$0xff]   ;;  %v5815_v0 = vld [vmem:[%s7968_s1 + $0x280] sm:$0xff]   ;;  %v451_v11 = vshrl.u32 %v6511_v34, 16  ;;  %v5822_v12 = vld [vmem:[%s7968_s1 + $0x2d0] sm:$0xff]   ;;  %v1937_v18 = vrot.slane %v6348_v29, 6 }
  0x46   : > { %5121 = vmatpush3.bf16.msra.mxu1 %v5795_v56  ;;  %5082 = vmatprep.subr.bf16.mxu0 %v5796_v1  ;;  %v5812_v56 = vld [vmem:[%s7968_s1 + $0x240] sm:$0xff]   ;;  %v418_v1 = vsel %vm415_vm1, %v416_v57, %v6331_v13  ;;  %v6580_v3 = vsel %vm332_vm0, %v1451_v60, %v1460_v61  ;;  %v5827_v40 = vld [vmem:[%s7968_s1 + $0x298] sm:$0xff]   ;;  %v1949_v45 = vrot.slane %v6399_v16, 6  ;;  %v5834_v57 = vld [vmem:[%s7968_s1 + $0x2e8] sm:$0xff]  }
  0x47   : > { %5122 = vmatprep.subr.bf16.mxu1 %v5798_v2  ;;  %v667_v32 = vsel %vm637_vm3, %v658_v59, %v666_v43  ;;  %v441_v55 = vsel %vm429_vm4, %v437_v48, %v6337_v25  ;;  %v5813_v59 = vld [vmem:[%s7968_s1 + $0x200] sm:$0xff]   ;;  %v5816_v2 = vld [vmem:[%s7968_s1 + $0x248] sm:$0xff]   ;;  %v1940_v43 = vrot.slane %v6345_v27, 6 }
  0x48   : > { %931 = vmatmul.mubr.bf16.gmra.mrb[8].mxu0 %v659_v22  ;;  %v5823_v22 = vld [vmem:[%s7968_s1 + $0x290] sm:$0xff]   ;;  %v5829_v47 = vld [vmem:[%s7968_s1 + $0x220] sm:$0xff]  }
  0x49   : > { %996 = vmatmul.mubr.bf16.gmra.mrb[8].mxu1 %v663_v24  ;;  %5083 = vmatpush3.bf16.msra.mxu0 %v5797_v4  ;;  %v5818_v4 = vld [vmem:[%s7968_s1 + $0x2c8] sm:$0xff]   ;;  %v1943_v24 = vrot.slane %v6355_v41, 6  ;;  %v5831_v48 = vld [vmem:[%s7968_s1 + $0x2a0] sm:$0xff]  }
  0x4a   : > { %5123 = vmatpush3.bf16.msra.mxu1 %v5799_v8  ;;  %5084 = vmatprep.subr.bf16.mxu0 %v5800_v17  ;;  %v5817_v8 = vld [vmem:[%s7968_s1 + $0x208] sm:$0xff]   ;;  %v454_v17 = vshll.u32 %v6511_v34, 16  ;;  %v6613_v34 = vld [vmem:[#allocation2 + $0x20] sm:$0x1] }
  0x4b   : > { %5124 = vmatprep.subr.bf16.mxu1 %v5802_v30  ;;  %938 = vmatprep.mubr.bf16.mxu0 %v669_v26  ;;  %v1951_v30 = vrot.slane %v6422_v28, 6  ;;  %v5826_v26 = vld [vmem:[%s7968_s1 + $0x2d8] sm:$0xff]   ;;  %v402_v42 = vshll.u32 %v6613_v34, 16 }
  0x4c   : > { %1003 = vmatprep.mubr.bf16.mxu1 %v673_v39  ;;  %v456_v39 = vrot.slane %v454_v17, 2 }
  0x4d   : > { %5085 = vmatpush3.bf16.msra.mxu0 %v5801_v20  ;;  %v453_v20 = vrot.slane %v451_v11, 1  ;;  %v423_v11 = vrot.slane %v6613_v34, 1 }
  0x4e   : > { %5125 = vmatpush3.bf16.msra.mxu1 %v5803_v23  ;;  %5086 = vmatprep.subr.bf16.mxu0 %v5804_v6  ;;  %v6630_v23 = vsel %vm1932_vm5, %v1943_v24, %v1951_v30  ;;  %v5825_v6 = vld [vmem:[%s7968_s1 + $0x218] sm:$0xff]  }
  0x4f   : > { %5126 = vmatprep.subr.bf16.mxu1 %v5806_v36  ;;  %v5828_v36 = vld [vmem:[%s7968_s1 + $0x260] sm:$0xff]  }
  0x50   : > { %939 = vmatmul.mubr.bf16.gmra.mrb[12].mxu0 %v667_v32  ;;  %v404_v32 = vrot.slane %v402_v42, 1 }
  0x51   : > { %1004 = vmatmul.mubr.bf16.gmra.mrb[12].mxu1 %v671_v44  ;;  %5087 = vmatpush3.bf16.msra.mxu0 %v5805_v38  ;;  %v5830_v38 = vld [vmem:[%s7968_s1 + $0x2e0] sm:$0xff]   ;;  %v457_v44 = vor.u32 %v456_v39, %v453_v20  ;;  %v5839_v39 = vld [vmem:[%s7968_s1 + $0x2b0] sm:$0xff]  }
  0x52   : > { %5127 = vmatpush3.bf16.msra.mxu1 %v5807_v46  ;;  %5088 = vmatprep.subr.bf16.mxu0 %v5808_v49  ;;  %v6657_v46 = vsel %vm1932_vm5, %v1940_v43, %v1949_v45  ;;  %v6667_v49 = vld [vmem:[#allocation2] sm:$0xf0] }
  0x53   : > { %5128 = vmatprep.subr.bf16.mxu1 %v5810_v50  ;;  %1236 = vmatprep.mubr.bf16.mxu0 %v381_v54  ;;  %v1336_v50 = vld [vmem:[#allocation2] sm:$0xe0] }
  0x54   : > { %1301 = vmatprep.mubr.bf16.mxu1 %v441_v55  ;;  %v1361_v54 = vshrl.u32 %v1336_v50, 16  ;;  %v1364_v55 = vshll.u32 %v1336_v50, 16 }
  0x55   : > { %5089 = vmatpush3.bf16.msra.mxu0 %v5809_v51  ;;  %v1339_v51 = vshrl.u32 %v6667_v49, 16 }
  0x56   : > { %5129 = vmatpush3.bf16.msra.mxu1 %v5811_v53  ;;  %5154 = vmatprep.subr.bf16.mxu0 %v5812_v56  ;;  %v1341_v53 = vshll.u32 %v6667_v49, 16  ;;  %v5832_v56 = vld [vmem:[%s7968_s1 + $0x268] sm:$0xff]  }
  0x57   : > { %5194 = vmatprep.subr.bf16.mxu1 %v5814_v58  ;;  %v1448_v58 = vrot.slane %v6348_v29, 4 }
  0x58   : > { %6027 = vmatmul.mubr.msk.bf16.vlgmr.msra.gmra.mrb[16].mxu0 %vm6026_vm6, %v6307_v63  ;;  %v1947_v63 = vrot.slane %v6408_v19, 6 }
  0x59   : > { %1302 = vmatmul.mubr.bf16.vlgmr.msra.gmra.mrb[16].mxu1 %v418_v1  ;;  %5155 = vmatpush3.bf16.msra.mxu0 %v5813_v59  ;;  %v5833_v59 = vld [vmem:[%s7968_s1 + $0x228] sm:$0xff]   ;;  %v1343_v1 = vrot.slane %v1341_v53, 1  ;;  %v1445_v53 = vrot.slane %v6314_v5, 4 }
  0x5a   : > { %5195 = vmatpush3.bf16.msra.mxu1 %v5815_v0  ;;  %5156 = vmatprep.subr.bf16.mxu0 %v5816_v2  ;;  %v6620_v35 = vsel %vm1932_vm5, %v1937_v18, %v1947_v63  ;;  %v5835_v0 = vld [vmem:[%s7968_s1 + $0x2a8] sm:$0xff]   ;;  %v1363_v2 = vrot.slane %v1361_v54, 1  ;;  %v1444_v54 = vrot.slane %v6667_v49, 4  ;;  %v1462_v49 = vrot.slane %v6422_v28, 4 }
  0x5b   : > { %5196 = vmatprep.subr.bf16.mxu1 %v5818_v4  ;;  %1244 = vmatprep.mubr.bf16.mxu0 %v6348_v29  ;;  %v1366_v4 = vrot.slane %v1364_v55, 2  ;;  %v5877_v29 = vld [vmem:[%s7968_s1 + $0x408] sm:$0xff]  }
  0x5c   : > { %1309 = vmatprep.mubr.bf16.mxu1 %v6355_v41 }
  0x5d   : > { %5157 = vmatpush3.bf16.msra.mxu0 %v5817_v8  ;;  %v405_v8 = vsel %vm369_vm2, %v6427_v31, %v404_v32  ;;  %v1367_v17 = vor.u32 %v1366_v4, %v1363_v2  ;;  %v5843_v32 = vld [vmem:[%s7968_s1 + $0x2b8] sm:$0xff]   ;;  %v5848_v2 = vld [vmem:[%s7968_s1 + $0x348] sm:$0xff]   ;;  %v1456_v4 = vrot.slane %v6321_v7, 4 }
  0x5e   : > { %5197 = vmatpush3.bf16.msra.mxu1 %v5819_v9  ;;  %5158 = vmatprep.subr.bf16.mxu0 %v5820_v10  ;;  %v458_v9 = vsel %vm429_vm4, %v6411_v21, %v457_v44  ;;  %v5836_v10 = vld [vmem:[%s7968_s1 + $0x270] sm:$0xff]  }
  0x5f   : > { %5198 = vmatprep.subr.bf16.mxu1 %v5822_v12  ;;  %v1344_v12 = vor.u32 %v1343_v1, %v1339_v51  ;;  %v1368_v34 = vsel %vm429_vm4, %v1367_v17, %v6337_v25  ;;  %v5844_v51 = vld [vmem:[%s7968_s1 + $0x340] sm:$0xff]  }
  0x60   : > { %1245 = vmatmul.mubr.bf16.gmra.mrb[20].mxu0 %v6314_v5  ;;  %v1453_v42 = vrot.slane %v1368_v34, 4  ;;  %v5847_v5 = vld [vmem:[%s7968_s1 + $0x380] sm:$0xff]  }
  0x61   : > { %1310 = vmatmul.mubr.bf16.gmra.mrb[20].mxu1 %v6345_v27  ;;  %5159 = vmatpush3.bf16.msra.mxu0 %v5821_v14  ;;  %v5838_v14 = vld [vmem:[%s7968_s1 + $0x2f0] sm:$0xff]   ;;  %v1345_v20 = vsel %vm369_vm2, %v1344_v12, %v6334_v15  ;;  %v5851_v12 = vld [vmem:[%s7968_s1 + $0x388] sm:$0xff]   ;;  %v5879_v27 = vld [vmem:[%s7968_s1 + $0x418] sm:$0xff]  }
  0x62   : > { %5199 = vmatpush3.bf16.msra.mxu1 %v5823_v22  ;;  %5160 = vmatprep.subr.bf16.mxu0 %v5824_v37  ;;  %v1356_v22 = vrot.slane %v1336_v50, 1  ;;  %v5837_v37 = vld [vmem:[%s7968_s1 + $0x230] sm:$0xff]  }
  0x63   : > { %5200 = vmatprep.subr.bf16.mxu1 %v5826_v26  ;;  %1252 = vmatprep.mubr.bf16.mxu0 %v6408_v19  ;;  %v1454_v26 = vrot.slane %v6355_v41, 4  ;;  %v5876_v41 = vld [vmem:[%s7968_s1 + $0x400] sm:$0xff]  }
  0x64   : > { %1317 = vmatprep.mubr.bf16.mxu1 %v6422_v28 }
  0x65   : > { %5161 = vmatpush3.bf16.msra.mxu0 %v5825_v6  ;;  %v5840_v6 = vld [vmem:[%s7968_s1 + $0x278] sm:$0xff]   ;;  %v1455_v50 = vsel %vm332_vm0, %v1453_v42, %v1454_v26  ;;  %v5853_v42 = vld [vmem:[%s7968_s1 + $0x310] sm:$0xff]  }
  0x66   : > { %5201 = vmatpush3.bf16.msra.mxu1 %v5827_v40  ;;  %5162 = vmatprep.subr.bf16.mxu0 %v5828_v36  ;;  %v1447_v40 = vrot.slane %v1345_v20, 4  ;;  %v424_v36 = vsel %vm415_vm1, %v6376_v62, %v423_v11  ;;  %v6759_v11 = vld [vmem:[#allocation2 + $0x20] sm:$0x3f]  ;;  %v5852_v20 = vld [vmem:[%s7968_s1 + $0x350] sm:$0xff]  }
  0x67   : > { %5202 = vmatprep.subr.bf16.mxu1 %v5830_v38  ;;  %v5842_v38 = vld [vmem:[%s7968_s1 + $0x2f8] sm:$0xff]   ;;  %v1370_v17 = vshrl.u32 %v6759_v11, 16 }
  0x68   : > { %1253 = vmatmul.mubr.bf16.gmra.mrb[24].mxu0 %v6321_v7  ;;  %v1449_v44 = vsel %vm332_vm0, %v1447_v40, %v1448_v58  ;;  %v5854_v40 = vld [vmem:[%s7968_s1 + $0x3d0] sm:$0xff]   ;;  %v5866_v7 = vld [vmem:[%s7968_s1 + $0x3e8] sm:$0xff]  }
  0x69   : > { %1318 = vmatmul.mubr.bf16.gmra.mrb[24].mxu1 %v6399_v16  ;;  %5163 = vmatpush3.bf16.msra.mxu0 %v5829_v47  ;;  %v1357_v47 = vsel %vm415_vm1, %v1356_v22, %v6331_v13  ;;  %v5883_v16 = vld [vmem:[%s7968_s1 + $0x438] sm:$0xff]  }
  0x6a   : > { %5203 = vmatpush3.bf16.msra.mxu1 %v5831_v48  ;;  %5164 = vmatprep.subr.bf16.mxu0 %v5832_v56  ;;  %v5841_v48 = vld [vmem:[%s7968_s1 + $0x238] sm:$0xff]   ;;  %v1450_v55 = vrot.slane %v1357_v47, 4  ;;  %v5846_v56 = vld [vmem:[%s7968_s1 + $0x3c0] sm:$0xff]  }
  0x6b   : > { %5204 = vmatprep.subr.bf16.mxu1 %v5834_v57  ;;  %1260 = vmatprep.mubr.bf16.mxu0 %v405_v8  ;;  %v5845_v57 = vld [vmem:[%s7968_s1 + $0x300] sm:$0xff]  }
  0x6c   : > { %1325 = vmatprep.mubr.bf16.mxu1 %v458_v9  ;;  %v1452_v1 = vsel %vm332_vm0, %v1450_v55, %v1451_v60  ;;  %v6753_v8 = vld [vmem:[#allocation2 + $0x20] sm:$0x1f]  ;;  %v5850_v9 = vld [vmem:[%s7968_s1 + $0x3c8] sm:$0xff]  }
  0x6d   : > { %5165 = vmatpush3.bf16.msra.mxu0 %v5833_v59  ;;  %v1458_v59 = vrot.slane %v6408_v19, 4  ;;  %v5849_v60 = vld [vmem:[%s7968_s1 + $0x308] sm:$0xff]  }
  0x6e   : > { %5205 = vmatpush3.bf16.msra.mxu1 %v5835_v0  ;;  %5166 = vmatprep.subr.bf16.mxu0 %v5836_v10  ;;  %v1446_v0 = vsel %vm332_vm0, %v1444_v54, %v1445_v53  ;;  %v1347_v10 = vshll.u32 %v6753_v8, 16  ;;  %v5881_v19 = vld [vmem:[%s7968_s1 + $0x428] sm:$0xff]  }
  0x6f   : > { %5206 = vmatprep.subr.bf16.mxu1 %v5838_v14  ;;  %v1373_v14 = vshll.u32 %v6759_v11, 16  ;;  %v1459_v22 = vsel %vm332_vm0, %v1448_v58, %v1458_v59 }
  0x70   : > { %1261 = vmatmul.mubr.bf16.gmra.mrb[28].mxu0 %v6362_v52  ;;  %v1349_v34 = vrot.slane %v1347_v10, 1  ;;  %v5863_v10 = vld [vmem:[%s7968_s1 + $0x3a0] sm:$0xff]  }
  0x71   : > { %1326 = vmatmul.mubr.bf16.gmra.mrb[28].mxu1 %v424_v36  ;;  %5167 = vmatpush3.bf16.msra.mxu0 %v5837_v37  ;;  %v1463_v37 = vsel %vm332_vm0, %v1454_v26, %v1462_v49  ;;  %v1358_v26 = vrot.slane %v6753_v8, 1  ;;  %v5855_v36 = vld [vmem:[%s7968_s1 + $0x390] sm:$0xff]  }
  0x72   : > { %5207 = vmatpush3.bf16.msra.mxu1 %v5839_v39  ;;  %5168 = vmatprep.subr.bf16.mxu0 %v5840_v6  ;;  %v1372_v39 = vrot.slane %v1370_v17, 1  ;;  %v1375_v6 = vrot.slane %v1373_v14, 2  ;;  %v1350_v58 = vsel %vm369_vm2, %v6427_v31, %v1349_v34  ;;  %v5864_v17 = vld [vmem:[%s7968_s1 + $0x368] sm:$0xff]  }
  0x73   : > { %5208 = vmatprep.subr.bf16.mxu1 %v5842_v38  ;;  %1720 = vmatprep.mubr.bf16.mxu0 %v1449_v44  ;;  %v1466_v47 = vrot.slane %v1350_v58, 4  ;;  %v5856_v44 = vld [vmem:[%s7968_s1 + $0x358] sm:$0xff]   ;;  %v6804_v55 = vsel %vm415_vm1, %v6376_v62, %v1358_v26  ;;  %v6839_v14 = vld [vmem:[#allocation2 + $0x8] sm:$0xff] }
  0x74   : > { %1785 = vmatprep.mubr.bf16.mxu1 %v1455_v50  ;;  %v1376_v38 = vor.u32 %v1375_v6, %v1372_v39  ;;  %v1828_v39 = vld [vmem:[#allocation2] sm:$0x80]  ;;  %v5867_v6 = vld [vmem:[%s7968_s1 + $0x3a8] sm:$0xff]  }
  0x75   : > { %5169 = vmatpush3.bf16.msra.mxu0 %v5841_v48  ;;  %v1351_v48 = vshrl.u32 %v6753_v8, 16  ;;  %v5871_v8 = vld [vmem:[%s7968_s1 + $0x3b0] sm:$0xff]  }
  0x76   : > { %5209 = vmatpush3.bf16.msra.mxu1 %v5843_v32  ;;  %5234 = vmatprep.subr.bf16.mxu0 %v5844_v51  ;;  %v1457_v32 = vsel %vm332_vm0, %v1445_v53, %v1456_v4  ;;  %v1377_v50 = vsel %vm429_vm4, %v6411_v21, %v1376_v38  ;;  %v5858_v51 = vld [vmem:[%s7968_s1 + $0x3d8] sm:$0xff]  }
  0x77   : > { %5274 = vmatprep.subr.bf16.mxu1 %v5846_v56  ;;  %v1470_v54 = vrot.slane %v1377_v50, 4  ;;  %v5857_v53 = vld [vmem:[%s7968_s1 + $0x318] sm:$0xff]  }
  0x78   : > { %1721 = vmatmul.mubr.bf16.vlgmr.msra.gmra.mrb[32].mxu0 %v1446_v0  ;;  %v5859_v56 = vld [vmem:[%s7968_s1 + $0x398] sm:$0xff]   ;;  %v1464_v0 = vrot.slane %v6362_v52, 4  ;;  %v5861_v52 = vld [vmem:[%s7968_s1 + $0x320] sm:$0xff]  }
  0x79   : > { %1786 = vmatmul.mubr.bf16.vlgmr.msra.gmra.mrb[32].mxu1 %v1452_v1  ;;  %5235 = vmatpush3.bf16.msra.mxu0 %v5845_v57  ;;  %v1467_v57 = vsel %vm332_vm0, %v1458_v59, %v1466_v47  ;;  %v1353_v1 = vor.u32 %v1351_v48, %v1349_v34  ;;  %v1472_v59 = vrot.slane %v6431_v33, 4  ;;  %v6852_v34 = vld [vmem:[#allocation2] sm:$0xc0]  ;;  %v1476_v48 = vrot.slane %v1358_v26, 4  ;;  %v6874_v26 = vld [vmem:[#allocation2 + $0x18] sm:$0xff] }
  0x7a   : > { %5275 = vmatpush3.bf16.msra.mxu1 %v5847_v5  ;;  %5236 = vmatprep.subr.bf16.mxu0 %v5848_v2  ;;  %v1471_v5 = vsel %vm332_vm0, %v1462_v49, %v1470_v54  ;;  %v5860_v2 = vld [vmem:[%s7968_s1 + $0x360] sm:$0xff]   ;;  %v1478_v49 = vrot.slane %v1376_v38, 4  ;;  %v1831_v58 = vshrl.u32 %v6852_v34, 16  ;;  %v5868_v38 = vld [vmem:[%s7968_s1 + $0x370] sm:$0xff]  }
  0x7b   : > { %5276 = vmatprep.subr.bf16.mxu1 %v5850_v9  ;;  %1728 = vmatprep.mubr.bf16.mxu0 %v1459_v22  ;;  %v1468_v9 = vrot.slane %v6804_v55, 4  ;;  %v1934_v22 = vrot.slane %v6839_v14, 6  ;;  %v1473_v55 = vsel %vm332_vm0, %v1464_v0, %v1472_v59 }
  0x7c   : > { %1793 = vmatprep.mubr.bf16.mxu1 %v1463_v37  ;;  %v6845_v37 = vld [vmem:[#allocation2 + $0x10] sm:$0xff] }
  0x7d   : > { %5237 = vmatpush3.bf16.msra.mxu0 %v5849_v60  ;;  %v1474_v60 = vrot.slane %v1353_v1, 4  ;;  %v1469_v33 = vsel %vm332_vm0, %v1460_v61, %v1468_v9  ;;  %v5865_v61 = vld [vmem:[%s7968_s1 + $0x328] sm:$0xff]   ;;  %v6883_v1 = vld [vmem:[#allocation2 + $0x20] sm:$0xff] }
  0x7e   : > { %5277 = vmatpush3.bf16.msra.mxu1 %v5851_v12  ;;  %5238 = vmatprep.subr.bf16.mxu0 %v5852_v20  ;;  %v1465_v12 = vsel %vm332_vm0, %v1456_v4, %v1464_v0  ;;  %v1945_v4 = vrot.slane %v6845_v37, 6  ;;  %v1479_v20 = vsel %vm332_vm0, %v1470_v54, %v1478_v49  ;;  %v1953_v54 = vrot.slane %v6874_v26, 6  ;;  %v5874_v0 = vld [vmem:[%s7968_s1 + $0x3f8] sm:$0xff]  }
  0x7f   : > { %5278 = vmatprep.subr.bf16.mxu1 %v5854_v40  ;;  %v1475_v40 = vsel %vm332_vm0, %v1466_v47, %v1474_v60  ;;  %v5870_v47 = vld [vmem:[%s7968_s1 + $0x3f0] sm:$0xff]   ;;  %v1858_v49 = vshrl.u32 %v6883_v1, 16  ;;  %v1861_v60 = vshll.u32 %v6883_v1, 16 }
  0x80   : > { %1729 = vmatmul.mubr.bf16.gmra.mrb[36].mxu0 %v1457_v32  ;;  %v1954_v28 = vsel %vm1932_vm5, %v1945_v4, %v1953_v54 }
  0x81   : > { %1794 = vmatmul.mubr.bf16.gmra.mrb[36].mxu1 %v6580_v3  ;;  %5239 = vmatpush3.bf16.msra.mxu0 %v5853_v42  ;;  %v5862_v3 = vld [vmem:[%s7968_s1 + $0x3e0] sm:$0xff]   ;;  %v1833_v42 = vshll.u32 %v6852_v34, 16 }
  0x82   : > { %5279 = vmatpush3.bf16.msra.mxu1 %v5855_v36  ;;  %5240 = vmatprep.subr.bf16.mxu0 %v5856_v44  ;;  %v1853_v36 = vshrl.u32 %v1828_v39, 16  ;;  %v1848_v44 = vrot.slane %v1828_v39, 1  ;;  %v5875_v39 = vld [vmem:[%s7968_s1 + $0x3b8] sm:$0xff]  }
  0x83   : > { %5280 = vmatprep.subr.bf16.mxu1 %v5858_v51  ;;  %1736 = vmatprep.mubr.bf16.mxu0 %v1467_v57  ;;  %v1835_v32 = vrot.slane %v1833_v42, 1  ;;  %v5869_v51 = vld [vmem:[%s7968_s1 + $0x330] sm:$0xff]  }
  0x84   : > { %1801 = vmatprep.mubr.bf16.mxu1 %v1471_v5  ;;  %v1855_v50 = vrot.slane %v1853_v36, 1  ;;  %v1827_v5 = vld [vmem:[#allocation2 + $0x20] sm:$0x7f] }
  0x85   : > { %5241 = vmatpush3.bf16.msra.mxu0 %v5857_v53  ;;  %v5872_v53 = vld [vmem:[%s7968_s1 + $0x378] sm:$0xff]  }
  0x86   : > { %5281 = vmatpush3.bf16.msra.mxu1 %v5859_v56  ;;  %5242 = vmatprep.subr.bf16.mxu0 %v5860_v2  ;;  %v1836_v56 = vor.u32 %v1835_v32, %v1831_v58  ;;  %v1856_v57 = vsel %vm429_vm4, %v1855_v50, %v6337_v25  ;;  %v1961_v2 = vrot.slane %v6759_v11, 6 }
  0x87   : > { %5282 = vmatprep.subr.bf16.mxu1 %v5862_v3  ;;  %v1477_v3 = vsel %vm332_vm0, %v1468_v9, %v1476_v48  ;;  %v1942_v59 = vrot.slane %v1856_v57, 6  ;;  %v5873_v9 = vld [vmem:[%s7968_s1 + $0x338] sm:$0xff]  }
  0x88   : > { %1737 = vmatmul.mubr.bf16.gmra.mrb[40].mxu0 %v1465_v12  ;;  %v1837_v25 = vsel %vm369_vm2, %v1836_v56, %v6334_v15  ;;  %v1850_v12 = vrot.slane %v1827_v5, 1  ;;  %v1863_v15 = vrot.slane %v1861_v60, 2  ;;  %v5892_v60 = vld [vmem:[%s7971_s4 + $0x188] sm:$0xff]  }
  0x89   : > { %1802 = vmatmul.mubr.bf16.gmra.mrb[40].mxu1 %v1469_v33  ;;  %5243 = vmatpush3.bf16.msra.mxu0 %v5861_v52  ;;  %v1839_v52 = vshll.u32 %v1827_v5, 16  ;;  %v1936_v33 = vrot.slane %v1837_v25, 6  ;;  %v5889_v25 = vld [vmem:[%s7971_s4 + $0x108] sm:$0xff]  }
  0x8a   : > { %5283 = vmatpush3.bf16.msra.mxu1 %v5863_v10  ;;  %5244 = vmatprep.subr.bf16.mxu0 %v5864_v17  ;;  %v1849_v10 = vsel %vm415_vm1, %v1848_v44, %v6331_v13  ;;  %v6904_v13 = vsel %vm415_vm1, %v6376_v62, %v1850_v12 }
  0x8b   : > { %5284 = vmatprep.subr.bf16.mxu1 %v5866_v7  ;;  %1744 = vmatprep.mubr.bf16.mxu0 %v1475_v40  ;;  %v1841_v17 = vrot.slane %v1839_v52, 1  ;;  %v1860_v7 = vrot.slane %v1858_v49, 1  ;;  %v1939_v40 = vrot.slane %v1849_v10, 6  ;;  %v1957_v42 = vrot.slane %v6904_v13, 6  ;;  %v5887_v52 = vld [vmem:[%s7971_s4 + $0x148] sm:$0xff]  }
  0x8c   : > { %1809 = vmatprep.mubr.bf16.mxu1 %v1479_v20  ;;  %v1843_v20 = vshrl.u32 %v1827_v5, 16  ;;  %v5890_v10 = vld [vmem:[%s7971_s4 + $0x1c8] sm:$0xff]  }
  0x8d   : > { %5245 = vmatpush3.bf16.msra.mxu0 %v5865_v61  ;;  %v1944_v61 = vsel %vm1932_vm5, %v1942_v59, %v1943_v24  ;;  %v1933_v24 = vrot.slane %v6852_v34, 6  ;;  %v1842_v62 = vsel %vm369_vm2, %v6427_v31, %v1841_v17  ;;  %v1864_v58 = vor.u32 %v1863_v15, %v1860_v7  ;;  %v5891_v7 = vld [vmem:[%s7971_s4 + $0x150] sm:$0xff]  }
  0x8e   : > { %5285 = vmatpush3.bf16.msra.mxu1 %v5867_v6  ;;  %5246 = vmatprep.subr.bf16.mxu0 %v5868_v38  ;;  %v1938_v6 = vsel %vm1932_vm5, %v1936_v33, %v1937_v18  ;;  %v1845_v36 = vor.u32 %v1843_v20, %v1841_v17  ;;  %v1965_v38 = vrot.slane %v1850_v12, 6  ;;  %v1955_v18 = vrot.slane %v1842_v62, 6 }
  0x8f   : > { %5286 = vmatprep.subr.bf16.mxu1 %v5870_v47  ;;  %v1865_v34 = vsel %vm429_vm4, %v6411_v21, %v1864_v58  ;;  %v1935_v31 = vsel %vm1932_vm5, %v1933_v24, %v1934_v22  ;;  %v1941_v47 = vsel %vm1932_vm5, %v1939_v40, %v1940_v43  ;;  %v1967_v44 = vrot.slane %v1864_v58, 6  ;;  %v5878_v21 = vld [vmem:[%s7968_s1 + $0x410] sm:$0xff]  }
  0x90   : > { %1745 = vmatmul.mubr.bf16.gmra.mrb[44].mxu0 %v1473_v55  ;;  %v1963_v48 = vrot.slane %v1845_v36, 6  ;;  %v1959_v32 = vrot.slane %v1865_v34, 6  ;;  %v1946_v43 = vsel %vm1932_vm5, %v1934_v22, %v1945_v4  ;;  %v1956_v50 = vsel %vm1932_vm5, %v1947_v63, %v1955_v18  ;;  %v5882_v22 = vld [vmem:[%s7968_s1 + $0x430] sm:$0xff]   ;;  %v5884_v55 = vld [vmem:[%s7971_s4 + $0x140] sm:$0xff]   ;;  %v5895_v36 = vld [vmem:[%s7971_s4 + $0x158] sm:$0xff]  }
  0x91   : > { %1810 = vmatmul.mubr.bf16.gmra.mrb[44].mxu1 %v1477_v3  ;;  %5247 = vmatpush3.bf16.msra.mxu0 %v5869_v51  ;;  %v1958_v63 = vsel %vm1932_vm5, %v1949_v45, %v1957_v42  ;;  %v1962_v45 = vsel %vm1932_vm5, %v1953_v54, %v1961_v2  ;;  %v1966_v4 = vsel %vm1932_vm5, %v1957_v42, %v1965_v38  ;;  %v5888_v2 = vld [vmem:[%s7971_s4 + $0x180] sm:$0xff]   ;;  %v5896_v40 = vld [vmem:[%s7971_s4 + $0x190] sm:$0xff]   ;;  %v5900_v34 = vld [vmem:[%s7971_s4 + $0x198] sm:$0xff]  }
  0x92   : > { %5287 = vmatpush3.bf16.msra.mxu1 %v5871_v8  ;;  %5248 = vmatprep.subr.bf16.mxu0 %v5872_v53 }
  0x93   : > { %5288 = vmatprep.subr.bf16.mxu1 %v5874_v0  ;;  %2209 = vmatprep.mubr.bf16.mxu0 %v1938_v6  ;;  %v5894_v6 = vld [vmem:[%s7971_s4 + $0x1d0] sm:$0xff]  }
  0x94   : > { %2274 = vmatprep.mubr.bf16.mxu1 %v1944_v61 }
  0x95   : > { %5249 = vmatpush3.bf16.msra.mxu0 %v5873_v9 }
  0x96   : > { %5289 = vmatpush3.bf16.msra.mxu1 %v5875_v39  ;;  %5658 = vmatprep.subr.bf16.mxu0 %v5876_v41  ;;  %v5893_v39 = vld [vmem:[%s7971_s4 + $0x110] sm:$0xff]  }
  0x97   : > { %5326 = vmatprep.subr.bf16.mxu1 %v5884_v55 }
  0x98   : > { %2210 = vmatmul.mubr.bf16.vlgmr.msra.gmra.mrb[48].mxu0 %v1935_v31 }
  0x99   : > { %2275 = vmatmul.mubr.bf16.vlgmr.msra.gmra.mrb[48].mxu1 %v1941_v47  ;;  %5659 = vmatpush3.bf16.msra.mxu0 %v5876_v41  ;;  %v6092_v47 = vmov 0  }
  0x9a   : > { %2217 = vmatprep.mubr.bf16.mxu0 %v6620_v35  ;;  %5660 = vmatprep.subr.bf16.mxu0 %v5877_v29  ;;  %v1960_v35 = vsel %vm1932_vm5, %v1951_v30, %v1959_v32  ;;  %v1964_v30 = vsel %vm1932_vm5, %v1955_v18, %v1963_v48  ;;  %v5898_v18 = vld [vmem:[%s7971_s4 + $0x1d8] sm:$0xff]   ;;  %356 = vst [vmem:[#allocation3] sm:$0xf] %v6092_v47  ;;  %357 = vst [vmem:[#allocation3 + $0x20] sm:$0xf0] %v6092_v47 }
  0x9b   : > { %2282 = vmatprep.mubr.bf16.mxu1 %v6630_v23  ;;  %v5880_v23 = vld [vmem:[%s7968_s1 + $0x420] sm:$0xff]  }
  0x9d   : > { %5661 = vmatpush3.bf16.msra.mxu0 %v5877_v29  ;;  %v5897_v29 = vld [vmem:[%s7971_s4 + $0x118] sm:$0xff]  }
  0x9e   : > { %5662 = vmatprep.subr.bf16.mxu0 %v5878_v21 }
  0xa0   : > { %2218 = vmatmul.mubr.bf16.gmra.mrb[52].mxu0 %v1946_v43 }
  0xa1   : > { %2283 = vmatmul.mubr.bf16.gmra.mrb[52].mxu1 %v6657_v46  ;;  %5663 = vmatpush3.bf16.msra.mxu0 %v5878_v21  ;;  %v1968_v46 = vsel %vm1932_vm5, %v1959_v32, %v1967_v44  ;;  %v5899_v21 = vld [vmem:[%s7971_s4 + $0x160] sm:$0xff]  }
  0xa2   : > { %2225 = vmatprep.mubr.bf16.mxu0 %v1956_v50  ;;  %5664 = vmatprep.subr.bf16.mxu0 %v5879_v27 }
  0xa3   : > { %2290 = vmatprep.mubr.bf16.mxu1 %v1960_v35 }
  0xa5   : > { %5665 = vmatpush3.bf16.msra.mxu0 %v5879_v27 }
  0xa6   : > { %5666 = vmatprep.subr.bf16.mxu0 %v5880_v23 }
  0xa8   : > { %2226 = vmatmul.mubr.bf16.gmra.mrb[56].mxu0 %v1954_v28 }
  0xa9   : > { %2291 = vmatmul.mubr.bf16.gmra.mrb[56].mxu1 %v1958_v63  ;;  %5667 = vmatpush3.bf16.msra.mxu0 %v5880_v23  ;;  %v5901_v23 = vld [vmem:[%s7971_s4 + $0x120] sm:$0xff]  }
  0xaa   : > { %2233 = vmatprep.mubr.bf16.mxu0 %v1964_v30  ;;  %5668 = vmatprep.subr.bf16.mxu0 %v5881_v19  ;;  %v5904_v30 = vld [vmem:[%s7971_s4 + $0x1a0] sm:$0xff]  }
  0xab   : > { %2298 = vmatprep.mubr.bf16.mxu1 %v1968_v46 }
  0xad   : > { %5669 = vmatpush3.bf16.msra.mxu0 %v5881_v19  ;;  %v5902_v19 = vld [vmem:[%s7971_s4 + $0x1e0] sm:$0xff]  }
  0xae   : > { %5670 = vmatprep.subr.bf16.mxu0 %v5882_v22 }
  0xb0   : > { %2234 = vmatmul.mubr.bf16.gmra.mrb[60].mxu0 %v1962_v45  ;;  %v5903_v45 = vld [vmem:[%s7971_s4 + $0x168] sm:$0xff]  }
  0xb1   : > { %2299 = vmatmul.mubr.bf16.gmra.mrb[60].mxu1 %v1966_v4  ;;  %5671 = vmatpush3.bf16.msra.mxu0 %v5882_v22 }
  0xb2   : > { %5674 = vmatprep.mubr.bf16.mxu0 %v6839_v14  ;;  %5672 = vmatprep.subr.bf16.mxu0 %v5883_v16 }
  0xb5   : > { %5673 = vmatpush3.bf16.msra.mxu0 %v5883_v16 }
  0xb8   : > { %5675 = vmatmul.mubr.bf16.vlgmr.msra.gmra.mrb[64].mxu0 %v6845_v37  ;;  %v5885_v37 = vld [vmem:[%s7971_s4 + $0x100] sm:$0xff]  }
  0xb9   : > { %5678 = vmatprep.mubr.bf16.mxu0 %v6874_v26  ;;  %v5886_v26 = vld [vmem:[%s7971_s4 + $0x1c0] sm:$0xff]   ;;  %5327 = vmatpush3.bf16.msra.mxu1 %v5885_v37  ;;  %v5910_v37 = vld [vmem:[%s7971_s4 + $0x1f0] sm:$0xff]  }
  0xba   : > { %5366 = vmatprep.subr.bf16.mxu0 %v5886_v26  ;;  %5328 = vmatprep.subr.bf16.mxu1 %v5887_v52 }
  0xbb   : > { %5367 = vmatpush3.bf16.msra.mxu0 %v5888_v2 }
  0xbc   : > { %5368 = vmatprep.subr.bf16.mxu0 %v5890_v10  ;;  %v5914_v10 = vld [vmem:[%s7971_s4 + $0x1f8] sm:$0xff]  }
  0xbd   : > { %5329 = vmatpush3.bf16.msra.mxu1 %v5889_v25 }
  0xbe   : > { %5330 = vmatprep.subr.bf16.mxu1 %v5891_v7  ;;  %v5915_v7 = vld [vmem:[%s7971_s4 + $0x1b8] sm:$0xff]  }
  0xbf   : > { %5369 = vmatpush3.bf16.msra.mxu0 %v5892_v60 }
  0xc0   : > { %5679 = vmatmul.mubr.bf16.gmra.mrb[68].mxu0 %v6883_v1  ;;  %5370 = vmatprep.subr.bf16.mxu0 %v5894_v6 }
  0xc1   : > { %5331 = vmatpush3.bf16.msra.mxu1 %v5893_v39  ;;  %v5916_v39 = vld [vmem:[%s7971_s4 + $0x40] sm:$0xff]  }
  0xc2   : > { %5332 = vmatprep.subr.bf16.mxu1 %v5895_v36 }
  0xc3   : > { %5371 = vmatpush3.bf16.msra.mxu0 %v5896_v40 }
  0xc4   : > { %5372 = vmatprep.subr.bf16.mxu0 %v5898_v18 }
  0xc5   : > { %5333 = vmatpush3.bf16.msra.mxu1 %v5897_v29 }
  0xc6   : > { %5334 = vmatprep.subr.bf16.mxu1 %v5899_v21 }
  0xc7   : > { %5373 = vmatpush3.bf16.msra.mxu0 %v5900_v34 }
  0xc8   : > { %5374 = vmatprep.subr.bf16.mxu0 %v5902_v19 }
  0xc9   : > { %5335 = vmatpush3.bf16.msra.mxu1 %v5901_v23 }
  0xca   : > { %5336 = vmatprep.subr.bf16.mxu1 %v5903_v45 }
  0xcb   : > { %5375 = vmatpush3.bf16.msra.mxu0 %v5904_v30 }
 0x10b   : > { %v5010_v11 = vpop.f32.mrb[0].mxu0 }
 0x10c   : > { %v5050_v51 = vpop.f32.mrb[0].mxu1  ;;  %v5011_v8 = vpop.f32.mrb[1].mxu0 }
 0x10d   : > { %v5051_v54 = vpop.f32.mrb[1].mxu1  ;;  %v5012_v53 = vadd.f32 %v5011_v8, %v5010_v11  ;;  %v5013_v57 = vpop.f32.mrb[2].mxu0  ;;  %v5905_v11 = vld [vmem:[%s7971_s4 + $0x128] sm:$0xff]  }
 0x10e   : > { %v5052_v56 = vadd.f32 %v5051_v54, %v5050_v51  ;;  %v5053_v14 = vpop.f32.mrb[2].mxu1  ;;  %v5014_v5 = vpop.f32.mrb[3].mxu0  ;;  %v5906_v51 = vld [vmem:[%s7971_s4 + $0x1e8] sm:$0xff]   ;;  %5337 = vmatpush3.bf16.msra.mxu1 %v5905_v11 }
 0x10f   : > { %v5054_v1 = vpop.f32.mrb[3].mxu1  ;;  %v5015_v0 = vadd.f32 %v5014_v5, %v5013_v57  ;;  %v5908_v8 = vld [vmem:[%s7971_s4 + $0x1a8] sm:$0xff]   ;;  %5376 = vmatprep.subr.bf16.mxu0 %v5906_v51  ;;  %v5907_v57 = vld [vmem:[%s7971_s4 + $0x170] sm:$0xff]  }
 0x110   : > { %v6994_v3 = vadd.f32 %v5052_v56, %v5012_v53  ;;  %v5055_v59 = vadd.f32 %v5054_v1, %v5053_v14  ;;  %5377 = vmatpush3.bf16.msra.mxu0 %v5908_v8  ;;  %v5909_v14 = vld [vmem:[%s7971_s4 + $0x130] sm:$0xff]   ;;  %5338 = vmatprep.subr.bf16.mxu1 %v5907_v57 }
 0x111   : > { %5378 = vmatprep.subr.bf16.mxu0 %v5910_v37 }
 0x112   : > { %v6999_v49 = vadd.f32 %v5055_v59, %v5015_v0  ;;  %v5911_v0 = vld [vmem:[%s7971_s4 + $0x178] sm:$0xff]   ;;  %v5912_v59 = vld [vmem:[%s7971_s4 + $0x1b0] sm:$0xff]   ;;  %5339 = vmatpush3.bf16.msra.mxu1 %v5909_v14 }
 0x113   : > { %v5016_v12 = vpop.f32.mrb[4].mxu0  ;;  %5340 = vmatprep.subr.bf16.mxu1 %v5911_v0 }
 0x114   : > { %v5056_v9 = vpop.f32.mrb[4].mxu1  ;;  %v5017_v33 = vpop.f32.mrb[5].mxu0  ;;  %5379 = vmatpush3.bf16.msra.mxu0 %v5912_v59 }
 0x115   : > { %v5057_v17 = vpop.f32.mrb[5].mxu1  ;;  %v5018_v61 = vadd.f32 %v5017_v33, %v5016_v12  ;;  %v5019_v13 = vpop.f32.mrb[6].mxu0  ;;  %v5913_v33 = vld [vmem:[%s7971_s4 + $0x138] sm:$0xff]   ;;  %5380 = vmatprep.subr.bf16.mxu0 %v5914_v10 }
 0x116   : > { %v5058_v15 = vadd.f32 %v5057_v17, %v5056_v9  ;;  %v5059_v20 = vpop.f32.mrb[6].mxu1  ;;  %v5020_v41 = vpop.f32.mrb[7].mxu0  ;;  %5341 = vmatpush3.bf16.msra.mxu1 %v5913_v33 }
 0x117   : > { %v5060_v24 = vpop.f32.mrb[7].mxu1  ;;  %v5021_v58 = vadd.f32 %v5020_v41, %v5019_v13  ;;  %5406 = vmatprep.subr.bf16.mxu1 %v5916_v39 }
 0x118   : > { %v7022_v62 = vadd.f32 %v5058_v15, %v5018_v61  ;;  %v5061_v42 = vadd.f32 %v5060_v24, %v5059_v20  ;;  %5381 = vmatpush3.bf16.msra.mxu0 %v5915_v7 }
 0x11a   : > { %v7027_v38 = vadd.f32 %v5061_v42, %v5021_v58 }
 0x11b   : > { %v5022_v48 = vpop.f32.mrb[8].mxu0 }
 0x11c   : > { %v5062_v31 = vpop.f32.mrb[8].mxu1  ;;  %v5023_v32 = vpop.f32.mrb[9].mxu0 }
 0x11d   : > { %v5063_v44 = vpop.f32.mrb[9].mxu1  ;;  %v5024_v27 = vadd.f32 %v5023_v32, %v5022_v48  ;;  %v5025_v50 = vpop.f32.mrb[10].mxu0 }
 0x11e   : > { %v5064_v43 = vadd.f32 %v5063_v44, %v5062_v31  ;;  %v5065_v35 = vpop.f32.mrb[10].mxu1  ;;  %v5026_v28 = vpop.f32.mrb[11].mxu0  ;;  %v5918_v31 = vld [vmem:[%s7971_s4 + $0xc0] sm:$0xff]  }
 0x11f   : > { %v5066_v63 = vpop.f32.mrb[11].mxu1  ;;  %v5027_v22 = vadd.f32 %v5026_v28, %v5025_v50  ;;  %5446 = vmatprep.subr.bf16.mxu0 %v5918_v31 }
 0x120   : > { %v7050_v46 = vadd.f32 %v5064_v43, %v5024_v27  ;;  %v5067_v16 = vadd.f32 %v5066_v63, %v5065_v35 }
 0x122   : > { %v7055_v4 = vadd.f32 %v5067_v16, %v5027_v22 }
 0x123   : > { %v5028_v54 = vpop.f32.mrb[12].mxu0 }
 0x124   : > { %v5068_v55 = vpop.f32.mrb[12].mxu1  ;;  %v5029_v53 = vpop.f32.mrb[13].mxu0 }
 0x125   : > { %v5069_v56 = vpop.f32.mrb[13].mxu1  ;;  %v5030_v26 = vadd.f32 %v5029_v53, %v5028_v54  ;;  %v5031_v1 = vpop.f32.mrb[14].mxu0 }
 0x126   : > { %v5070_v5 = vadd.f32 %v5069_v56, %v5068_v55  ;;  %v5071_v2 = vpop.f32.mrb[14].mxu1  ;;  %v5032_v52 = vpop.f32.mrb[15].mxu0 }
 0x127   : > { %v5072_v25 = vpop.f32.mrb[15].mxu1  ;;  %v5033_v12 = vadd.f32 %v5032_v52, %v5031_v1 }
 0x128   : > { %v7084_v60 = vadd.f32 %v5070_v5, %v5030_v26  ;;  %v5073_v9 = vadd.f32 %v5072_v25, %v5071_v2 }
 0x12a   : > { %v7089_v17 = vadd.f32 %v5073_v9, %v5033_v12 }
 0x12b   : > { %v5090_v61 = vpop.f32.mrb[16].mxu0 }
 0x12c   : > { %v5130_v15 = vpop.f32.mrb[16].mxu1  ;;  %v5091_v13 = vpop.f32.mrb[17].mxu0 }
 0x12d   : > { %v5131_v20 = vpop.f32.mrb[17].mxu1  ;;  %v5092_v6 = vadd.f32 %v5091_v13, %v5090_v61  ;;  %v5093_v41 = vpop.f32.mrb[18].mxu0 }
 0x12e   : > { %v5132_v24 = vadd.f32 %v5131_v20, %v5130_v15  ;;  %v5133_v40 = vpop.f32.mrb[18].mxu1  ;;  %v5094_v58 = vpop.f32.mrb[19].mxu0 }
 0x12f   : > { %v5134_v42 = vpop.f32.mrb[19].mxu1  ;;  %v1239_v36 = vadd.f32 %v5092_v6, %v6994_v3  ;;  %v5095_v29 = vadd.f32 %v5094_v58, %v5093_v41 }
 0x130   : > { %v5135_v18 = vadd.f32 %v5134_v42, %v5133_v40 }
 0x131   : > { %v1242_v34 = vadd.f32 %v5095_v29, %v6999_v49  ;;  %v7099_v48 = vadd.f32 %v5132_v24, %v1239_v36 }
 0x133   : > { %v7104_v47 = vadd.f32 %v5135_v18, %v1242_v34  ;;  %v5096_v32 = vpop.f32.mrb[20].mxu0 }
 0x134   : > { %v5136_v44 = vpop.f32.mrb[20].mxu1  ;;  %v5097_v21 = vpop.f32.mrb[21].mxu0 }
 0x135   : > { %v5137_v27 = vpop.f32.mrb[21].mxu1  ;;  %v5098_v43 = vadd.f32 %v5097_v21, %v5096_v32  ;;  %v5099_v50 = vpop.f32.mrb[22].mxu0 }
 0x136   : > { %v5138_v3 = vadd.f32 %v5137_v27, %v5136_v44  ;;  %v5139_v35 = vpop.f32.mrb[22].mxu1  ;;  %v5100_v23 = vpop.f32.mrb[23].mxu0 }
 0x137   : > { %v5140_v19 = vpop.f32.mrb[23].mxu1  ;;  %v1247_v49 = vadd.f32 %v5098_v43, %v7022_v62  ;;  %v5101_v28 = vadd.f32 %v5100_v23, %v5099_v50 }
 0x138   : > { %v5141_v63 = vadd.f32 %v5140_v19, %v5139_v35 }
 0x139   : > { %v1250_v30 = vadd.f32 %v5101_v28, %v7027_v38  ;;  %v7108_v22 = vadd.f32 %v5138_v3, %v1247_v49 }
 0x13b   : > { %v7110_v16 = vadd.f32 %v5141_v63, %v1250_v30  ;;  %v5102_v45 = vpop.f32.mrb[24].mxu0 }
 0x13c   : > { %v5142_v11 = vpop.f32.mrb[24].mxu1  ;;  %v5103_v51 = vpop.f32.mrb[25].mxu0 }
 0x13d   : > { %v5143_v8 = vpop.f32.mrb[25].mxu1  ;;  %v5104_v54 = vadd.f32 %v5103_v51, %v5102_v45  ;;  %v5105_v55 = vpop.f32.mrb[26].mxu0 }
 0x13e   : > { %v5144_v53 = vadd.f32 %v5143_v8, %v5142_v11  ;;  %v5145_v56 = vpop.f32.mrb[26].mxu1  ;;  %v5106_v57 = vpop.f32.mrb[27].mxu0 }
 0x13f   : > { %v5146_v14 = vpop.f32.mrb[27].mxu1  ;;  %v1255_v62 = vadd.f32 %v5104_v54, %v7050_v46  ;;  %v5107_v37 = vadd.f32 %v5106_v57, %v5105_v55 }
 0x140   : > { %v5147_v26 = vadd.f32 %v5146_v14, %v5145_v56 }
 0x141   : > { %v1258_v38 = vadd.f32 %v5107_v37, %v7055_v4  ;;  %v7114_v5 = vadd.f32 %v5144_v53, %v1255_v62 }
 0x143   : > { %v7116_v1 = vadd.f32 %v5147_v26, %v1258_v38  ;;  %v5108_v2 = vpop.f32.mrb[28].mxu0 }
 0x144   : > { %v5148_v0 = vpop.f32.mrb[28].mxu1  ;;  %v5109_v59 = vpop.f32.mrb[29].mxu0 }
 0x145   : > { %v5149_v52 = vpop.f32.mrb[29].mxu1  ;;  %v5110_v25 = vadd.f32 %v5109_v59, %v5108_v2  ;;  %v5111_v10 = vpop.f32.mrb[30].mxu0 }
 0x146   : > { %v5150_v12 = vadd.f32 %v5149_v52, %v5148_v0  ;;  %v5151_v9 = vpop.f32.mrb[30].mxu1  ;;  %v5112_v33 = vpop.f32.mrb[31].mxu0 }
 0x147   : > { %v5152_v7 = vpop.f32.mrb[31].mxu1  ;;  %v1263_v46 = vadd.f32 %v5110_v25, %v7084_v60  ;;  %v5113_v61 = vadd.f32 %v5112_v33, %v5111_v10 }
 0x148   : > { %v5153_v15 = vadd.f32 %v5152_v7, %v5151_v9 }
 0x149   : > { %v1266_v4 = vadd.f32 %v5113_v61, %v7089_v17  ;;  %v7120_v13 = vadd.f32 %v5150_v12, %v1263_v46 }
 0x14b   : > { %v7122_v20 = vadd.f32 %v5153_v15, %v1266_v4  ;;  %v5170_v39 = vpop.f32.mrb[32].mxu0 }
 0x14c   : > { %v5210_v6 = vpop.f32.mrb[32].mxu1  ;;  %v5171_v41 = vpop.f32.mrb[33].mxu0 }
 0x14d   : > { %v5211_v24 = vpop.f32.mrb[33].mxu1  ;;  %v5172_v40 = vadd.f32 %v5171_v41, %v5170_v39  ;;  %v5173_v42 = vpop.f32.mrb[34].mxu0 }
 0x14e   : > { %v5212_v58 = vadd.f32 %v5211_v24, %v5210_v6  ;;  %v5213_v36 = vpop.f32.mrb[34].mxu1  ;;  %v5174_v29 = vpop.f32.mrb[35].mxu0 }
 0x14f   : > { %v5214_v18 = vpop.f32.mrb[35].mxu1  ;;  %v5175_v60 = vadd.f32 %v5174_v29, %v5173_v42 }
 0x150   : > { %v1788_v34 = vadd.f32 %v5212_v58, %v5172_v40  ;;  %v5215_v31 = vadd.f32 %v5214_v18, %v5213_v36 }
 0x152   : > { %v1791_v32 = vadd.f32 %v5215_v31, %v5175_v60  ;;  %v7125_v17 = vadd.f32 %v1788_v34, %v7099_v48 }
 0x153   : > { %v5176_v44 = vpop.f32.mrb[36].mxu0 }
 0x154   : > { %v5216_v21 = vpop.f32.mrb[36].mxu1  ;;  %v7128_v27 = vadd.f32 %v1791_v32, %v7104_v47  ;;  %v5177_v43 = vpop.f32.mrb[37].mxu0 }
 0x155   : > { %v5217_v50 = vpop.f32.mrb[37].mxu1  ;;  %v5178_v3 = vadd.f32 %v5177_v43, %v5176_v44  ;;  %v5179_v23 = vpop.f32.mrb[38].mxu0 }
 0x156   : > { %v5218_v35 = vadd.f32 %v5217_v50, %v5216_v21  ;;  %v5219_v19 = vpop.f32.mrb[38].mxu1  ;;  %v5180_v49 = vpop.f32.mrb[39].mxu0 }
 0x157   : > { %v5220_v28 = vpop.f32.mrb[39].mxu1  ;;  %v5181_v30 = vadd.f32 %v5180_v49, %v5179_v23 }
 0x158   : > { %v1796_v63 = vadd.f32 %v5218_v35, %v5178_v3  ;;  %v5221_v45 = vadd.f32 %v5220_v28, %v5219_v19 }
 0x15a   : > { %v1799_v11 = vadd.f32 %v5221_v45, %v5181_v30  ;;  %v7131_v48 = vadd.f32 %v1796_v63, %v7108_v22 }
 0x15b   : > { %v5182_v51 = vpop.f32.mrb[40].mxu0 }
 0x15c   : > { %v5222_v8 = vpop.f32.mrb[40].mxu1  ;;  %v7134_v47 = vadd.f32 %v1799_v11, %v7110_v16  ;;  %v5183_v54 = vpop.f32.mrb[41].mxu0 }
 0x15d   : > { %v5223_v55 = vpop.f32.mrb[41].mxu1  ;;  %v5184_v53 = vadd.f32 %v5183_v54, %v5182_v51  ;;  %v5185_v57 = vpop.f32.mrb[42].mxu0 }
 0x15e   : > { %v5224_v56 = vadd.f32 %v5223_v55, %v5222_v8  ;;  %v5225_v14 = vpop.f32.mrb[42].mxu1  ;;  %v5186_v62 = vpop.f32.mrb[43].mxu0 }
 0x15f   : > { %v5226_v37 = vpop.f32.mrb[43].mxu1  ;;  %v5187_v38 = vadd.f32 %v5186_v62, %v5185_v57 }
 0x160   : > { %v1804_v26 = vadd.f32 %v5224_v56, %v5184_v53  ;;  %v5227_v2 = vadd.f32 %v5226_v37, %v5225_v14 }
 0x162   : > { %v1807_v0 = vadd.f32 %v5227_v2, %v5187_v38  ;;  %v7137_v22 = vadd.f32 %v1804_v26, %v7114_v5 }
 0x163   : > { %v5188_v59 = vpop.f32.mrb[44].mxu0 }
 0x164   : > { %v5228_v52 = vpop.f32.mrb[44].mxu1  ;;  %v7140_v16 = vadd.f32 %v1807_v0, %v7116_v1  ;;  %v5189_v25 = vpop.f32.mrb[45].mxu0 }
 0x165   : > { %v5229_v10 = vpop.f32.mrb[45].mxu1  ;;  %v5190_v12 = vadd.f32 %v5189_v25, %v5188_v59  ;;  %v5191_v33 = vpop.f32.mrb[46].mxu0 }
 0x166   : > { %v5230_v9 = vadd.f32 %v5229_v10, %v5228_v52  ;;  %v5231_v7 = vpop.f32.mrb[46].mxu1  ;;  %v5192_v46 = vpop.f32.mrb[47].mxu0 }
 0x167   : > { %v5232_v61 = vpop.f32.mrb[47].mxu1  ;;  %v5193_v4 = vadd.f32 %v5192_v46, %v5191_v33 }
 0x168   : > { %v1812_v15 = vadd.f32 %v5230_v9, %v5190_v12  ;;  %v5233_v39 = vadd.f32 %v5232_v61, %v5231_v7 }
 0x16a   : > { %v1815_v6 = vadd.f32 %v5233_v39, %v5193_v4  ;;  %v7143_v5 = vadd.f32 %v1812_v15, %v7120_v13 }
 0x16b   : > { %v5250_v41 = vpop.f32.mrb[48].mxu0 }
 0x16c   : > { %v5290_v24 = vpop.f32.mrb[48].mxu1  ;;  %v7146_v1 = vadd.f32 %v1815_v6, %v7122_v20  ;;  %v5251_v40 = vpop.f32.mrb[49].mxu0 }
 0x16d   : > { %v5291_v58 = vpop.f32.mrb[49].mxu1  ;;  %v5252_v42 = vadd.f32 %v5251_v40, %v5250_v41  ;;  %v5253_v29 = vpop.f32.mrb[50].mxu0 }
 0x16e   : > { %v5292_v36 = vadd.f32 %v5291_v58, %v5290_v24  ;;  %v5293_v18 = vpop.f32.mrb[50].mxu1  ;;  %v5254_v34 = vpop.f32.mrb[51].mxu0 }
 0x16f   : > { %v5294_v60 = vpop.f32.mrb[51].mxu1  ;;  %v5255_v32 = vadd.f32 %v5254_v34, %v5253_v29  ;;  %v4850_v29 = vld [vmem:[%s7973_s6] ss:$0 sm:$0xff] }
 0x170   : > { %v2277_v31 = vadd.f32 %v5292_v36, %v5252_v42  ;;  %v5295_v44 = vadd.f32 %v5294_v60, %v5293_v18 }
 0x172   : > { %v2280_v21 = vadd.f32 %v5295_v44, %v5255_v32  ;;  %v2307_v13 = vadd.f32 %v2277_v31, %v7125_v17 }
 0x173   : > { %v5256_v43 = vpop.f32.mrb[52].mxu0 }
 0x174   : > { %v5296_v50 = vpop.f32.mrb[52].mxu1  ;;  %v2308_v3 = vadd.f32 %v2280_v21, %v7128_v27  ;;  %v5257_v20 = vpop.f32.mrb[53].mxu0 }
 0x175   : > { %v5297_v35 = vpop.f32.mrb[53].mxu1  ;;  %v5258_v23 = vadd.f32 %v5257_v20, %v5256_v43  ;;  %v5259_v49 = vpop.f32.mrb[54].mxu0 }
 0x176   : > { %v5298_v19 = vadd.f32 %v5297_v35, %v5296_v50  ;;  %v5299_v28 = vpop.f32.mrb[54].mxu1  ;;  %v5260_v63 = vpop.f32.mrb[55].mxu0 }
 0x177   : > { %v5300_v30 = vpop.f32.mrb[55].mxu1  ;;  %v5261_v11 = vadd.f32 %v5260_v63, %v5259_v49 }
 0x178   : > { %v2285_v45 = vadd.f32 %v5298_v19, %v5258_v23  ;;  %v5301_v51 = vadd.f32 %v5300_v30, %v5299_v28 }
 0x17a   : > { %v2288_v8 = vadd.f32 %v5301_v51, %v5261_v11  ;;  %v2309_v54 = vadd.f32 %v2285_v45, %v7131_v48 }
 0x17b   : > { %v5262_v55 = vpop.f32.mrb[56].mxu0 }
 0x17c   : > { %v5302_v17 = vpop.f32.mrb[56].mxu1  ;;  %v2310_v53 = vadd.f32 %v2288_v8, %v7134_v47  ;;  %v5263_v56 = vpop.f32.mrb[57].mxu0 }
 0x17d   : > { %v5303_v27 = vpop.f32.mrb[57].mxu1  ;;  %v5264_v57 = vadd.f32 %v5263_v56, %v5262_v55  ;;  %v5265_v62 = vpop.f32.mrb[58].mxu0 }
 0x17e   : > { %v5304_v14 = vadd.f32 %v5303_v27, %v5302_v17  ;;  %v5305_v37 = vpop.f32.mrb[58].mxu1  ;;  %v5266_v26 = vpop.f32.mrb[59].mxu0 }
 0x17f   : > { %v5306_v38 = vpop.f32.mrb[59].mxu1  ;;  %v5267_v0 = vadd.f32 %v5266_v26, %v5265_v62 }
 0x180   : > { %v2293_v2 = vadd.f32 %v5304_v14, %v5264_v57  ;;  %v5307_v59 = vadd.f32 %v5306_v38, %v5305_v37 }
 0x182   : > { %v2296_v52 = vadd.f32 %v5307_v59, %v5267_v0  ;;  %v2311_v25 = vadd.f32 %v2293_v2, %v7137_v22  ;;  %v4849_v22 = vld [vmem:[%s7972_s5] ss:$0 sm:$0xff] }
 0x183   : > { %v5268_v10 = vpop.f32.mrb[60].mxu0 }
 0x184   : > { %v5308_v48 = vpop.f32.mrb[60].mxu1  ;;  %v2312_v12 = vadd.f32 %v2296_v52, %v7140_v16  ;;  %v5269_v9 = vpop.f32.mrb[61].mxu0 }
 0x185   : > { %v5309_v47 = vpop.f32.mrb[61].mxu1  ;;  %v5270_v33 = vadd.f32 %v5269_v9, %v5268_v10  ;;  %v5271_v46 = vpop.f32.mrb[62].mxu0 }
 0x186   : > { %v5310_v7 = vadd.f32 %v5309_v47, %v5308_v48  ;;  %v5311_v61 = vpop.f32.mrb[62].mxu1  ;;  %v5272_v15 = vpop.f32.mrb[63].mxu0 }
 0x187   : > { %v5312_v4 = vpop.f32.mrb[63].mxu1  ;;  %v5273_v6 = vadd.f32 %v5272_v15, %v5271_v46 }
 0x188   : > { %v2301_v39 = vadd.f32 %v5310_v7, %v5270_v33  ;;  %v5313_v41 = vadd.f32 %v5312_v4, %v5311_v61 }
 0x18a   : > { %v2304_v24 = vadd.f32 %v5313_v41, %v5273_v6  ;;  %v2313_v40 = vadd.f32 %v2301_v39, %v7143_v5 }
 0x18b   : > { %v5676_v58 = vpop.f32.mrb[64].mxu0 }
 0x18c   : > { %v2314_v16 = vadd.f32 %v2304_v24, %v7146_v1  ;;  %v2446_v42 = vadd.f32 %v5676_v58, %v2309_v54  ;;  %v2413_v36 = vpop.f32.mrb[65].mxu0 }
 0x18d   : > { %v2444_v18 = vadd.f32 %v2413_v36, %v2307_v13  ;;  %v5677_v34 = vpop.f32.mrb[66].mxu0 }
 0x18e   : > { %v2461_v60 = vmul.f32 %v4849_v22, %v2446_v42  ;;  %v2447_v31 = vadd.f32 %v5677_v34, %v2310_v53  ;;  %v2416_v32 = vpop.f32.mrb[67].mxu0 }
 0x18f   : > { %v2459_v44 = vmul.f32 %v4849_v22, %v2444_v18  ;;  %v2445_v5 = vadd.f32 %v2416_v32, %v2308_v3 }
 0x190   : > { %v2476_v21 = vadd.f32 %v4850_v29, %v2461_v60  ;;  %v2462_v43 = vmul.f32 %v4849_v22, %v2447_v31 }
 0x191   : > { %v2474_v50 = vadd.f32 %v4850_v29, %v2459_v44  ;;  %v2460_v20 = vmul.f32 %v4849_v22, %v2445_v5 }
 0x192   : > { %v2477_v35 = vadd.f32 %v4850_v29, %v2462_v43  ;;  %v2484_v19 = vmax.f32 %v2476_v21, 0.0 }
 0x193   : > { %v2475_v23 = vadd.f32 %v4850_v29, %v2460_v20  ;;  %v5680_v1 = vpop.f32.mrb[68].mxu0  ;;  %v2482_v30 = vmax.f32 %v2474_v50, 0.0 }
 0x194   : > { %v2485_v49 = vmax.f32 %v2477_v35, 0.0  ;;  %v2450_v28 = vadd.f32 %v5680_v1, %v2313_v40  ;;  %v2429_v63 = vpop.f32.mrb[69].mxu0 }
 0x195   : > { %v2483_v45 = vmax.f32 %v2475_v23, 0.0  ;;  %v2448_v13 = vadd.f32 %v2429_v63, %v2311_v25  ;;  %v5681_v11 = vpop.f32.mrb[70].mxu0 }
 0x196   : > { %v2491_v51 = vpack.c.bf16 %v2485_v49, %v2484_v19  ;;  %v2465_v8 = vmul.f32 %v4849_v22, %v2450_v28  ;;  %v2451_v54 = vadd.f32 %v5681_v11, %v2314_v16  ;;  %v2432_v55 = vpop.f32.mrb[71].mxu0 }
 0x197   : > { %v2490_v3 = vpack.c.bf16 %v2483_v45, %v2482_v30  ;;  %v2463_v17 = vmul.f32 %v4849_v22, %v2448_v13  ;;  %v2449_v53 = vadd.f32 %v2432_v55, %v2312_v12  ;;  %v5917_v55 = vld [vmem:[%s7971_s4] sm:$0xff]  }
 0x198   : > { %v2499_v56 = vrot.slane %v2491_v51, 4  ;;  %v2480_v27 = vadd.f32 %v4850_v29, %v2465_v8  ;;  %v2466_v57 = vmul.f32 %v4849_v22, %v2451_v54 }
 0x199   : > { %v2498_v14 = vrot.slane %v2490_v3, 4  ;;  %v2478_v62 = vadd.f32 %v4850_v29, %v2463_v17  ;;  %v2464_v37 = vmul.f32 %v4849_v22, %v2449_v53 }
 0x19a   : > { %v2481_v26 = vadd.f32 %v4850_v29, %v2466_v57  ;;  %v2488_v0 = vmax.f32 %v2480_v27, 0.0 }
 0x19b   : > { %v7163_v38 = vsel %vm332_vm0, %v2498_v14, %v2499_v56  ;;  %2510 = vst [vmem:[#allocation3] sm:$0xf0] %v2498_v14  ;;  %v2479_v2 = vadd.f32 %v4850_v29, %v2464_v37  ;;  %v2486_v10 = vmax.f32 %v2478_v62, 0.0  ;;  %v5919_v37 = vld [vmem:[%s7971_s4 + $0x48] sm:$0xff]  }
 0x19c   : > { %2511 = vst [vmem:[#allocation3 + $0x8] sm:$0xff] %v7163_v38  ;;  %v2489_v59 = vmax.f32 %v2481_v26, 0.0  ;;  %v2534_v52 = vshll.u32 %v7163_v38, 16  ;;  %v2538_v25 = vshrl.u32 %v7163_v38, 16  ;;  %v2792_v39 = vrot.slane %v7163_v38, 2 }
 0x19d   : > { %v2487_v48 = vmax.f32 %v2479_v2, 0.0  ;;  %v7175_v24 = vrot.slane %v7163_v38, 1 }
 0x19e   : > { %v2493_v12 = vpack.c.bf16 %v2489_v59, %v2488_v0  ;;  %v7168_v9 = vrot.slane %v2534_v52, 1  ;;  %v2592_v47 = vrot.slane %v2538_v25, 1  ;;  %v2593_v33 = vrot.slane %v2534_v52, 2 }
 0x19f   : > { %v2492_v7 = vpack.c.bf16 %v2487_v48, %v2486_v10 }
 0x1a0   : > { %v2503_v46 = vrot.slane %v2493_v12, 4  ;;  %v2540_v15 = vor.u32 %v2538_v25, %v7168_v9  ;;  %v7172_v6 = vor.u32 %v2593_v33, %v2592_v47  ;;  %v5920_v12 = vld [vmem:[%s7971_s4 + $0x80] sm:$0xff]   ;;  %v5921_v33 = vld [vmem:[%s7971_s4 + $0x8] sm:$0xff]  }
 0x1a1   : > { %v2501_v61 = vrot.slane %v2492_v7, 4  ;;  %v5922_v7 = vld [vmem:[%s7971_s4 + $0xc8] sm:$0xff]  }
 0x1a2   : > { %2514 = vst [vmem:[#allocation3 + $0x20] sm:$0xf] %v2503_v46  ;;  %v2681_v4 = vld [vmem:[#allocation3] sm:$0xfc] }
 0x1a3   : > { %v2683_v41 = vld [vmem:[#allocation3] sm:$0xf8]  ;;  %v7178_v40 = vsel %vm332_vm0, %v2499_v56, %v2501_v61  ;;  %v7181_v58 = vsel %vm332_vm0, %v2501_v61, %v2503_v46  ;;  %v2686_v22 = vshrl.u32 %v2681_v4, 16  ;;  %v2688_v16 = vshll.u32 %v2681_v4, 16 }
 0x1a4   : > { %2512 = vst [vmem:[#allocation3 + $0x10] sm:$0xff] %v7178_v40  ;;  %2513 = vst [vmem:[#allocation3 + $0x18] sm:$0xff] %v7181_v58  ;;  %v2542_v42 = vshll.u32 %v7178_v40, 16  ;;  %v2791_v36 = vrot.slane %v2681_v4, 2  ;;  %v2546_v29 = vshrl.u32 %v7178_v40, 16  ;;  %v2550_v18 = vshll.u32 %v7181_v58, 16 }
 0x1a5   : > { %v2690_v34 = vrot.slane %v2688_v16, 1  ;;  %v2554_v60 = vshrl.u32 %v7181_v58, 16  ;;  %v2708_v31 = vshrl.u32 %v2683_v41, 16  ;;  %v2711_v32 = vshll.u32 %v2683_v41, 16 }
 0x1a6   : > { %v2544_v44 = vrot.slane %v2542_v42, 1  ;;  %v2793_v5 = vsel %vm637_vm3, %v2791_v36, %v2792_v39  ;;  %v2552_v21 = vrot.slane %v2550_v18, 1  ;;  %v2601_v43 = vrot.slane %v2550_v18, 2 }
 0x1a7   : > { %v2691_v50 = vor.u32 %v2690_v34, %v2686_v22  ;;  %v2600_v20 = vrot.slane %v2554_v60, 1  ;;  %v2596_v35 = vrot.slane %v2546_v29, 1  ;;  %v2597_v23 = vrot.slane %v2542_v42, 2 }
 0x1a8   : > { %v7193_v1 = vsel %vm369_vm2, %v2540_v15, %v2544_v44  ;;  %v2548_v19 = vor.u32 %v2546_v29, %v2544_v44  ;;  %v2710_v49 = vrot.slane %v2708_v31, 1  ;;  %v2713_v28 = vrot.slane %v2711_v32, 2  ;;  %v5924_v31 = vld [vmem:[%s7971_s4 + $0x88] sm:$0xff]  }
 0x1a9   : > { %v2692_v63 = vsel %vm369_vm2, %v2691_v50, %v7168_v9  ;;  %v2795_v30 = vrot.slane %v7193_v1, 2  ;;  %v7198_v45 = vor.u32 %v2601_v43, %v2600_v20  ;;  %v2598_v13 = vor.u32 %v2597_v23, %v2596_v35  ;;  %v7227_v26 = vld [vmem:[#allocation3 + $0x20] sm:$0x7]  ;;  %v5926_v43 = vld [vmem:[%s7971_s4 + $0xd0] sm:$0xff]   ;;  %v5927_v20 = vld [vmem:[%s7971_s4 + $0x58] sm:$0xff]  }
 0x1aa   : > { %v2794_v11 = vrot.slane %v2692_v63, 2  ;;  %v7201_v51 = vsel %vm369_vm2, %v2548_v19, %v2552_v21  ;;  %v2714_v8 = vor.u32 %v2713_v28, %v2710_v49  ;;  %v2574_v54 = vrot.slane %v7178_v40, 1  ;;  %v7229_v2 = vld [vmem:[#allocation3 + $0x20] sm:$0xf]  ;;  %v5928_v63 = vld [vmem:[%s7971_s4 + $0x90] sm:$0xff]  }
 0x1ab   : > { %v2805_v3 = vrot.slane %v7201_v51, 2  ;;  %v7210_v17 = vsel %vm429_vm4, %v7172_v6, %v2598_v13  ;;  %v2703_v53 = vrot.slane %v2683_v41, 1  ;;  %v7214_v56 = vsel %vm429_vm4, %v2598_v13, %v7198_v45  ;;  %v5923_v41 = vld [vmem:[%s7971_s4 + $0x50] sm:$0xff]   ;;  %v7290_v13 = vld [vmem:[#allocation3] sm:$0xff] }
 0x1ac   : > { %v2796_v27 = vsel %vm637_vm3, %v2794_v11, %v2795_v30  ;;  %v2715_v57 = vsel %vm429_vm4, %v2714_v8, %v7172_v6  ;;  %v2801_v14 = vrot.slane %v7210_v17, 2  ;;  %v7222_v62 = vsel %vm415_vm1, %v7175_v24, %v2574_v54  ;;  %v5930_v8 = vld [vmem:[%s7971_s4 + $0xd8] sm:$0xff]  }
 0x1ad   : > { %3067 = vmatprep.mubr.bf16.mxu1 %v2796_v27  ;;  %v2806_v0 = vsel %vm637_vm3, %v2795_v30, %v2805_v3  ;;  %v2800_v59 = vrot.slane %v2715_v57, 2  ;;  %v2704_v52 = vsel %vm415_vm1, %v2703_v53, %v7175_v24  ;;  %v2798_v25 = vrot.slane %v7222_v62, 2 }
 0x1ae   : > { %3068 = vmatmul.mubr.bf16.vlgmr.msra.gmra.mrb[64].mxu1 %v2793_v5  ;;  %v2797_v10 = vrot.slane %v2704_v52, 2  ;;  %v2809_v48 = vrot.slane %v7214_v56, 2  ;;  %v2694_v46 = vshll.u32 %v7227_v26, 16  ;;  %v7248_v61 = vrot.slane %v7181_v58, 1 }
 0x1af   : > { %5407 = vmatpush3.bf16.msra.mxu1 %v5917_v55  ;;  %3075 = vmatprep.mubr.bf16.mxu1 %v2806_v0  ;;  %v2802_v47 = vsel %vm637_vm3, %v2800_v59, %v2801_v14  ;;  %v2717_v15 = vshrl.u32 %v7229_v2, 16  ;;  %v2803_v22 = vrot.slane %v7178_v40, 2  ;;  %v7256_v16 = vor.u32 %v2554_v60, %v2552_v21  ;;  %v5925_v60 = vld [vmem:[%s7971_s4 + $0x10] sm:$0xff]   ;;  %v5931_v55 = vld [vmem:[%s7971_s4 + $0x60] sm:$0xff]   ;;  %v7314_v0 = vld [vmem:[#allocation3] sm:$0xfe] }
 0x1b0   : > { %3132 = vmatprep.mubr.bf16.mxu0 %v2802_v47  ;;  %v2799_v4 = vsel %vm637_vm3, %v2797_v10, %v2798_v25  ;;  %5408 = vmatprep.subr.bf16.mxu1 %v5919_v37  ;;  %v2720_v42 = vshll.u32 %v7229_v2, 16  ;;  %v2810_v36 = vsel %vm637_vm3, %v2801_v14, %v2809_v48  ;;  %v2696_v29 = vrot.slane %v2694_v46, 1  ;;  %v5932_v14 = vld [vmem:[%s7971_s4 + $0x98] sm:$0xff]   ;;  %v5933_v59 = vld [vmem:[%s7971_s4 + $0x20] sm:$0xff]   ;;  %v7327_v47 = vld [vmem:[#allocation3 + $0x20] sm:$0x3] }
 0x1b1   : > { %3133 = vmatmul.mubr.bf16.vlgmr.msra.gmra.mrb[72].mxu0 %v2799_v4  ;;  %v7262_v18 = vsel %vm415_vm1, %v2574_v54, %v7248_v61  ;;  %v2719_v34 = vrot.slane %v2717_v15, 1  ;;  %v2698_v35 = vshrl.u32 %v7227_v26, 16  ;;  %v2804_v23 = vsel %vm637_vm3, %v2792_v39, %v2803_v22  ;;  %v5929_v39 = vld [vmem:[%s7971_s4 + $0x18] sm:$0xff]   ;;  %v5936_v4 = vld [vmem:[%s7971_s4 + $0xa0] sm:$0xff]  }
 0x1b2   : > { %3140 = vmatprep.mubr.bf16.mxu0 %v2810_v36  ;;  %5447 = vmatpush3.bf16.msra.mxu0 %v5920_v12  ;;  %v2722_v32 = vrot.slane %v2720_v42, 2  ;;  %v2697_v44 = vsel %vm369_vm2, %v7256_v16, %v2696_v29  ;;  %v2807_v21 = vrot.slane %v7262_v18, 2  ;;  %v2705_v19 = vrot.slane %v7227_v26, 1  ;;  %v5938_v42 = vld [vmem:[%s7971_s4 + $0xe8] sm:$0xff]  }
 0x1b3   : > { %5409 = vmatpush3.bf16.msra.mxu1 %v5921_v33  ;;  %5448 = vmatprep.subr.bf16.mxu0 %v5922_v7  ;;  %v2813_v5 = vrot.slane %v2697_v44, 2  ;;  %v2700_v30 = vor.u32 %v2698_v35, %v2696_v29  ;;  %v2811_v53 = vrot.slane %v7181_v58, 2  ;;  %v2529_v57 = vshll.u32 %v7290_v13, 16  ;;  %v5941_v35 = vld [vmem:[%s7971_s4 + $0x30] sm:$0xff]  }
 0x1b4   : > { %5410 = vmatprep.subr.bf16.mxu1 %v5923_v41  ;;  %v2723_v50 = vor.u32 %v2722_v32, %v2719_v34  ;;  %v2808_v54 = vsel %vm637_vm3, %v2798_v25, %v2807_v21  ;;  %v7308_v27 = vsel %vm415_vm1, %v7248_v61, %v2705_v19  ;;  %v5934_v25 = vld [vmem:[%s7971_s4 + $0xe0] sm:$0xff]   ;;  %v2585_v7 = vshrl.u32 %v7314_v0, 16  ;;  %v7335_v41 = vld [vmem:[#allocation3] sm:$0xe0] }
 0x1b5   : > { %v2814_v49 = vsel %vm637_vm3, %v2805_v3, %v2813_v5  ;;  %v2821_v37 = vrot.slane %v2700_v30, 2  ;;  %v2815_v52 = vrot.slane %v7308_v27, 2  ;;  %v2812_v12 = vsel %vm637_vm3, %v2803_v22, %v2811_v53  ;;  %v5937_v22 = vld [vmem:[%s7971_s4 + $0x28] sm:$0xff]   ;;  %v5942_v30 = vld [vmem:[%s7971_s4 + $0xf0] sm:$0xff]  }
 0x1b6   : > { %5449 = vmatpush3.bf16.msra.mxu0 %v5924_v31  ;;  %3076 = vmatmul.mubr.bf16.gmra.mrb[68].mxu1 %v2804_v23  ;;  %v2724_v28 = vsel %vm429_vm4, %v7198_v45, %v2723_v50  ;;  %v2825_v10 = vrot.slane %v2723_v50, 2  ;;  %v2531_v33 = vrot.slane %v2529_v57, 1  ;;  %v2588_v46 = vshll.u32 %v7314_v0, 16  ;;  %v5939_v31 = vld [vmem:[%s7971_s4 + $0x70] sm:$0xff]  }
 0x1b7   : > { %5411 = vmatpush3.bf16.msra.mxu1 %v5925_v60  ;;  %3083 = vmatprep.mubr.bf16.mxu1 %v2814_v49  ;;  %v2817_v11 = vrot.slane %v2724_v28, 2  ;;  %v2822_v15 = vsel %vm637_vm3, %v2813_v5, %v2821_v37  ;;  %v2527_v36 = vshrl.u32 %v7290_v13, 16  ;;  %v2816_v29 = vsel %vm637_vm3, %v2807_v21, %v2815_v52  ;;  %v7350_v60 = vld [vmem:[#allocation3 + $0x20] sm:$0x1f] }
 0x1b8   : > { %5450 = vmatprep.subr.bf16.mxu0 %v5926_v43  ;;  %5412 = vmatprep.subr.bf16.mxu1 %v5927_v20  ;;  %v2819_v32 = vrot.slane %v7327_v47, 2  ;;  %v2587_v5 = vrot.slane %v2585_v7, 1  ;;  %v2590_v43 = vrot.slane %v2588_v46, 2  ;;  %v3509_v50 = vrot.slane %v7335_v41, 1  ;;  %v5940_v21 = vld [vmem:[%s7971_s4 + $0xa8] sm:$0xff]  }
 0x1b9   : > { %3141 = vmatmul.mubr.bf16.gmra.mrb[76].mxu0 %v2808_v54  ;;  %v2818_v3 = vsel %vm637_vm3, %v2809_v48, %v2817_v11  ;;  %v5935_v48 = vld [vmem:[%s7971_s4 + $0x68] sm:$0xff]   ;;  %v2826_v34 = vsel %vm637_vm3, %v2817_v11, %v2825_v10  ;;  %v2532_v44 = vor.u32 %v2531_v33, %v2527_v36  ;;  %v3604_v20 = vrot.slane %v7222_v62, 4  ;;  %v5943_v11 = vld [vmem:[%s7971_s4 + $0x78] sm:$0xff]  }
 0x1ba   : > { %3148 = vmatprep.mubr.bf16.mxu0 %v2818_v3  ;;  %5451 = vmatpush3.bf16.msra.mxu0 %v5928_v63  ;;  %v2823_v23 = vrot.slane %v2705_v19, 2  ;;  %v3510_v49 = vsel %vm415_vm1, %v3509_v50, %v7175_v24  ;;  %v3500_v28 = vshll.u32 %v7350_v60, 16  ;;  %v7365_v63 = vld [vmem:[#allocation3 + $0x20] sm:$0x3f]  ;;  %v3613_v26 = vrot.slane %v7262_v18, 4  ;;  %v5944_v3 = vld [vmem:[%s7971_s4 + $0xb0] sm:$0xff]  }
 0x1bb   : > { %5413 = vmatpush3.bf16.msra.mxu1 %v5929_v39  ;;  %5452 = vmatprep.subr.bf16.mxu0 %v5930_v8  ;;  %v3603_v39 = vrot.slane %v3510_v49, 4  ;;  %v2820_v19 = vsel %vm637_vm3, %v2811_v53, %v2819_v32  ;;  %v2537_v8 = vsel %vm369_vm2, %v2532_v44, %v7168_v9  ;;  %v2591_v54 = vor.u32 %v2590_v43, %v2587_v5  ;;  %v5949_v32 = vld [vmem:[%s7971_s4 + $0x200] sm:$0xff]   ;;  %v7435_v44 = vld [vmem:[#allocation3 + $0x20] sm:$0x1] }
 0x1bc   : > { %5414 = vmatprep.subr.bf16.mxu1 %v5931_v55  ;;  %v7377_v55 = vrot.slane %v3500_v28, 1  ;;  %v7386_v57 = vsel %vm332_vm0, %v3604_v20, %v3613_v26  ;;  %v3523_v53 = vshrl.u32 %v7365_v63, 16  ;;  %v2824_v37 = vsel %vm637_vm3, %v2815_v52, %v2823_v23  ;;  %v5948_v52 = vld [vmem:[%s7971_s4 + $0x240] sm:$0xff]   ;;  %v5951_v50 = vld [vmem:[%s7971_s4 + $0x248] sm:$0xff]  }
 0x1bd   : > { %v7383_v27 = vsel %vm332_vm0, %v3603_v39, %v3604_v20  ;;  %v7980_v10 = vrot.slane %v7201_v51, 4  ;;  %v5950_v43 = vld [vmem:[%s7971_s4 + $0x2c0] sm:$0xff]   ;;  %v7979_v23 = vrot.slane %v7214_v56, 4 }
 0x1be   : > { %5453 = vmatpush3.bf16.msra.mxu0 %v5932_v14  ;;  %3084 = vmatmul.mubr.bf16.gmra.mrb[72].mxu1 %v2812_v12  ;;  %v3526_v14 = vshll.u32 %v7365_v63, 16  ;;  %v7403_v12 = vld [vmem:[#allocation3] sm:$0xc0]  ;;  %v3525_v7 = vrot.slane %v3523_v53, 1  ;;  %v5952_v39 = vld [vmem:[%s7971_s4 + $0x280] sm:$0xff]  }
 0x1bf   : > { %5415 = vmatpush3.bf16.msra.mxu1 %v5933_v59  ;;  %3091 = vmatprep.mubr.bf16.mxu1 %v2822_v15  ;;  %v5945_v59 = vld [vmem:[%s7971_s4 + $0x38] sm:$0xff]   ;;  %v7976_v15 = vrot.slane %v7350_v60, 1  ;;  %v3984_v20 = vshrl.u32 %v7403_v12, 16 }
 0x1c0   : > { %5454 = vmatprep.subr.bf16.mxu0 %v5934_v25  ;;  %5416 = vmatprep.subr.bf16.mxu1 %v5935_v48  ;;  %v5946_v25 = vld [vmem:[%s7971_s4 + $0xf8] sm:$0xff]   ;;  %v7401_v48 = vsel %vm369_vm2, %v7256_v16, %v7377_v55  ;;  %v3528_v46 = vrot.slane %v3526_v14, 2  ;;  %v4089_v14 = vrot.slane %v7193_v1, 6 }
 0x1c1   : > { %3149 = vmatmul.mubr.bf16.gmra.mrb[80].mxu0 %v2816_v29  ;;  %v7978_v33 = vrot.slane %v7401_v48, 4 }
 0x1c2   : > { %3156 = vmatprep.mubr.bf16.mxu0 %v2826_v34  ;;  %5455 = vmatpush3.bf16.msra.mxu0 %v5936_v4  ;;  %v2595_v4 = vsel %vm429_vm4, %v2591_v54, %v7172_v6  ;;  %v7423_v29 = vor.u32 %v3528_v46, %v3525_v7  ;;  %v3986_v34 = vshll.u32 %v7403_v12, 16  ;;  %v7467_v54 = vld [vmem:[#allocation3] sm:$0xf0] }
 0x1c3   : > { %5417 = vmatpush3.bf16.msra.mxu1 %v5937_v22  ;;  %5456 = vmatprep.subr.bf16.mxu0 %v5938_v42  ;;  %v2571_v22 = vrot.slane %v7314_v0, 1  ;;  %v5947_v42 = vld [vmem:[%s7971_s4 + $0xb8] sm:$0xff]   ;;  %v7421_v36 = vsel %vm332_vm0, %v7980_v10, %v7978_v33  ;;  %v7429_v0 = vsel %vm415_vm1, %v7248_v61, %v7976_v15 }
 0x1c4   : > { %5418 = vmatprep.subr.bf16.mxu1 %v5939_v31  ;;  %v3981_v31 = vld [vmem:[#allocation3] sm:$0x80]  ;;  %v7975_v5 = vrot.slane %v7429_v0, 4 }
 0x1c6   : > { %5457 = vmatpush3.bf16.msra.mxu0 %v5940_v21  ;;  %3092 = vmatmul.mubr.bf16.gmra.mrb[76].mxu1 %v2820_v19  ;;  %v7447_v21 = vsel %vm429_vm4, %v7198_v45, %v7423_v29  ;;  %v7455_v28 = vsel %vm332_vm0, %v3613_v26, %v7975_v5  ;;  %v5953_v19 = vld [vmem:[%s7971_s4 + $0x208] sm:$0xff]  }
 0x1c7   : > { %5419 = vmatpush3.bf16.msra.mxu1 %v5941_v35  ;;  %3389 = vmatprep.mubr.bf16.mxu1 %v2537_v8  ;;  %v3988_v35 = vrot.slane %v3986_v34, 1  ;;  %v7977_v49 = vrot.slane %v7447_v21, 4  ;;  %v2558_v8 = vshll.u32 %v7435_v44, 16 }
 0x1c8   : > { %5458 = vmatprep.subr.bf16.mxu0 %v5942_v30  ;;  %5420 = vmatprep.subr.bf16.mxu1 %v5943_v11  ;;  %v4001_v30 = vrot.slane %v3981_v31, 1  ;;  %v2573_v11 = vsel %vm415_vm1, %v2571_v22, %v7175_v24  ;;  %v4092_v22 = vrot.slane %v7222_v62, 6 }
 0x1c9   : > { %3157 = vmatmul.mubr.bf16.gmra.mrb[84].mxu0 %v2824_v37  ;;  %v3989_v26 = vor.u32 %v3988_v35, %v3984_v20  ;;  %v7478_v53 = vsel %vm332_vm0, %v7979_v23, %v7977_v49  ;;  %v4095_v37 = vrot.slane %v7210_v17, 6  ;;  %v4103_v35 = vrot.slane %v7214_v56, 6 }
 0x1ca   : > { %5459 = vmatpush3.bf16.msra.mxu0 %v5944_v3  ;;  %3454 = vmatprep.mubr.bf16.mxu0 %v2595_v4  ;;  %v4006_v3 = vshrl.u32 %v3981_v31, 16  ;;  %v4002_v4 = vsel %vm415_vm1, %v4001_v30, %v7175_v24  ;;  %v5956_v24 = vld [vmem:[%s7971_s4 + $0x288] sm:$0xff]   ;;  %v3492_v23 = vshrl.u32 %v7467_v54, 16 }
 0x1cb   : > { %5421 = vmatpush3.bf16.msra.mxu1 %v5945_v59  ;;  %5460 = vmatprep.subr.bf16.mxu0 %v5946_v25  ;;  %v4099_v59 = vrot.slane %v7201_v51, 6  ;;  %v7483_v25 = vld [vmem:[#allocation3 + $0x20] sm:$0x7f]  ;;  %v3990_v7 = vsel %vm369_vm2, %v3989_v26, %v7168_v9 }
 0x1cc   : > { %5486 = vmatprep.subr.bf16.mxu1 %v5948_v52  ;;  %v5955_v52 = vld [vmem:[%s7971_s4 + $0x250] sm:$0xff]   ;;  %v4008_v46 = vrot.slane %v4006_v3, 1  ;;  %v4088_v34 = vrot.slane %v3990_v7, 6  ;;  %v3992_v30 = vshll.u32 %v7483_v25, 16  ;;  %v4101_v7 = vrot.slane %v7262_v18, 6 }
 0x1cd   : > { %v7497_v31 = vsel %vm1932_vm5, %v4089_v14, %v4099_v59 }
 0x1ce   : > { %5461 = vmatpush3.bf16.msra.mxu0 %v5947_v42  ;;  %3390 = vmatmul.mubr.bf16.vlgmr.msra.gmra.mrb[80].mxu1 %v7290_v13  ;;  %v5954_v13 = vld [vmem:[%s7971_s4 + $0x2c8] sm:$0xff]   ;;  %v2605_v42 = vshrl.u32 %v7327_v47, 16  ;;  %v4009_v20 = vsel %vm429_vm4, %v4008_v46, %v7172_v6  ;;  %v5958_v46 = vld [vmem:[%s7971_s4 + $0x2d0] sm:$0xff]  }
 0x1cf   : > { %5487 = vmatpush3.bf16.msra.mxu1 %v5949_v32  ;;  %3397 = vmatprep.mubr.bf16.mxu1 %v7193_v1  ;;  %v4091_v32 = vrot.slane %v4002_v4, 6  ;;  %v4094_v26 = vrot.slane %v4009_v20, 6  ;;  %v7532_v4 = vrot.slane %v3992_v30, 1  ;;  %v7540_v20 = vsel %vm1932_vm5, %v4092_v22, %v4101_v7 }
 0x1d0   : > { %5526 = vmatprep.subr.bf16.mxu0 %v5950_v43  ;;  %5488 = vmatprep.subr.bf16.mxu1 %v5951_v50  ;;  %v7499_v43 = vld [vmem:[#allocation3 + $0x20] sm:$0xff]  ;;  %v3494_v50 = vshll.u32 %v7467_v54, 16  ;;  %v3517_v30 = vshll.u32 %v7335_v41, 16 }
 0x1d1   : > { %3455 = vmatmul.mubr.bf16.vlgmr.msra.gmra.mrb[88].mxu0 %v2573_v11  ;;  %v5957_v11 = vld [vmem:[%s7971_s4 + $0x210] sm:$0xff]   ;;  %v7517_v3 = vsel %vm1932_vm5, %v4091_v32, %v4092_v22  ;;  %v7537_v32 = vsel %vm1932_vm5, %v4094_v26, %v4095_v37  ;;  %v4014_v5 = vshll.u32 %v7499_v43, 16  ;;  %v7551_v15 = vsel %vm369_vm2, %v7256_v16, %v7532_v4  ;;  %v5962_v26 = vld [vmem:[%s7971_s4 + $0x2d8] sm:$0xff]  }
 0x1d2   : > { %3462 = vmatprep.mubr.bf16.mxu0 %v7210_v17  ;;  %5527 = vmatpush3.bf16.msra.mxu0 %v5952_v39  ;;  %v7514_v39 = vsel %vm1932_vm5, %v4088_v34, %v4089_v14  ;;  %v7530_v14 = vsel %vm1932_vm5, %v4095_v37, %v4103_v35  ;;  %v4011_v34 = vshrl.u32 %v7499_v43, 16  ;;  %v7981_v22 = vrot.slane %v7483_v25, 1 }
 0x1d3   : > { %5489 = vmatpush3.bf16.msra.mxu1 %v5953_v19  ;;  %5528 = vmatprep.subr.bf16.mxu0 %v5954_v13  ;;  %v5959_v19 = vld [vmem:[%s7971_s4 + $0x258] sm:$0xff]   ;;  %v2608_v13 = vshll.u32 %v7327_v47, 16  ;;  %v5960_v47 = vld [vmem:[%s7971_s4 + $0x290] sm:$0xff]   ;;  %v4107_v49 = vrot.slane %v7551_v15, 6  ;;  %v4016_v33 = vrot.slane %v4014_v5, 2  ;;  %v7990_v15 = vrot.slane %v7483_v25, 1 }
 0x1d4   : > { %5490 = vmatprep.subr.bf16.mxu1 %v5955_v52  ;;  %v3514_v52 = vshrl.u32 %v7335_v41, 16  ;;  %v4013_v37 = vrot.slane %v4011_v34, 1  ;;  %v3496_v41 = vrot.slane %v3494_v50, 1  ;;  %v2607_v34 = vrot.slane %v2605_v42, 1 }
 0x1d5   : > { %v7570_v10 = vsel %vm415_vm1, %v7248_v61, %v7981_v22  ;;  %v2610_v50 = vrot.slane %v2608_v13, 2  ;;  %v7578_v5 = vsel %vm1932_vm5, %v4099_v59, %v4107_v49  ;;  %v3519_v22 = vrot.slane %v3517_v30, 2 }
 0x1d6   : > { %5529 = vmatpush3.bf16.msra.mxu0 %v5956_v24  ;;  %3398 = vmatmul.mubr.bf16.gmra.mrb[84].mxu1 %v7163_v38  ;;  %v5961_v24 = vld [vmem:[%s7971_s4 + $0x218] sm:$0xff]   ;;  %v4109_v42 = vrot.slane %v7570_v10, 6  ;;  %v3516_v13 = vrot.slane %v3514_v52, 1  ;;  %v3497_v59 = vor.u32 %v3496_v41, %v3492_v23  ;;  %v5967_v52 = vld [vmem:[%s7971_s4 + $0x268] sm:$0xff]  }
 0x1d7   : > { %5491 = vmatpush3.bf16.msra.mxu1 %v5957_v11  ;;  %3405 = vmatprep.mubr.bf16.mxu1 %v7201_v51  ;;  %v5963_v11 = vld [vmem:[%s7971_s4 + $0x260] sm:$0xff]   ;;  %v2611_v30 = vor.u32 %v2610_v50, %v2607_v34  ;;  %v5972_v50 = vld [vmem:[%s7971_s4 + $0x2a8] sm:$0xff]  }
 0x1d8   : > { %5530 = vmatprep.subr.bf16.mxu0 %v5958_v46  ;;  %5492 = vmatprep.subr.bf16.mxu1 %v5959_v19  ;;  %v7580_v46 = vor.u32 %v4016_v33, %v4013_v37  ;;  %v5964_v19 = vld [vmem:[%s7971_s4 + $0x298] sm:$0xff]   ;;  %v5965_v33 = vld [vmem:[%s7971_s4 + $0x220] sm:$0xff]   ;;  %v7600_v37 = vsel %vm1932_vm5, %v4101_v7, %v4109_v42 }
 0x1d9   : > { %3463 = vmatmul.mubr.bf16.gmra.mrb[92].mxu0 %v7222_v62  ;;  %v2560_v62 = vrot.slane %v2558_v8, 1  ;;  %v5966_v8 = vld [vmem:[%s7971_s4 + $0x2e0] sm:$0xff]   ;;  %v2612_v34 = vsel %vm429_vm4, %v7198_v45, %v2611_v30 }
 0x1da   : > { %3470 = vmatprep.mubr.bf16.mxu0 %v7214_v56  ;;  %5531 = vmatpush3.bf16.msra.mxu0 %v5960_v47  ;;  %v7595_v47 = vsel %vm429_vm4, %v7198_v45, %v7580_v46  ;;  %v5968_v7 = vld [vmem:[%s7971_s4 + $0x2a0] sm:$0xff]   ;;  %v2578_v45 = vrot.slane %v7435_v44, 1  ;;  %v5976_v44 = vld [vmem:[%s7971_s4 + $0x2b0] sm:$0xff]  }
 0x1db   : > { %5493 = vmatpush3.bf16.msra.mxu1 %v5961_v24  ;;  %5532 = vmatprep.subr.bf16.mxu0 %v5962_v26  ;;  %v4111_v23 = vrot.slane %v7595_v47, 6  ;;  %v2561_v24 = vsel %vm369_vm2, %v7256_v16, %v2560_v62  ;;  %v3520_v26 = vor.u32 %v3519_v22, %v3516_v13  ;;  %v5970_v16 = vld [vmem:[%s7971_s4 + $0x2e8] sm:$0xff]   ;;  %v3498_v22 = vsel %vm369_vm2, %v3497_v59, %v7168_v9  ;;  %v5974_v13 = vld [vmem:[%s7971_s4 + $0x2f0] sm:$0xff]   ;;  %v5980_v30 = vld [vmem:[%s7971_s4 + $0x340] sm:$0xff]  }
 0x1dc   : > { %5494 = vmatprep.subr.bf16.mxu1 %v5963_v11  ;;  %v5969_v11 = vld [vmem:[%s7971_s4 + $0x228] sm:$0xff]   ;;  %v3601_v9 = vrot.slane %v7193_v1, 4  ;;  %v5975_v1 = vld [vmem:[%s7971_s4 + $0x278] sm:$0xff]  }
 0x1dd   : > { %v7620_v41 = vsel %vm1932_vm5, %v4103_v35, %v4111_v23  ;;  %v5971_v35 = vld [vmem:[%s7971_s4 + $0x270] sm:$0xff]   ;;  %v3521_v62 = vsel %vm429_vm4, %v3520_v26, %v7172_v6  ;;  %v3607_v6 = vrot.slane %v7210_v17, 4  ;;  %v2579_v17 = vsel %vm415_vm1, %v7248_v61, %v2578_v45  ;;  %v5979_v26 = vld [vmem:[%s7971_s4 + $0x2b8] sm:$0xff]  }
 0x1de   : > { %5533 = vmatpush3.bf16.msra.mxu0 %v5964_v19  ;;  %3406 = vmatmul.mubr.bf16.gmra.mrb[88].mxu1 %v7178_v40  ;;  %v3600_v19 = vrot.slane %v3498_v22, 4  ;;  %v3598_v61 = vrot.slane %v7163_v38, 4  ;;  %v3609_v45 = vrot.slane %v7178_v40, 4  ;;  %v6024_v47 = vld [vmem:[#allocation3 + $0x10] sm:$0xff] }
 0x1df   : > { %5495 = vmatpush3.bf16.msra.mxu1 %v5965_v33  ;;  %3413 = vmatprep.mubr.bf16.mxu1 %v2561_v24  ;;  %v3606_v33 = vrot.slane %v3521_v62, 4  ;;  %v5986_v62 = vld [vmem:[%s7971_s4 + $0x3c8] sm:$0xff]  }
 0x1e0   : > { %5534 = vmatprep.subr.bf16.mxu0 %v5966_v8  ;;  %5496 = vmatprep.subr.bf16.mxu1 %v5967_v52  ;;  %v3602_v59 = vsel %vm332_vm0, %v3600_v19, %v3601_v9  ;;  %v5977_v8 = vld [vmem:[%s7971_s4 + $0x238] sm:$0xff]   ;;  %v5985_v19 = vld [vmem:[%s7971_s4 + $0x308] sm:$0xff]  }
 0x1e1   : > { %3471 = vmatmul.mubr.bf16.gmra.mrb[96].mxu0 %v7262_v18  ;;  %v5973_v18 = vld [vmem:[%s7971_s4 + $0x230] sm:$0xff]   ;;  %v5978_v52 = vld [vmem:[%s7971_s4 + $0x2f8] sm:$0xff]   ;;  %v3608_v24 = vsel %vm332_vm0, %v3606_v33, %v3607_v6  ;;  %v3504_v33 = vshrl.u32 %v7350_v60, 16 }
 0x1e2   : > { %3478 = vmatprep.mubr.bf16.mxu0 %v2612_v34  ;;  %5535 = vmatpush3.bf16.msra.mxu0 %v5968_v7  ;;  %v3597_v7 = vrot.slane %v7467_v54, 4  ;;  %v5983_v54 = vld [vmem:[%s7971_s4 + $0x348] sm:$0xff]  }
 0x1e3   : > { %5497 = vmatpush3.bf16.msra.mxu1 %v5969_v11  ;;  %5536 = vmatprep.subr.bf16.mxu0 %v5970_v16  ;;  %v5981_v11 = vld [vmem:[%s7971_s4 + $0x300] sm:$0xff]  }
 0x1e4   : > { %5498 = vmatprep.subr.bf16.mxu1 %v5971_v35  ;;  %v5982_v16 = vld [vmem:[%s7971_s4 + $0x3c0] sm:$0xff]   ;;  %v3599_v22 = vsel %vm332_vm0, %v3597_v7, %v3598_v61  ;;  %v7984_v35 = vrot.slane %v7201_v51, 4  ;;  %v5987_v51 = vld [vmem:[%s7971_s4 + $0x350] sm:$0xff]  }
 0x1e6   : > { %5537 = vmatpush3.bf16.msra.mxu0 %v5972_v50  ;;  %3414 = vmatmul.mubr.bf16.gmra.mrb[92].mxu1 %v7181_v58  ;;  %v3612_v34 = vsel %vm332_vm0, %v3601_v9, %v7984_v35  ;;  %v5984_v50 = vld [vmem:[%s7971_s4 + $0x380] sm:$0xff]   ;;  %v7985_v9 = vrot.slane %v7214_v56, 4  ;;  %v5990_v56 = vld [vmem:[%s7971_s4 + $0x3d0] sm:$0xff]  }
 0x1e7   : > { %5499 = vmatpush3.bf16.msra.mxu1 %v5973_v18  ;;  %3873 = vmatprep.mubr.bf16.mxu1 %v3602_v59  ;;  %v5992_v59 = vld [vmem:[%s7971_s4 + $0x390] sm:$0xff]  }
 0x1e8   : > { %5538 = vmatprep.subr.bf16.mxu0 %v5974_v13  ;;  %5500 = vmatprep.subr.bf16.mxu1 %v5975_v1  ;;  %v3616_v18 = vsel %vm332_vm0, %v3607_v6, %v7985_v9  ;;  %v5988_v13 = vld [vmem:[%s7971_s4 + $0x388] sm:$0xff]   ;;  %v5989_v1 = vld [vmem:[%s7971_s4 + $0x310] sm:$0xff]   ;;  %v3610_v6 = vsel %vm332_vm0, %v3598_v61, %v3609_v45  ;;  %v7986_v61 = vrot.slane %v7401_v48, 4 }
 0x1e9   : > { %3479 = vmatmul.mubr.bf16.gmra.mrb[100].mxu0 %v2579_v17  ;;  %v5995_v17 = vld [vmem:[%s7971_s4 + $0x360] sm:$0xff]   ;;  %v6003_v48 = vld [vmem:[%s7971_s4 + $0x370] sm:$0xff]  }
 0x1ea   : > { %5539 = vmatpush3.bf16.msra.mxu0 %v5976_v44  ;;  %3938 = vmatprep.mubr.bf16.mxu0 %v3608_v24  ;;  %v3506_v44 = vor.u32 %v3504_v33, %v7377_v55  ;;  %v3617_v55 = vrot.slane %v7181_v58, 4  ;;  %v5997_v24 = vld [vmem:[%s7971_s4 + $0x320] sm:$0xff]   ;;  %v6008_v9 = vld [vmem:[%s7971_s4 + $0x3b0] sm:$0xff]  }
 0x1eb   : > { %5501 = vmatpush3.bf16.msra.mxu1 %v5977_v8  ;;  %5540 = vmatprep.subr.bf16.mxu0 %v5978_v52  ;;  %v5993_v8 = vld [vmem:[%s7971_s4 + $0x318] sm:$0xff]  }
 0x1ec   : > { %5566 = vmatprep.subr.bf16.mxu1 %v5980_v30  ;;  %v5994_v52 = vld [vmem:[%s7971_s4 + $0x3d8] sm:$0xff]   ;;  %v3627_v30 = vrot.slane %v3506_v44, 4  ;;  %v3618_v7 = vsel %vm332_vm0, %v3609_v45, %v3617_v55  ;;  %v7989_v45 = vrot.slane %v7429_v0, 4  ;;  %v4086_v0 = vrot.slane %v7163_v38, 6 }
 0x1ed   : > { %v4097_v38 = vrot.slane %v7178_v40, 6  ;;  %v6016_v40 = vld [vmem:[%s7971_s4 + $0x420] sm:$0xff]   ;;  %v4119_v44 = vrot.slane %v7580_v46, 6  ;;  %v4113_v46 = vrot.slane %v7365_v63, 6 }
 0x1ee   : > { %5541 = vmatpush3.bf16.msra.mxu0 %v5979_v26  ;;  %3874 = vmatmul.mubr.bf16.vlgmr.msra.gmra.mrb[96].mxu1 %v3599_v22  ;;  %v3631_v26 = vrot.slane %v7423_v29, 4  ;;  %v6002_v29 = vld [vmem:[%s7971_s4 + $0x3e8] sm:$0xff]   ;;  %v7987_v22 = vrot.slane %v7447_v21, 4 }
 0x1ef   : > { %5567 = vmatpush3.bf16.msra.mxu1 %v5981_v11  ;;  %3881 = vmatprep.mubr.bf16.mxu1 %v3612_v34  ;;  %v3628_v11 = vsel %vm332_vm0, %v7986_v61, %v3627_v30  ;;  %v3625_v34 = vrot.slane %v7229_v2, 4  ;;  %v6006_v2 = vld [vmem:[%s7971_s4 + $0x3f0] sm:$0xff]  }
 0x1f0   : > { %5606 = vmatprep.subr.bf16.mxu0 %v5982_v16  ;;  %5568 = vmatprep.subr.bf16.mxu1 %v5983_v54  ;;  %v6000_v16 = vld [vmem:[%s7971_s4 + $0x3a0] sm:$0xff]   ;;  %v6001_v54 = vld [vmem:[%s7971_s4 + $0x328] sm:$0xff]   ;;  %v3632_v35 = vsel %vm332_vm0, %v7987_v22, %v3631_v26 }
 0x1f1   : > { %3939 = vmatmul.mubr.bf16.vlgmr.msra.gmra.mrb[104].mxu0 %v7383_v27  ;;  %v5991_v27 = vld [vmem:[%s7971_s4 + $0x358] sm:$0xff]  }
 0x1f2   : > { %3946 = vmatprep.mubr.bf16.mxu0 %v3616_v18  ;;  %5607 = vmatpush3.bf16.msra.mxu0 %v5984_v50  ;;  %v6004_v50 = vld [vmem:[%s7971_s4 + $0x3a8] sm:$0xff]   ;;  %v6010_v18 = vld [vmem:[%s7971_s4 + $0x3f8] sm:$0xff]  }
 0x1f3   : > { %5569 = vmatpush3.bf16.msra.mxu1 %v5985_v19  ;;  %5608 = vmatprep.subr.bf16.mxu0 %v5986_v62  ;;  %v6005_v19 = vld [vmem:[%s7971_s4 + $0x330] sm:$0xff]   ;;  %v6007_v62 = vld [vmem:[%s7971_s4 + $0x378] sm:$0xff]  }
 0x1f4   : > { %5570 = vmatprep.subr.bf16.mxu1 %v5987_v51  ;;  %v3626_v51 = vsel %vm332_vm0, %v3617_v55, %v3625_v34 }
 0x1f6   : > { %5609 = vmatpush3.bf16.msra.mxu0 %v5988_v13  ;;  %3882 = vmatmul.mubr.bf16.gmra.mrb[100].mxu1 %v3610_v6  ;;  %v3996_v6 = vshrl.u32 %v7483_v25, 16  ;;  %v6025_v25 = vld [vmem:[#allocation3 + $0x18] sm:$0xff] }
 0x1f7   : > { %5571 = vmatpush3.bf16.msra.mxu1 %v5989_v1  ;;  %3889 = vmatprep.mubr.bf16.mxu1 %v7421_v36  ;;  %v5996_v36 = vld [vmem:[%s7971_s4 + $0x398] sm:$0xff]   ;;  %v6012_v1 = vld [vmem:[%s7971_s4 + $0x400] sm:$0xff]  }
 0x1f8   : > { %5610 = vmatprep.subr.bf16.mxu0 %v5990_v56  ;;  %5572 = vmatprep.subr.bf16.mxu1 %v5991_v27  ;;  %v6011_v56 = vld [vmem:[%s7971_s4 + $0x3b8] sm:$0xff]   ;;  %v6013_v27 = vld [vmem:[%s7971_s4 + $0x408] sm:$0xff]  }
 0x1f9   : > { %3947 = vmatmul.mubr.bf16.gmra.mrb[108].mxu0 %v7386_v57  ;;  %v5998_v57 = vld [vmem:[%s7971_s4 + $0x3e0] sm:$0xff]  }
 0x1fa   : > { %3954 = vmatprep.mubr.bf16.mxu0 %v7478_v53  ;;  %5611 = vmatpush3.bf16.msra.mxu0 %v5992_v59  ;;  %v5999_v53 = vld [vmem:[%s7971_s4 + $0x368] sm:$0xff]   ;;  %v3998_v59 = vor.u32 %v3996_v6, %v7532_v4 }
 0x1fb   : > { %5573 = vmatpush3.bf16.msra.mxu1 %v5993_v8  ;;  %5612 = vmatprep.subr.bf16.mxu0 %v5994_v52  ;;  %v6017_v4 = vld [vmem:[%s7971_s4 + $0x428] sm:$0xff]   ;;  %v6019_v8 = vld [vmem:[%s7971_s4 + $0x438] sm:$0xff]  }
 0x1fc   : > { %5574 = vmatprep.subr.bf16.mxu1 %v5995_v17 }
 0x1fe   : > { %5613 = vmatpush3.bf16.msra.mxu0 %v5996_v36  ;;  %3890 = vmatmul.mubr.bf16.gmra.mrb[104].mxu1 %v3618_v7 }
 0x1ff   : > { %5575 = vmatpush3.bf16.msra.mxu1 %v5997_v24  ;;  %3897 = vmatprep.mubr.bf16.mxu1 %v3628_v11 }
 0x200   : > { %5614 = vmatprep.subr.bf16.mxu0 %v5998_v57  ;;  %5576 = vmatprep.subr.bf16.mxu1 %v5999_v53 }
 0x201   : > { %3955 = vmatmul.mubr.bf16.gmra.mrb[112].mxu0 %v7455_v28  ;;  %v7988_v28 = vrot.slane %v7350_v60, 1  ;;  %v6009_v60 = vld [vmem:[%s7971_s4 + $0x338] sm:$0xff]  }
 0x202   : > { %3962 = vmatprep.mubr.bf16.mxu0 %v3632_v35  ;;  %5615 = vmatpush3.bf16.msra.mxu0 %v6000_v16 }
 0x203   : > { %5577 = vmatpush3.bf16.msra.mxu1 %v6001_v54  ;;  %5616 = vmatprep.subr.bf16.mxu0 %v6002_v29  ;;  %v3629_v21 = vrot.slane %v7988_v28, 4 }
 0x204   : > { %5578 = vmatprep.subr.bf16.mxu1 %v6003_v48 }
 0x205   : > { %v3630_v13 = vsel %vm332_vm0, %v7989_v45, %v3629_v21 }
 0x206   : > { %5617 = vmatpush3.bf16.msra.mxu0 %v6004_v50  ;;  %3898 = vmatmul.mubr.bf16.gmra.mrb[108].mxu1 %v3626_v51 }
 0x207   : > { %5579 = vmatpush3.bf16.msra.mxu1 %v6005_v19  ;;  %4361 = vmatprep.mubr.bf16.mxu1 %v7514_v39  ;;  %v4085_v39 = vrot.slane %v7403_v12, 6  ;;  %v6014_v12 = vld [vmem:[%s7971_s4 + $0x410] sm:$0xff]  }
 0x208   : > { %5618 = vmatprep.subr.bf16.mxu0 %v6006_v2  ;;  %5580 = vmatprep.subr.bf16.mxu1 %v6007_v62 }
 0x209   : > { %3963 = vmatmul.mubr.bf16.gmra.mrb[116].mxu0 %v3630_v13  ;;  %v4087_v33 = vsel %vm1932_vm5, %v4085_v39, %v4086_v0 }
 0x20a   : > { %5619 = vmatpush3.bf16.msra.mxu0 %v6008_v9  ;;  %4426 = vmatprep.mubr.bf16.mxu0 %v7537_v32  ;;  %v6015_v32 = vld [vmem:[%s7971_s4 + $0x418] sm:$0xff]  }
 0x20b   : > { %5581 = vmatpush3.bf16.msra.mxu1 %v6009_v60  ;;  %5620 = vmatprep.subr.bf16.mxu0 %v6010_v18 }
 0x20c   : > { %5682 = vmatprep.subr.bf16.mxu1 %v6012_v1 }
 0x20e   : > { %5621 = vmatpush3.bf16.msra.mxu0 %v6011_v56  ;;  %4362 = vmatmul.mubr.bf16.vlgmr.msra.gmra.mrb[112].mxu1 %v4087_v33 }
 0x20f   : > { %5683 = vmatpush3.bf16.msra.mxu1 %v6012_v1  ;;  %4369 = vmatprep.mubr.bf16.mxu1 %v7497_v31  ;;  %v4098_v31 = vsel %vm1932_vm5, %v4086_v0, %v4097_v38 }
 0x210   : > { %5684 = vmatprep.subr.bf16.mxu1 %v6013_v27 }
 0x211   : > { %4427 = vmatmul.mubr.bf16.vlgmr.msra.gmra.mrb[120].mxu0 %v7517_v3  ;;  %v4105_v3 = vrot.slane %v7181_v58, 6  ;;  %v6018_v58 = vld [vmem:[%s7971_s4 + $0x430] sm:$0xff]  }
 0x212   : > { %4434 = vmatprep.mubr.bf16.mxu0 %v7530_v14  ;;  %v4115_v14 = vrot.slane %v3998_v59, 6 }
 0x213   : > { %5685 = vmatpush3.bf16.msra.mxu1 %v6013_v27  ;;  %v4114_v52 = vsel %vm1932_vm5, %v4105_v3, %v4113_v46 }
 0x214   : > { %5686 = vmatprep.subr.bf16.mxu1 %v6014_v12 }
 0x216   : > { %4370 = vmatmul.mubr.bf16.gmra.mrb[116].mxu1 %v4098_v31 }
 0x217   : > { %5687 = vmatpush3.bf16.msra.mxu1 %v6014_v12  ;;  %4377 = vmatprep.mubr.bf16.mxu1 %v7578_v5  ;;  %v4106_v5 = vsel %vm1932_vm5, %v4097_v38, %v4105_v3 }
 0x218   : > { %5688 = vmatprep.subr.bf16.mxu1 %v6015_v32 }
 0x219   : > { %4435 = vmatmul.mubr.bf16.gmra.mrb[124].mxu0 %v7540_v20  ;;  %v4116_v20 = vsel %vm1932_vm5, %v4107_v49, %v4115_v14  ;;  %v4117_v49 = vrot.slane %v7990_v15, 6 }
 0x21a   : > { %4442 = vmatprep.mubr.bf16.mxu0 %v7620_v41  ;;  %v4120_v41 = vsel %vm1932_vm5, %v4111_v23, %v4119_v44 }
 0x21b   : > { %5689 = vmatpush3.bf16.msra.mxu1 %v6015_v32  ;;  %v4118_v63 = vsel %vm1932_vm5, %v4109_v42, %v4117_v49 }
 0x21c   : > { %5690 = vmatprep.subr.bf16.mxu1 %v6016_v40 }
 0x21e   : > { %4378 = vmatmul.mubr.bf16.gmra.mrb[120].mxu1 %v4106_v5 }
 0x21f   : > { %5691 = vmatpush3.bf16.msra.mxu1 %v6016_v40  ;;  %4385 = vmatprep.mubr.bf16.mxu1 %v4116_v20 }
 0x220   : > { %5692 = vmatprep.subr.bf16.mxu1 %v6017_v4 }
 0x221   : > { %4443 = vmatmul.mubr.bf16.gmra.mrb[128].mxu0 %v7600_v37  ;;  %v6023_v37 = vld [vmem:[#allocation3 + $0x8] sm:$0xff] }
 0x222   : > { %4450 = vmatprep.mubr.bf16.mxu0 %v4120_v41 }
 0x223   : > { %5693 = vmatpush3.bf16.msra.mxu1 %v6017_v4 }
 0x224   : > { %5694 = vmatprep.subr.bf16.mxu1 %v6018_v58 }
 0x226   : > { %4386 = vmatmul.mubr.bf16.gmra.mrb[124].mxu1 %v4114_v52 }
 0x227   : > { %5695 = vmatpush3.bf16.msra.mxu1 %v6018_v58  ;;  %5698 = vmatprep.mubr.bf16.mxu1 %v6023_v37 }
 0x228   : > { %5696 = vmatprep.subr.bf16.mxu1 %v6019_v8 }
 0x229   : > { %4451 = vmatmul.mubr.bf16.gmra.mrb[132].mxu0 %v4118_v63 }
 0x22b   : > { %5697 = vmatpush3.bf16.msra.mxu1 %v6019_v8 }
 0x22e   : > { %5699 = vmatmul.mubr.bf16.vlgmr.msra.gmra.mrb[128].mxu1 %v6024_v47 }
 0x22f   : > { %5702 = vmatprep.mubr.bf16.mxu1 %v6025_v25 }
 0x236   : > { %5703 = vmatmul.mubr.bf16.gmra.mrb[132].mxu1 %v7499_v43 }
 0x281   : > { %v5342_v23 = vpop.f32.mrb[64].mxu1 }
 0x282   : > { %v5343_v17 = vpop.f32.mrb[65].mxu1 }
 0x283   : > { %v5344_v55 = vadd.f32 %v5343_v17, %v5342_v23  ;;  %v5345_v36 = vpop.f32.mrb[66].mxu1 }
 0x284   : > { %v5382_v30 = vpop.f32.mrb[72].mxu0  ;;  %v5346_v24 = vpop.f32.mrb[67].mxu1 }
 0x285   : > { %v5347_v57 = vadd.f32 %v5346_v24, %v5345_v36  ;;  %v5383_v53 = vpop.f32.mrb[73].mxu0 }
 0x286   : > { %v5384_v10 = vadd.f32 %v5383_v53, %v5382_v30  ;;  %v5385_v7 = vpop.f32.mrb[74].mxu0 }
 0x287   : > { %v5386_v42 = vpop.f32.mrb[75].mxu0 }
 0x288   : > { %v3135_v26 = vadd.f32 %v5384_v10, %v5344_v55  ;;  %v5387_v61 = vadd.f32 %v5386_v42, %v5385_v7 }
 0x289   : > { %v5348_v11 = vpop.f32.mrb[68].mxu1 }
 0x28a   : > { %v3138_v16 = vadd.f32 %v5387_v61, %v5347_v57  ;;  %v5349_v54 = vpop.f32.mrb[69].mxu1 }
 0x28b   : > { %v5350_v29 = vadd.f32 %v5349_v54, %v5348_v11  ;;  %v5351_v48 = vpop.f32.mrb[70].mxu1 }
 0x28c   : > { %v5388_v22 = vpop.f32.mrb[76].mxu0  ;;  %v5352_v43 = vpop.f32.mrb[71].mxu1 }
 0x28d   : > { %v5353_v35 = vadd.f32 %v5352_v43, %v5351_v48  ;;  %v5389_v34 = vpop.f32.mrb[77].mxu0 }
 0x28e   : > { %v5390_v50 = vadd.f32 %v5389_v34, %v5388_v22  ;;  %v5391_v19 = vpop.f32.mrb[78].mxu0 }
 0x28f   : > { %v5392_v28 = vpop.f32.mrb[79].mxu0 }
 0x290   : > { %v3143_v21 = vadd.f32 %v5390_v50, %v5350_v29  ;;  %v5393_v2 = vadd.f32 %v5392_v28, %v5391_v19 }
 0x291   : > { %v5354_v62 = vpop.f32.mrb[72].mxu1 }
 0x292   : > { %v3146_v51 = vadd.f32 %v5393_v2, %v5353_v35  ;;  %v5355_v9 = vpop.f32.mrb[73].mxu1 }
 0x293   : > { %v5356_v60 = vadd.f32 %v5355_v9, %v5354_v62  ;;  %v5357_v18 = vpop.f32.mrb[74].mxu1 }
 0x294   : > { %v5394_v45 = vpop.f32.mrb[80].mxu0  ;;  %v5358_v13 = vpop.f32.mrb[75].mxu1 }
 0x295   : > { %v5359_v1 = vadd.f32 %v5358_v13, %v5357_v18  ;;  %v5395_v39 = vpop.f32.mrb[81].mxu0 }
 0x296   : > { %v5396_v56 = vadd.f32 %v5395_v39, %v5394_v45  ;;  %v5397_v0 = vpop.f32.mrb[82].mxu0 }
 0x297   : > { %v5398_v27 = vpop.f32.mrb[83].mxu0 }
 0x298   : > { %v3151_v33 = vadd.f32 %v5396_v56, %v5356_v60  ;;  %v5399_v12 = vadd.f32 %v5398_v27, %v5397_v0 }
 0x299   : > { %v5360_v38 = vpop.f32.mrb[76].mxu1 }
 0x29a   : > { %v3154_v32 = vadd.f32 %v5399_v12, %v5359_v1  ;;  %v5361_v6 = vpop.f32.mrb[77].mxu1 }
 0x29b   : > { %v5362_v31 = vadd.f32 %v5361_v6, %v5360_v38  ;;  %v5363_v59 = vpop.f32.mrb[78].mxu1 }
 0x29c   : > { %v5400_v40 = vpop.f32.mrb[84].mxu0  ;;  %v5364_v3 = vpop.f32.mrb[79].mxu1 }
 0x29d   : > { %v5365_v14 = vadd.f32 %v5364_v3, %v5363_v59  ;;  %v5401_v4 = vpop.f32.mrb[85].mxu0 }
 0x29e   : > { %v5402_v5 = vadd.f32 %v5401_v4, %v5400_v40  ;;  %v5403_v44 = vpop.f32.mrb[86].mxu0 }
 0x29f   : > { %v5404_v20 = vpop.f32.mrb[87].mxu0 }
 0x2a0   : > { %v3159_v58 = vadd.f32 %v5402_v5, %v5362_v31  ;;  %v5405_v41 = vadd.f32 %v5404_v20, %v5403_v44 }
 0x2a1   : > { %v5422_v46 = vpop.f32.mrb[80].mxu1 }
 0x2a2   : > { %v3162_v15 = vadd.f32 %v5405_v41, %v5365_v14  ;;  %v5423_v49 = vpop.f32.mrb[81].mxu1 }
 0x2a3   : > { %v5424_v8 = vadd.f32 %v5423_v49, %v5422_v46  ;;  %v5425_v52 = vpop.f32.mrb[82].mxu1 }
 0x2a4   : > { %v5462_v37 = vpop.f32.mrb[88].mxu0  ;;  %v5426_v63 = vpop.f32.mrb[83].mxu1 }
 0x2a5   : > { %v3392_v47 = vadd.f32 %v5424_v8, %v3135_v26  ;;  %v5427_v25 = vadd.f32 %v5426_v63, %v5425_v52  ;;  %v5463_v23 = vpop.f32.mrb[89].mxu0 }
 0x2a6   : > { %v5464_v17 = vadd.f32 %v5463_v23, %v5462_v37  ;;  %v5465_v55 = vpop.f32.mrb[90].mxu0 }
 0x2a7   : > { %v3395_v36 = vadd.f32 %v5427_v25, %v3138_v16  ;;  %v5466_v30 = vpop.f32.mrb[91].mxu0 }
 0x2a8   : > { %v7857_v24 = vadd.f32 %v5464_v17, %v3392_v47  ;;  %v5467_v57 = vadd.f32 %v5466_v30, %v5465_v55 }
 0x2a9   : > { %v5428_v53 = vpop.f32.mrb[84].mxu1 }
 0x2aa   : > { %v7859_v10 = vadd.f32 %v5467_v57, %v3395_v36  ;;  %v5429_v7 = vpop.f32.mrb[85].mxu1 }
 0x2ab   : > { %v5430_v42 = vadd.f32 %v5429_v7, %v5428_v53  ;;  %v5431_v61 = vpop.f32.mrb[86].mxu1 }
 0x2ac   : > { %v5468_v11 = vpop.f32.mrb[92].mxu0  ;;  %v5432_v54 = vpop.f32.mrb[87].mxu1 }
 0x2ad   : > { %v3400_v29 = vadd.f32 %v5430_v42, %v3143_v21  ;;  %v5433_v48 = vadd.f32 %v5432_v54, %v5431_v61  ;;  %v5469_v26 = vpop.f32.mrb[93].mxu0 }
 0x2ae   : > { %v5470_v22 = vadd.f32 %v5469_v26, %v5468_v11  ;;  %v5471_v43 = vpop.f32.mrb[94].mxu0 }
 0x2af   : > { %v3403_v35 = vadd.f32 %v5433_v48, %v3146_v51  ;;  %v5472_v34 = vpop.f32.mrb[95].mxu0 }
 0x2b0   : > { %v7861_v16 = vadd.f32 %v5470_v22, %v3400_v29  ;;  %v5473_v50 = vadd.f32 %v5472_v34, %v5471_v43 }
 0x2b1   : > { %v5434_v19 = vpop.f32.mrb[88].mxu1 }
 0x2b2   : > { %v7863_v28 = vadd.f32 %v5473_v50, %v3403_v35  ;;  %v5435_v2 = vpop.f32.mrb[89].mxu1 }
 0x2b3   : > { %v5436_v62 = vadd.f32 %v5435_v2, %v5434_v19  ;;  %v5437_v9 = vpop.f32.mrb[90].mxu1 }
 0x2b4   : > { %v5474_v60 = vpop.f32.mrb[96].mxu0  ;;  %v5438_v18 = vpop.f32.mrb[91].mxu1 }
 0x2b5   : > { %v3408_v45 = vadd.f32 %v5436_v62, %v3151_v33  ;;  %v5439_v13 = vadd.f32 %v5438_v18, %v5437_v9  ;;  %v5475_v21 = vpop.f32.mrb[97].mxu0 }
 0x2b6   : > { %v5476_v1 = vadd.f32 %v5475_v21, %v5474_v60  ;;  %v5477_v39 = vpop.f32.mrb[98].mxu0 }
 0x2b7   : > { %v3411_v56 = vadd.f32 %v5439_v13, %v3154_v32  ;;  %v5478_v0 = vpop.f32.mrb[99].mxu0 }
 0x2b8   : > { %v7865_v51 = vadd.f32 %v5476_v1, %v3408_v45  ;;  %v5479_v27 = vadd.f32 %v5478_v0, %v5477_v39 }
 0x2b9   : > { %v5440_v12 = vpop.f32.mrb[92].mxu1 }
 0x2ba   : > { %v7867_v38 = vadd.f32 %v5479_v27, %v3411_v56  ;;  %v5441_v6 = vpop.f32.mrb[93].mxu1 }
 0x2bb   : > { %v5442_v31 = vadd.f32 %v5441_v6, %v5440_v12  ;;  %v5443_v59 = vpop.f32.mrb[94].mxu1 }
 0x2bc   : > { %v5480_v40 = vpop.f32.mrb[100].mxu0  ;;  %v5444_v3 = vpop.f32.mrb[95].mxu1 }
 0x2bd   : > { %v3416_v14 = vadd.f32 %v5442_v31, %v3159_v58  ;;  %v5445_v4 = vadd.f32 %v5444_v3, %v5443_v59  ;;  %v5481_v33 = vpop.f32.mrb[101].mxu0 }
 0x2be   : > { %v5482_v5 = vadd.f32 %v5481_v33, %v5480_v40  ;;  %v5483_v44 = vpop.f32.mrb[102].mxu0 }
 0x2bf   : > { %v3419_v20 = vadd.f32 %v5445_v4, %v3162_v15  ;;  %v5484_v41 = vpop.f32.mrb[103].mxu0 }
 0x2c0   : > { %v7869_v32 = vadd.f32 %v5482_v5, %v3416_v14  ;;  %v5485_v46 = vadd.f32 %v5484_v41, %v5483_v44 }
 0x2c1   : > { %v5502_v49 = vpop.f32.mrb[96].mxu1 }
 0x2c2   : > { %v7871_v8 = vadd.f32 %v5485_v46, %v3419_v20  ;;  %v5503_v52 = vpop.f32.mrb[97].mxu1 }
 0x2c3   : > { %v5504_v37 = vadd.f32 %v5503_v52, %v5502_v49  ;;  %v5505_v63 = vpop.f32.mrb[98].mxu1 }
 0x2c4   : > { %v5542_v47 = vpop.f32.mrb[104].mxu0  ;;  %v5506_v25 = vpop.f32.mrb[99].mxu1 }
 0x2c5   : > { %v5507_v23 = vadd.f32 %v5506_v25, %v5505_v63  ;;  %v5543_v17 = vpop.f32.mrb[105].mxu0 }
 0x2c6   : > { %v5544_v58 = vadd.f32 %v5543_v17, %v5542_v47  ;;  %v5545_v55 = vpop.f32.mrb[106].mxu0 }
 0x2c7   : > { %v5546_v36 = vpop.f32.mrb[107].mxu0 }
 0x2c8   : > { %v3941_v30 = vadd.f32 %v5544_v58, %v5504_v37  ;;  %v5547_v57 = vadd.f32 %v5546_v36, %v5545_v55 }
 0x2c9   : > { %v5508_v15 = vpop.f32.mrb[100].mxu1 }
 0x2ca   : > { %v3944_v53 = vadd.f32 %v5547_v57, %v5507_v23  ;;  %v5509_v7 = vpop.f32.mrb[101].mxu1  ;;  %v7874_v42 = vadd.f32 %v3941_v30, %v7857_v24 }
 0x2cb   : > { %v5510_v61 = vadd.f32 %v5509_v7, %v5508_v15  ;;  %v5511_v11 = vpop.f32.mrb[102].mxu1 }
 0x2cc   : > { %v5548_v54 = vpop.f32.mrb[108].mxu0  ;;  %v5512_v29 = vpop.f32.mrb[103].mxu1  ;;  %v7877_v48 = vadd.f32 %v3944_v53, %v7859_v10 }
 0x2cd   : > { %v5513_v26 = vadd.f32 %v5512_v29, %v5511_v11  ;;  %v5549_v22 = vpop.f32.mrb[109].mxu0 }
 0x2ce   : > { %v5550_v43 = vadd.f32 %v5549_v22, %v5548_v54  ;;  %v5551_v35 = vpop.f32.mrb[110].mxu0 }
 0x2cf   : > { %v5552_v34 = vpop.f32.mrb[111].mxu0 }
 0x2d0   : > { %v3949_v50 = vadd.f32 %v5550_v43, %v5510_v61  ;;  %v5553_v19 = vadd.f32 %v5552_v34, %v5551_v35 }
 0x2d1   : > { %v5514_v2 = vpop.f32.mrb[104].mxu1 }
 0x2d2   : > { %v3952_v62 = vadd.f32 %v5553_v19, %v5513_v26  ;;  %v5515_v9 = vpop.f32.mrb[105].mxu1  ;;  %v7880_v24 = vadd.f32 %v3949_v50, %v7861_v16 }
 0x2d3   : > { %v5516_v60 = vadd.f32 %v5515_v9, %v5514_v2  ;;  %v5517_v18 = vpop.f32.mrb[106].mxu1 }
 0x2d4   : > { %v5554_v45 = vpop.f32.mrb[112].mxu0  ;;  %v5518_v13 = vpop.f32.mrb[107].mxu1  ;;  %v7883_v10 = vadd.f32 %v3952_v62, %v7863_v28 }
 0x2d5   : > { %v5519_v21 = vadd.f32 %v5518_v13, %v5517_v18  ;;  %v5555_v1 = vpop.f32.mrb[113].mxu0 }
 0x2d6   : > { %v5556_v39 = vadd.f32 %v5555_v1, %v5554_v45  ;;  %v5557_v56 = vpop.f32.mrb[114].mxu0 }
 0x2d7   : > { %v5558_v0 = vpop.f32.mrb[115].mxu0 }
 0x2d8   : > { %v3957_v27 = vadd.f32 %v5556_v39, %v5516_v60  ;;  %v5559_v12 = vadd.f32 %v5558_v0, %v5557_v56 }
 0x2d9   : > { %v5520_v6 = vpop.f32.mrb[108].mxu1 }
 0x2da   : > { %v3960_v31 = vadd.f32 %v5559_v12, %v5519_v21  ;;  %v5521_v59 = vpop.f32.mrb[109].mxu1  ;;  %v7886_v16 = vadd.f32 %v3957_v27, %v7865_v51 }
 0x2db   : > { %v5522_v40 = vadd.f32 %v5521_v59, %v5520_v6  ;;  %v5523_v3 = vpop.f32.mrb[110].mxu1 }
 0x2dc   : > { %v5560_v14 = vpop.f32.mrb[116].mxu0  ;;  %v5524_v4 = vpop.f32.mrb[111].mxu1  ;;  %v7889_v28 = vadd.f32 %v3960_v31, %v7867_v38 }
 0x2dd   : > { %v5525_v33 = vadd.f32 %v5524_v4, %v5523_v3  ;;  %v5561_v5 = vpop.f32.mrb[117].mxu0 }
 0x2de   : > { %v5562_v44 = vadd.f32 %v5561_v5, %v5560_v14  ;;  %v5563_v20 = vpop.f32.mrb[118].mxu0 }
 0x2df   : > { %v5564_v41 = vpop.f32.mrb[119].mxu0 }
 0x2e0   : > { %v3965_v46 = vadd.f32 %v5562_v44, %v5522_v40  ;;  %v5565_v49 = vadd.f32 %v5564_v41, %v5563_v20 }
 0x2e1   : > { %v5582_v52 = vpop.f32.mrb[112].mxu1 }
 0x2e2   : > { %v3968_v37 = vadd.f32 %v5565_v49, %v5525_v33  ;;  %v5583_v63 = vpop.f32.mrb[113].mxu1  ;;  %v7892_v51 = vadd.f32 %v3965_v46, %v7869_v32 }
 0x2e3   : > { %v5584_v47 = vadd.f32 %v5583_v63, %v5582_v52  ;;  %v5585_v25 = vpop.f32.mrb[114].mxu1  ;;  %v4606_v63 = vld [vmem:[%s6279_s22 + $0x10] sm:$0xff] }
 0x2e4   : > { %v5622_v23 = vpop.f32.mrb[120].mxu0  ;;  %v5586_v17 = vpop.f32.mrb[115].mxu1  ;;  %v7895_v38 = vadd.f32 %v3968_v37, %v7871_v8 }
 0x2e5   : > { %v5587_v58 = vadd.f32 %v5586_v17, %v5585_v25  ;;  %v5623_v55 = vpop.f32.mrb[121].mxu0  ;;  %v4604_v17 = vld [vmem:[%s6279_s22] sm:$0xff] }
 0x2e6   : > { %v5624_v36 = vadd.f32 %v5623_v55, %v5622_v23  ;;  %v5625_v30 = vpop.f32.mrb[122].mxu0 }
 0x2e7   : > { %v5626_v57 = vpop.f32.mrb[123].mxu0 }
 0x2e8   : > { %v4429_v15 = vadd.f32 %v5624_v36, %v5584_v47  ;;  %v5627_v53 = vadd.f32 %v5626_v57, %v5625_v30  ;;  %v4607_v36 = vld [vmem:[%s6279_s22 + $0x18] sm:$0xff] }
 0x2e9   : > { %v5588_v7 = vpop.f32.mrb[116].mxu1 }
 0x2ea   : > { %v4432_v61 = vadd.f32 %v5627_v53, %v5587_v58  ;;  %v5589_v11 = vpop.f32.mrb[117].mxu1  ;;  %v4459_v32 = vadd.f32 %v4429_v15, %v7874_v42  ;;  %v4605_v53 = vld [vmem:[%s6279_s22 + $0x8] sm:$0xff] }
 0x2eb   : > { %v5590_v54 = vadd.f32 %v5589_v11, %v5588_v7  ;;  %v5591_v29 = vpop.f32.mrb[118].mxu1 }
 0x2ec   : > { %v5628_v26 = vpop.f32.mrb[124].mxu0  ;;  %v5592_v22 = vpop.f32.mrb[119].mxu1  ;;  %v4460_v43 = vadd.f32 %v4432_v61, %v7877_v48 }
 0x2ed   : > { %v5593_v8 = vadd.f32 %v5592_v22, %v5591_v29  ;;  %v5629_v35 = vpop.f32.mrb[125].mxu0  ;;  %v4610_v29 = vld [vmem:[%s6279_s22 + $0x30] sm:$0xff] }
 0x2ee   : > { %v5630_v34 = vadd.f32 %v5629_v35, %v5628_v26  ;;  %v5631_v50 = vpop.f32.mrb[126].mxu0 }
 0x2ef   : > { %v5632_v19 = vpop.f32.mrb[127].mxu0 }
 0x2f0   : > { %v4437_v2 = vadd.f32 %v5630_v34, %v5590_v54  ;;  %v5633_v62 = vadd.f32 %v5632_v19, %v5631_v50 }
 0x2f1   : > { %v5594_v9 = vpop.f32.mrb[120].mxu1 }
 0x2f2   : > { %v4440_v60 = vadd.f32 %v5633_v62, %v5593_v8  ;;  %v5595_v18 = vpop.f32.mrb[121].mxu1  ;;  %v4461_v45 = vadd.f32 %v4437_v2, %v7880_v24  ;;  %v4608_v8 = vld [vmem:[%s6279_s22 + $0x20] sm:$0xff]  ;;  %v4609_v2 = vld [vmem:[%s6279_s22 + $0x28] sm:$0xff] }
 0x2f3   : > { %v5596_v13 = vadd.f32 %v5595_v18, %v5594_v9  ;;  %v5597_v42 = vpop.f32.mrb[122].mxu1 }
 0x2f4   : > { %v5634_v21 = vpop.f32.mrb[128].mxu0  ;;  %v5598_v1 = vpop.f32.mrb[123].mxu1  ;;  %v4462_v39 = vadd.f32 %v4440_v60, %v7883_v10 }
 0x2f5   : > { %v5599_v56 = vadd.f32 %v5598_v1, %v5597_v42  ;;  %v5635_v48 = vpop.f32.mrb[129].mxu0 }
 0x2f6   : > { %v5636_v0 = vadd.f32 %v5635_v48, %v5634_v21  ;;  %v5637_v27 = vpop.f32.mrb[130].mxu0 }
 0x2f7   : > { %v5638_v12 = vpop.f32.mrb[131].mxu0 }
 0x2f8   : > { %v4445_v6 = vadd.f32 %v5636_v0, %v5596_v13  ;;  %v5639_v31 = vadd.f32 %v5638_v12, %v5637_v27 }
 0x2f9   : > { %v5600_v59 = vpop.f32.mrb[124].mxu1 }
 0x2fa   : > { %v4448_v40 = vadd.f32 %v5639_v31, %v5599_v56  ;;  %v5601_v3 = vpop.f32.mrb[125].mxu1  ;;  %v4463_v24 = vadd.f32 %v4445_v6, %v7886_v16 }
 0x2fb   : > { %v5602_v14 = vadd.f32 %v5601_v3, %v5600_v59  ;;  %v5603_v4 = vpop.f32.mrb[126].mxu1 }
 0x2fc   : > { %v5640_v33 = vpop.f32.mrb[132].mxu0  ;;  %v5604_v5 = vpop.f32.mrb[127].mxu1  ;;  %v4464_v10 = vadd.f32 %v4448_v40, %v7889_v28 }
 0x2fd   : > { %v5605_v44 = vadd.f32 %v5604_v5, %v5603_v4  ;;  %v5641_v20 = vpop.f32.mrb[133].mxu0 }
 0x2fe   : > { %v5642_v41 = vadd.f32 %v5641_v20, %v5640_v33  ;;  %v5643_v46 = vpop.f32.mrb[134].mxu0 }
 0x2ff   : > { %v5644_v49 = vpop.f32.mrb[135].mxu0 }
 0x300   : > { %v4453_v52 = vadd.f32 %v5642_v41, %v5602_v14  ;;  %v5645_v37 = vadd.f32 %v5644_v49, %v5643_v46 }
 0x301   : > { %v5700_v16 = vpop.f32.mrb[128].mxu1 }
 0x302   : > { %v4456_v47 = vadd.f32 %v5645_v37, %v5605_v44  ;;  %v4598_v25 = vadd.f32 %v5700_v16, %v4461_v45  ;;  %v4565_v23 = vpop.f32.mrb[129].mxu1  ;;  %v4465_v28 = vadd.f32 %v4453_v52, %v7892_v51 }
 0x303   : > { %v4596_v58 = vadd.f32 %v4565_v23, %v4459_v32  ;;  %v5701_v55 = vpop.f32.mrb[130].mxu1 }
 0x304   : > { %v4614_v30 = vadd.f32 %v4606_v63, %v4598_v25  ;;  %v4599_v57 = vadd.f32 %v5701_v55, %v4462_v39  ;;  %v4568_v15 = vpop.f32.mrb[131].mxu1  ;;  %v4466_v7 = vadd.f32 %v4456_v47, %v7895_v38  ;;  %v4611_v38 = vld [vmem:[%s6279_s22 + $0x38] sm:$0xff]  ;;  %s6028_s22 = scalar_lea.vmem %s7922_s29, 1024 }
 0x305   : > { %v4612_v61 = vadd.f32 %v4604_v17, %v4596_v58  ;;  %v4597_v11 = vadd.f32 %v4568_v15, %v4460_v43  ;;  %p6029_p11 = scmp.ne.s32.totalorder %s7922_s29, %s6028_s22  ;;  %p6036_p1 = scmp.lt.s32.totalorder %s6034_s16, %s6028_s22 }
 0x306   : > { %4622 = vst [vmem:[%s271_s17 + $0x10] sm:$0xff] %v4614_v30  ;;  %v4615_v54 = vadd.f32 %v4607_v36, %v4599_v57 }
 0x307   : > { %4620 = vst [vmem:[%s271_s17] sm:$0xff] %v4612_v61  ;;  %v4613_v51 = vadd.f32 %v4605_v53, %v4597_v11  ;;  %p6030_p12 = pnand %p6029_p11, %p6174_p5  ;;  %p6037_p2 = por %p6036_p1, %p6035_p0 }
 0x308   : > { %4623 = vst [vmem:[%s271_s17 + $0x18] sm:$0xff] %v4615_v54 }
 0x309   : > { %4621 = vst [vmem:[%s271_s17 + $0x8] sm:$0xff] %v4613_v51  ;;  %v5704_v32 = vpop.f32.mrb[132].mxu1  ;;  %p6031_p13 = pneg %p6030_p12 }
 0x30a   : > { %v4602_v26 = vadd.f32 %v5704_v32, %v4465_v28  ;;  %v4581_v22 = vpop.f32.mrb[133].mxu1 }
 0x30b   : > { %v4600_v35 = vadd.f32 %v4581_v22, %v4463_v24  ;;  %v5705_v34 = vpop.f32.mrb[134].mxu1  ;;  %p6038_p3 = pnand %p6037_p2, %p6031_p13 }
 0x30c   : > { %v4618_v43 = vadd.f32 %v4610_v29, %v4602_v26  ;;  %v4603_v50 = vadd.f32 %v5705_v34, %v4466_v7  ;;  %v4584_v19 = vpop.f32.mrb[135].mxu1 }
 0x30d   : > { %v4616_v62 = vadd.f32 %v4608_v8, %v4600_v35  ;;  %v4601_v9 = vadd.f32 %v4584_v19, %v4464_v10 }
 0x30e   : > { %4626 = vst [vmem:[%s271_s17 + $0x30] sm:$0xff] %v4618_v43  ;;  %v4619_v60 = vadd.f32 %v4611_v38, %v4603_v50 }
 0x30f   : > { %4624 = vst [vmem:[%s271_s17 + $0x20] sm:$0xff] %v4616_v62  ;;  %v4617_v18 = vadd.f32 %v4609_v2, %v4601_v9 }
 0x310   : > { %4627 = vst [vmem:[%s271_s17 + $0x38] sm:$0xff] %v4619_v60 }
 0x311   : > { %4625 = vst [vmem:[%s271_s17 + $0x28] sm:$0xff] %v4617_v18 }
 0x312   : > { %6041 = shalt.err (!%p6038_p3)
}
 0x313   : > { %s6042_s18 = scalar_lea.hbm %s7920_s13, 1024  ;;  %s6046_s21 = scalar_lea.hbm %s7974_s7, 2048 }
 0x314   : > { %p6043_p4 = scmp.ne.s32.totalorder %s7920_s13, %s6042_s18  ;;  %p6047_p9 = scmp.lt.u32.totalorder %s7920_s13, %s7974_s7 }
 0x315   : > { %p6048_p10 = scmp.lt.u32.totalorder %s6046_s21, %s6042_s18  ;;  %p6050_p12 = scmp.lt.u32.totalorder %s6042_s18, %s7920_s13 }
 0x316   : > { %p6044_p7 = pnand %p6043_p4, %p6174_p5 }
 0x317   : > { %p6049_p11 = por %p6048_p10, %p6047_p9 }
 0x318   : > { %p6045_p8 = pneg %p6044_p7 }
 0x319   : > { %p6051_p13 = por %p6050_p12, %p6049_p11 }
 0x31b   : > { %p6052_p0 = pnand %p6051_p13, %p6045_p8 }
 0x31d   : > { %6055 = shalt.err (!%p6052_p0)
}
 0x31e   : > { %s6094_s8 = smov 128   ;;  %s6095_s9 = smov 8  }
 0x31f   : > { %5706 = dma.vmem_to_hbm [thread:$0]  (%p6174_p5), %s7922_s29, 1024, %s7920_s13, %s7926_s28, %s6094_s8, %s6094_s8, %s6095_s9  }
 0x320 PF: > { %p5712_p1 = scmp.ge.s32.totalorder %s6090_s27, 2  ;;  %s4657_s22 = sand.u32 1, %s6078_s24  }
 0x321   : > { %s4658_s14 = scalar_lea.sflag [#allocation5], %s4657_s22 }
 0x322   : > { %p5709_p2 = pnand %p5712_p1, %p6178_p6 }
 0x324   : > { %6073 = dma.done.wait (!%p5709_p2), %s4658_s14, 1024  }
 0x325   : > { %6075 = vsyncadd (!%p5709_p2), %s4658_s14, 4294966272  ;;  %p17_p3 = scmp.ge.s32.totalorder %s6161_s30, 4   ;;  %s7991_s24 = smov %s6082_s25 }
 0x326   : > { %s7992_s25 = smov %s6086_s26  ;;  %s7993_s26 = smov %s6172_s10 }
 0x327   : > { %s7994_s27 = smov %s6161_s30  ;;  %19 = sbr.rel (!%p17_p3) target bundleno = 3 (0x3), region = 83 }
 0x32e   :  { %4663 = vsyncpa [#allocation5], 1 }
 0x32f   :  { %4665 = vsyncpa [#allocation5 + $0x1], 1 }

</bundles_post_ra>
